<compile_context>
chip_gen: v5e
topology: v5e:2x2
jax: 0.10.0
libtpu: 0.0.40
codegen_flags: <defaults>
</compile_context>

<pallas_src>
import functools
import math

import jax
import jax.numpy as jnp
from jax.experimental import pallas as pl
from jax.experimental.pallas import tpu as pltpu

# ----------------------------- configuration --------------------------------
NUM_TOKENS = 16
EMBED = 32
PAD_IDX = 0
NUM_HEADS = 4
HEAD_DIM = EMBED // NUM_HEADS
FF_HIDDEN = 64
NUM_BLOCKS = 2
NUM_WAVELENGTHS = 16
MAX_SEQ_LEN = 32
LN_EPS = 1e-5
NEG_INF = -1e30  # finite stand-in for -inf (same softmax result with >=1 valid key)

WEIGHT_KEYS = (
    "emb", "thick_w", "thick_b",
    "wqkv", "bqkv", "wo", "bo",
    "ln1_g", "ln1_b", "w1", "b1", "w2", "b2", "ln2_g", "ln2_b",
    "head_w1", "head_b1", "head_w2", "head_b2",
)


# ------------------------------ kernel helpers -------------------------------
def _layer_norm(x, gamma, beta):
    mu = jnp.mean(x, axis=-1, keepdims=True)
    var = jnp.mean((x - mu) ** 2, axis=-1, keepdims=True)
    return (x - mu) * jax.lax.rsqrt(var + LN_EPS) * gamma + beta


def _bf16(x):
    return x.astype(jnp.bfloat16)


# ------------------------------ fused kernel ---------------------------------
def fused_forward_kernel(
    # data inputs (blocked over the batch grid)
    matcol_ref, thickcol_ref, mask_ref, pos_ref,
    # weights (full-shape, constant index maps -> VMEM resident)
    emb_ref, tw_ref, tb_ref,
    wqkv_ref, bqkv_ref, wo_ref, bo_ref,
    ln1g_ref, ln1b_ref, w1_ref, b1_ref, w2_ref, b2_ref, ln2g_ref, ln2b_ref,
    hw1_ref, hb1_ref, hw2_ref, hb2_ref,
    # output
    o_ref,
    *, tile_b, seq, num_heads, num_blocks,
):
    B, S, E, H = tile_b, seq, EMBED, num_heads
    dh = E // H
    BS = B * S
    W = NUM_WAVELENGTHS

    # ---- input embedding: one-hot gather as a single MXU matmul -------------
    mat_col = matcol_ref[...]                                     # (BS, 1) i32
    tok_iota = jax.lax.broadcasted_iota(jnp.int32, (BS, NUM_TOKENS), 1)
    one_hot = (tok_iota == mat_col).astype(jnp.bfloat16)          # (BS, T)
    mat_emb = jnp.dot(one_hot, emb_ref[...],
                      preferred_element_type=jnp.float32)         # (BS, E)

    thick_enc = thickcol_ref[...] * tw_ref[...] + tb_ref[...]     # (BS, E)

    # positional encoding passed once as (S, E); broadcast over the batch block
    x = mat_emb + thick_enc
    x = (x.reshape(B, S, E) + pos_ref[...][None, :, :]).reshape(BS, E)

    # ---- padding mask & pooling denominator ----------------------------------
    mask3 = mask_ref[...]                                         # (B, 1, S) additive
    denom = jnp.sum((mask3 == 0.0).astype(jnp.float32), axis=-1)  # (B, 1) non-pad count

    # ---- encoder blocks (statically unrolled, post-norm) ---------------------
    for blk in range(num_blocks):
        x_bf = _bf16(x)
        # fused QKV projection: one (E, 3E) matmul per block, bias added once.
        # 1/sqrt(dh) is pre-folded into the Q columns of Wqkv / bqkv.
        qkv = jnp.dot(x_bf, wqkv_ref[blk],
                      preferred_element_type=jnp.float32) + bqkv_ref[blk]   # (BS, 3E)

        ctx_heads = []
        for h in range(H):   # per-head loop: only tiny VPU/MXU einsums, no projections
            q3 = qkv[:, h * dh:(h + 1) * dh].reshape(B, S, dh)
            k3 = qkv[:, E + h * dh:E + (h + 1) * dh].reshape(B, S, dh)
            v3 = qkv[:, 2 * E + h * dh:2 * E + (h + 1) * dh].reshape(B, S, dh)
            scores = jnp.einsum("bqd,bkd->bqk", _bf16(q3), _bf16(k3),
                                preferred_element_type=jnp.float32)
            scores = scores + mask3                               # (B, S, S)
            m = jnp.max(scores, axis=-1, keepdims=True)
            p = jnp.exp(scores - m)
            p = p * pl.reciprocal(jnp.sum(p, axis=-1, keepdims=True), approx=True)
            ctx3 = jnp.einsum("bqk,bkd->bqd", _bf16(p), _bf16(v3),
                              preferred_element_type=jnp.float32)
            ctx_heads.append(ctx3.reshape(BS, dh))

        ctx = jnp.concatenate(ctx_heads, axis=-1)                 # (BS, E) head-concat
        attn = jnp.dot(_bf16(ctx), wo_ref[blk],                   # single K=E Wo matmul
                       preferred_element_type=jnp.float32) + bo_ref[blk]
        x = _layer_norm(x + attn, ln1g_ref[blk], ln1b_ref[blk])

        h1 = jnp.dot(_bf16(x), w1_ref[blk],
                     preferred_element_type=jnp.float32) + b1_ref[blk]
        h1 = jnp.maximum(h1, 0.0)                                 # relu
        ff = jnp.dot(_bf16(h1), w2_ref[blk],
                     preferred_element_type=jnp.float32) + b2_ref[blk]
        x = _layer_norm(x + ff, ln2g_ref[blk], ln2b_ref[blk])

    # ---- pooling: sum over ALL positions / #non-pad tokens (as in reference) --
    pooled = jnp.sum(x.reshape(B, S, E), axis=1) / denom          # exact divide, (B, E)

    # ---- output head (single fused matmul) + exact channel softmax ------------
    hh = jnp.dot(_bf16(pooled), hw1_ref[...],
                 preferred_element_type=jnp.float32) + hb1_ref[...]
    hh = jnp.maximum(hh, 0.0)
    logits = jnp.dot(_bf16(hh), hw2_ref[...],                     # (B, 3W) channel-major
                     preferred_element_type=jnp.float32) + hb2_ref[...]
    l0 = logits[:, 0 * W:1 * W]
    l1 = logits[:, 1 * W:2 * W]
    l2 = logits[:, 2 * W:3 * W]
    m = jnp.maximum(jnp.maximum(l0, l1), l2)
    e0, e1, e2 = jnp.exp(l0 - m), jnp.exp(l1 - m), jnp.exp(l2 - m)
    inv = 1.0 / (e0 + e1 + e2)                                    # exact normalization
    o_ref[:, 0:1, :] = (e0 * inv)[:, None, :]
    o_ref[:, 1:2, :] = (e1 * inv)[:, None, :]
    o_ref[:, 2:3, :] = (e2 * inv)[:, None, :]


# ------------------------------ wrapper ---------------------------------------
def _const_spec(x):
    """Full-array block with a constant index map -> fetched once, stays in VMEM."""
    return pl.BlockSpec(x.shape, lambda i, _n=x.ndim: (0,) * _n)


def positional_encoding(max_len, embed):
    position = jnp.arange(max_len, dtype=jnp.float32)[:, None]
    div_term = jnp.exp(jnp.arange(0, embed, 2, dtype=jnp.float32)
                       * (-math.log(10000.0) / embed))
    pe = jnp.zeros((max_len, embed), jnp.float32)
    pe = pe.at[:, 0::2].set(jnp.sin(position * div_term))
    pe = pe.at[:, 1::2].set(jnp.cos(position * div_term[: embed // 2]))
    return pe[None]                                               # (1, max_len, E)


def transformer_rta_forward(params, materials, thicknesses, *, tile_b=None):
    B, S = materials.shape
    if tile_b is None:
        tile_b = 2 if B % 2 == 0 else 1
    assert B % tile_b == 0
    grid = (B // tile_b,)

    materials = materials.astype(jnp.int32)
    mat_col = materials.reshape(B * S, 1)                          # token ids, row layout
    thick_col = thicknesses.astype(jnp.float32).reshape(B * S, 1)
    mask_add = jnp.where(materials == PAD_IDX, NEG_INF, 0.0).astype(jnp.float32)[:, None, :]
    pos = positional_encoding(MAX_SEQ_LEN, EMBED)[0, :S, :]        # (S, E)

    weights = [params[k] for k in WEIGHT_KEYS]
    row_spec = pl.BlockSpec((tile_b * S, 1), lambda i: (i, 0))
    in_specs = [
        row_spec,                                                  # mat_col
        row_spec,                                                  # thick_col
        pl.BlockSpec((tile_b, 1, S), lambda i: (i, 0, 0)),         # additive key mask
        _const_spec(pos),                                          # positional encoding
    ] + [_const_spec(w) for w in weights]

    out = pl.pallas_call(
        functools.partial(fused_forward_kernel, tile_b=tile_b, seq=S,
                          num_heads=NUM_HEADS, num_blocks=NUM_BLOCKS),
        out_shape=jax.ShapeDtypeStruct((B, 3, NUM_WAVELENGTHS), jnp.float32),
        grid=grid,
        in_specs=in_specs,
        out_specs=pl.BlockSpec((tile_b, 3, NUM_WAVELENGTHS), lambda i: (i, 0, 0)),
        compiler_params=pltpu.CompilerParams(
            dimension_semantics=("parallel",),          # batch blocks -> 2 TCs on v7x
            vmem_limit_bytes=32 * 1024 * 1024,          # budgeted for v7x (64 MiB phys)
        ),
    )(mat_col, thick_col, mask_add, pos, *weights)
    # (B, 3, W) channel-major -> (B, W, 3) to match rta_flat.view(B, W, 3)
    return out.transpose(0, 2, 1)


# ------------------------------ parameters ------------------------------------
def _init(key, shape, scale=0.02, dtype=jnp.float32):
    return (scale * jax.random.normal(key, shape)).astype(dtype)


def make_params(key):
    keys = iter(jax.random.split(key, 32))
    bf = jnp.bfloat16
    nb, e, dh, ff, w = NUM_BLOCKS, EMBED, HEAD_DIM, FF_HIDDEN, NUM_WAVELENGTHS

    # Fused QKV weights: columns = [Q head0..head3 | K head0..head3 | V head0..head3].
    # The 1/sqrt(dh) attention scale is folded into the Q columns (weight + bias),
    # so no score scaling happens at runtime.
    q_scale = 1.0 / math.sqrt(dh)
    wqkv = _init(next(keys), (nb, e, 3 * e))
    bqkv = _init(next(keys), (nb, 1, 3 * e))
    wqkv = wqkv.at[:, :, :e].multiply(q_scale)
    bqkv = bqkv.at[:, :, :e].multiply(q_scale)

    params = {
        "emb": _init(next(keys), (NUM_TOKENS, e), dtype=bf),
        "thick_w": _init(next(keys), (1, e)),          # nn.Linear(1, E)
        "thick_b": _init(next(keys), (1, e)),
        "wqkv": wqkv.astype(bf),
        "bqkv": bqkv,                                  # f32
        "wo": _init(next(keys), (nb, e, e), dtype=bf),
        "bo": _init(next(keys), (nb, 1, e)),
        "ln1_g": jnp.ones((nb, 1, e), jnp.float32),
        "ln1_b": jnp.zeros((nb, 1, e), jnp.float32),
        "w1": _init(next(keys), (nb, e, ff), dtype=bf),
        "b1": _init(next(keys), (nb, 1, ff)),
        "w2": _init(next(keys), (nb, ff, e), dtype=bf),
        "b2": _init(next(keys), (nb, 1, e)),
        "ln2_g": jnp.ones((nb, 1, e), jnp.float32),
        "ln2_b": jnp.zeros((nb, 1, e), jnp.float32),
        "head_w1": _init(next(keys), (e, ff), dtype=bf),
        "head_b1": _init(next(keys), (1, ff)),
        # Linear(FF, 3*W), output columns in channel-major order (c*W + w).
        "head_w2": _init(next(keys), (ff, 3 * w), dtype=bf),
        "head_b2": _init(next(keys), (1, 3 * w)),
    }
    return params


# ---------------------------------- main ---------------------------------------
if __name__ == "__main__":
    key = jax.random.PRNGKey(0)
    pkey, mkey, tkey = jax.random.split(key, 3)

    params = make_params(pkey)

    B, S = 4, 8
    materials = jax.random.randint(mkey, (B, S), 1, NUM_TOKENS, dtype=jnp.int32)
    # Pad the last two positions of every sequence (padding_token_idx = 0).
    materials = materials.at[:, S - 2:].set(PAD_IDX)
    thicknesses = jax.random.uniform(tkey, (B, S), dtype=jnp.float32)

    rta = jax.jit(transformer_rta_forward)(params, materials, thicknesses)
    rta = jax.block_until_ready(rta)

    assert rta.shape == (B, NUM_WAVELENGTHS, 3), rta.shape
    assert bool(jnp.all(jnp.isfinite(rta)))
    # exact softmax over the 3 channels -> rows sum to 1 tightly
    assert bool(jnp.allclose(jnp.sum(rta, axis=-1), 1.0, atol=1e-4))
    assert bool(jnp.all(rta >= 0.0))
    print("KERNEL_OK")
</pallas_src>

<mosaic_0001>
module attributes {stable_mosaic.version = 11 : i64} {
  func.func @fused_forward_kernel(%arg0: i32, %arg1: memref<16x1xi32, #tpu.memory_space<vmem>>, %arg2: memref<16x1xf32, #tpu.memory_space<vmem>>, %arg3: memref<2x1x8xf32, #tpu.memory_space<vmem>>, %arg4: memref<8x32xf32, #tpu.memory_space<vmem>>, %arg5: memref<16x32xbf16, #tpu.memory_space<vmem>>, %arg6: memref<1x32xf32, #tpu.memory_space<vmem>>, %arg7: memref<1x32xf32, #tpu.memory_space<vmem>>, %arg8: memref<2x32x96xbf16, #tpu.memory_space<vmem>>, %arg9: memref<2x1x96xf32, #tpu.memory_space<vmem>>, %arg10: memref<2x32x32xbf16, #tpu.memory_space<vmem>>, %arg11: memref<2x1x32xf32, #tpu.memory_space<vmem>>, %arg12: memref<2x1x32xf32, #tpu.memory_space<vmem>>, %arg13: memref<2x1x32xf32, #tpu.memory_space<vmem>>, %arg14: memref<2x32x64xbf16, #tpu.memory_space<vmem>>, %arg15: memref<2x1x64xf32, #tpu.memory_space<vmem>>, %arg16: memref<2x64x32xbf16, #tpu.memory_space<vmem>>, %arg17: memref<2x1x32xf32, #tpu.memory_space<vmem>>, %arg18: memref<2x1x32xf32, #tpu.memory_space<vmem>>, %arg19: memref<2x1x32xf32, #tpu.memory_space<vmem>>, %arg20: memref<32x64xbf16, #tpu.memory_space<vmem>>, %arg21: memref<1x64xf32, #tpu.memory_space<vmem>>, %arg22: memref<64x48xbf16, #tpu.memory_space<vmem>>, %arg23: memref<1x48xf32, #tpu.memory_space<vmem>>, %arg24: memref<2x3x16xf32, #tpu.memory_space<vmem>>) attributes {dimension_semantics = [#tpu.dimension_semantics<parallel>], iteration_bounds = array<i64: 2>, scalar_prefetch = 0 : i64, scratch_operands = 0 : i64, tpu.core_type = #tpu.core_type<tc>, window_params = [{transform_indices = @transform_0, window_bounds = array<i64: 16, 1>}, {transform_indices = @transform_1, window_bounds = array<i64: 16, 1>}, {transform_indices = @transform_2, window_bounds = array<i64: 2, 1, 8>}, {pipeline_mode = #tpu.pipeline_mode<synchronous>, transform_indices = @transform_3, window_bounds = array<i64: 8, 32>}, {pipeline_mode = #tpu.pipeline_mode<synchronous>, transform_indices = @transform_4, window_bounds = array<i64: 16, 32>}, {pipeline_mode = #tpu.pipeline_mode<synchronous>, transform_indices = @transform_5, window_bounds = array<i64: 1, 32>}, {pipeline_mode = #tpu.pipeline_mode<synchronous>, transform_indices = @transform_6, window_bounds = array<i64: 1, 32>}, {pipeline_mode = #tpu.pipeline_mode<synchronous>, transform_indices = @transform_7, window_bounds = array<i64: 2, 32, 96>}, {pipeline_mode = #tpu.pipeline_mode<synchronous>, transform_indices = @transform_8, window_bounds = array<i64: 2, 1, 96>}, {pipeline_mode = #tpu.pipeline_mode<synchronous>, transform_indices = @transform_9, window_bounds = array<i64: 2, 32, 32>}, {pipeline_mode = #tpu.pipeline_mode<synchronous>, transform_indices = @transform_10, window_bounds = array<i64: 2, 1, 32>}, {pipeline_mode = #tpu.pipeline_mode<synchronous>, transform_indices = @transform_11, window_bounds = array<i64: 2, 1, 32>}, {pipeline_mode = #tpu.pipeline_mode<synchronous>, transform_indices = @transform_12, window_bounds = array<i64: 2, 1, 32>}, {pipeline_mode = #tpu.pipeline_mode<synchronous>, transform_indices = @transform_13, window_bounds = array<i64: 2, 32, 64>}, {pipeline_mode = #tpu.pipeline_mode<synchronous>, transform_indices = @transform_14, window_bounds = array<i64: 2, 1, 64>}, {pipeline_mode = #tpu.pipeline_mode<synchronous>, transform_indices = @transform_15, window_bounds = array<i64: 2, 64, 32>}, {pipeline_mode = #tpu.pipeline_mode<synchronous>, transform_indices = @transform_16, window_bounds = array<i64: 2, 1, 32>}, {pipeline_mode = #tpu.pipeline_mode<synchronous>, transform_indices = @transform_17, window_bounds = array<i64: 2, 1, 32>}, {pipeline_mode = #tpu.pipeline_mode<synchronous>, transform_indices = @transform_18, window_bounds = array<i64: 2, 1, 32>}, {pipeline_mode = #tpu.pipeline_mode<synchronous>, transform_indices = @transform_19, window_bounds = array<i64: 32, 64>}, {pipeline_mode = #tpu.pipeline_mode<synchronous>, transform_indices = @transform_20, window_bounds = array<i64: 1, 64>}, {pipeline_mode = #tpu.pipeline_mode<synchronous>, transform_indices = @transform_21, window_bounds = array<i64: 64, 48>}, {pipeline_mode = #tpu.pipeline_mode<synchronous>, transform_indices = @transform_22, window_bounds = array<i64: 1, 48>}, {transform_indices = @transform_23, window_bounds = array<i64: 2, 3, 16>}]} {
    %c0 = arith.constant 0 : index
    %c0_0 = arith.constant 0 : index
    %0 = vector.load %arg1[%c0, %c0_0] : memref<16x1xi32, #tpu.memory_space<vmem>>, vector<16x1xi32>
    %1 = tpu.iota {dimensions = array<i32: 1>} : vector<16x16xi32>
    %2 = vector.broadcast %0 : vector<16x1xi32> to vector<16x16xi32>
    %3 = arith.cmpi eq, %1, %2 : vector<16x16xi32>
    %4 = arith.extui %3 : vector<16x16xi1> to vector<16x16xi32>
    %5 = arith.sitofp %4 : vector<16x16xi32> to vector<16x16xf32>
    %6 = arith.truncf %5 : vector<16x16xf32> to vector<16x16xbf16>
    %c0_1 = arith.constant 0 : index
    %c0_2 = arith.constant 0 : index
    %7 = vector.load %arg5[%c0_1, %c0_2] : memref<16x32xbf16, #tpu.memory_space<vmem>>, vector<16x32xbf16>
    %cst = arith.constant dense<0.000000e+00> : vector<16x32xf32>
    %8 = tpu.matmul %6, %7, %cst {dimension_numbers = #tpu.dot_dimension_numbers<[1], [0], [0], [1], [0, 0, 1, 1], [], []>} : vector<16x16xbf16>, vector<16x32xbf16>, vector<16x32xf32> -> vector<16x32xf32>
    %c0_3 = arith.constant 0 : index
    %c0_4 = arith.constant 0 : index
    %9 = vector.load %arg2[%c0_3, %c0_4] : memref<16x1xf32, #tpu.memory_space<vmem>>, vector<16x1xf32>
    %c0_5 = arith.constant 0 : index
    %c0_6 = arith.constant 0 : index
    %10 = vector.load %arg6[%c0_5, %c0_6] : memref<1x32xf32, #tpu.memory_space<vmem>>, vector<1x32xf32>
    %11 = vector.broadcast %9 : vector<16x1xf32> to vector<16x32xf32>
    %12 = vector.broadcast %10 : vector<1x32xf32> to vector<16x32xf32>
    %13 = arith.mulf %11, %12 : vector<16x32xf32>
    %c0_7 = arith.constant 0 : index
    %c0_8 = arith.constant 0 : index
    %14 = vector.load %arg7[%c0_7, %c0_8] : memref<1x32xf32, #tpu.memory_space<vmem>>, vector<1x32xf32>
    %15 = vector.broadcast %14 : vector<1x32xf32> to vector<16x32xf32>
    %16 = arith.addf %13, %15 : vector<16x32xf32>
    %17 = arith.addf %8, %16 : vector<16x32xf32>
    %18 = vector.shape_cast %17 : vector<16x32xf32> to vector<2x8x32xf32>
    %c0_9 = arith.constant 0 : index
    %c0_10 = arith.constant 0 : index
    %19 = vector.load %arg4[%c0_9, %c0_10] : memref<8x32xf32, #tpu.memory_space<vmem>>, vector<8x32xf32>
    %20 = vector.shape_cast %19 : vector<8x32xf32> to vector<1x8x32xf32>
    %21 = vector.broadcast %20 : vector<1x8x32xf32> to vector<2x8x32xf32>
    %22 = arith.addf %18, %21 : vector<2x8x32xf32>
    %23 = vector.shape_cast %22 : vector<2x8x32xf32> to vector<16x32xf32>
    %c0_11 = arith.constant 0 : index
    %c0_12 = arith.constant 0 : index
    %c0_13 = arith.constant 0 : index
    %24 = vector.load %arg3[%c0_11, %c0_12, %c0_13] : memref<2x1x8xf32, #tpu.memory_space<vmem>>, vector<2x1x8xf32>
    %cst_14 = arith.constant 0.000000e+00 : f32
    %25 = vector.broadcast %cst_14 : f32 to vector<2x1x8xf32>
    %26 = arith.cmpf oeq, %24, %25 : vector<2x1x8xf32>
    %27 = arith.extui %26 : vector<2x1x8xi1> to vector<2x1x8xi32>
    %28 = arith.sitofp %27 : vector<2x1x8xi32> to vector<2x1x8xf32>
    %cst_15 = arith.constant dense<0.000000e+00> : vector<2x1xf32>
    %29 = vector.multi_reduction <add>, %28, %cst_15 [2] : vector<2x1x8xf32> to vector<2x1xf32>
    %30 = arith.truncf %23 : vector<16x32xf32> to vector<16x32xbf16>
    %c0_16 = arith.constant 0 : index
    %c0_17 = arith.constant 0 : index
    %c0_18 = arith.constant 0 : index
    %31 = vector.load %arg8[%c0_16, %c0_17, %c0_18] : memref<2x32x96xbf16, #tpu.memory_space<vmem>>, vector<1x32x96xbf16>
    %32 = vector.shape_cast %31 : vector<1x32x96xbf16> to vector<32x96xbf16>
    %cst_19 = arith.constant dense<0.000000e+00> : vector<16x96xf32>
    %33 = tpu.matmul %30, %32, %cst_19 {dimension_numbers = #tpu.dot_dimension_numbers<[1], [0], [0], [1], [0, 0, 1, 1], [], []>} : vector<16x32xbf16>, vector<32x96xbf16>, vector<16x96xf32> -> vector<16x96xf32>
    %c0_20 = arith.constant 0 : index
    %c0_21 = arith.constant 0 : index
    %c0_22 = arith.constant 0 : index
    %34 = vector.load %arg9[%c0_20, %c0_21, %c0_22] : memref<2x1x96xf32, #tpu.memory_space<vmem>>, vector<1x1x96xf32>
    %35 = vector.shape_cast %34 : vector<1x1x96xf32> to vector<1x96xf32>
    %36 = vector.broadcast %35 : vector<1x96xf32> to vector<16x96xf32>
    %37 = arith.addf %33, %36 : vector<16x96xf32>
    %38 = vector.extract_strided_slice %37 {offsets = [0, 0], sizes = [16, 8], strides = [1, 1]} : vector<16x96xf32> to vector<16x8xf32>
    %39 = vector.shape_cast %38 : vector<16x8xf32> to vector<2x8x8xf32>
    %40 = vector.extract_strided_slice %37 {offsets = [0, 32], sizes = [16, 8], strides = [1, 1]} : vector<16x96xf32> to vector<16x8xf32>
    %41 = vector.shape_cast %40 : vector<16x8xf32> to vector<2x8x8xf32>
    %42 = vector.extract_strided_slice %37 {offsets = [0, 64], sizes = [16, 8], strides = [1, 1]} : vector<16x96xf32> to vector<16x8xf32>
    %43 = vector.shape_cast %42 : vector<16x8xf32> to vector<2x8x8xf32>
    %44 = arith.truncf %39 : vector<2x8x8xf32> to vector<2x8x8xbf16>
    %45 = arith.truncf %41 : vector<2x8x8xf32> to vector<2x8x8xbf16>
    "tpu.trace_start"() <{level = 10 : i32, message = "bqd,bkd->bqk"}> : () -> ()
    %cst_23 = arith.constant dense<0.000000e+00> : vector<2x8x8xf32>
    %46 = tpu.matmul %44, %45, %cst_23 {dimension_numbers = #tpu.dot_dimension_numbers<[2], [2], [1], [1], [0, 0, 0, 1, 1, 1], [0], [0]>} : vector<2x8x8xbf16>, vector<2x8x8xbf16>, vector<2x8x8xf32> -> vector<2x8x8xf32>
    "tpu.trace_stop"() : () -> ()
    %47 = vector.broadcast %24 : vector<2x1x8xf32> to vector<2x8x8xf32>
    %48 = arith.addf %46, %47 : vector<2x8x8xf32>
    %cst_24 = arith.constant dense<0xFF800000> : vector<2x8xf32>
    %49 = vector.multi_reduction <maximumf>, %48, %cst_24 [2] : vector<2x8x8xf32> to vector<2x8xf32>
    %50 = vector.shape_cast %49 : vector<2x8xf32> to vector<2x8x1xf32>
    %51 = vector.broadcast %50 : vector<2x8x1xf32> to vector<2x8x8xf32>
    %52 = arith.subf %48, %51 : vector<2x8x8xf32>
    %53 = math.exp %52 : vector<2x8x8xf32>
    %cst_25 = arith.constant dense<0.000000e+00> : vector<2x8xf32>
    %54 = vector.multi_reduction <add>, %53, %cst_25 [2] : vector<2x8x8xf32> to vector<2x8xf32>
    %55 = vector.shape_cast %54 : vector<2x8xf32> to vector<2x8x1xf32>
    %56 = tpu.reciprocal %55 {approx = true} : vector<2x8x1xf32> -> vector<2x8x1xf32>
    %57 = vector.broadcast %56 : vector<2x8x1xf32> to vector<2x8x8xf32>
    %58 = arith.mulf %53, %57 : vector<2x8x8xf32>
    %59 = arith.truncf %58 : vector<2x8x8xf32> to vector<2x8x8xbf16>
    %60 = arith.truncf %43 : vector<2x8x8xf32> to vector<2x8x8xbf16>
    "tpu.trace_start"() <{level = 10 : i32, message = "bqk,bkd->bqd"}> : () -> ()
    %cst_26 = arith.constant dense<0.000000e+00> : vector<2x8x8xf32>
    %61 = tpu.matmul %59, %60, %cst_26 {dimension_numbers = #tpu.dot_dimension_numbers<[2], [1], [1], [2], [0, 0, 0, 1, 1, 2], [0], [0]>} : vector<2x8x8xbf16>, vector<2x8x8xbf16>, vector<2x8x8xf32> -> vector<2x8x8xf32>
    "tpu.trace_stop"() : () -> ()
    %62 = vector.shape_cast %61 : vector<2x8x8xf32> to vector<16x8xf32>
    %63 = vector.extract_strided_slice %37 {offsets = [0, 8], sizes = [16, 8], strides = [1, 1]} : vector<16x96xf32> to vector<16x8xf32>
    %64 = vector.shape_cast %63 : vector<16x8xf32> to vector<2x8x8xf32>
    %65 = vector.extract_strided_slice %37 {offsets = [0, 40], sizes = [16, 8], strides = [1, 1]} : vector<16x96xf32> to vector<16x8xf32>
    %66 = vector.shape_cast %65 : vector<16x8xf32> to vector<2x8x8xf32>
    %67 = vector.extract_strided_slice %37 {offsets = [0, 72], sizes = [16, 8], strides = [1, 1]} : vector<16x96xf32> to vector<16x8xf32>
    %68 = vector.shape_cast %67 : vector<16x8xf32> to vector<2x8x8xf32>
    %69 = arith.truncf %64 : vector<2x8x8xf32> to vector<2x8x8xbf16>
    %70 = arith.truncf %66 : vector<2x8x8xf32> to vector<2x8x8xbf16>
    "tpu.trace_start"() <{level = 10 : i32, message = "bqd,bkd->bqk"}> : () -> ()
    %cst_27 = arith.constant dense<0.000000e+00> : vector<2x8x8xf32>
    %71 = tpu.matmul %69, %70, %cst_27 {dimension_numbers = #tpu.dot_dimension_numbers<[2], [2], [1], [1], [0, 0, 0, 1, 1, 1], [0], [0]>} : vector<2x8x8xbf16>, vector<2x8x8xbf16>, vector<2x8x8xf32> -> vector<2x8x8xf32>
    "tpu.trace_stop"() : () -> ()
    %72 = vector.broadcast %24 : vector<2x1x8xf32> to vector<2x8x8xf32>
    %73 = arith.addf %71, %72 : vector<2x8x8xf32>
    %cst_28 = arith.constant dense<0xFF800000> : vector<2x8xf32>
    %74 = vector.multi_reduction <maximumf>, %73, %cst_28 [2] : vector<2x8x8xf32> to vector<2x8xf32>
    %75 = vector.shape_cast %74 : vector<2x8xf32> to vector<2x8x1xf32>
    %76 = vector.broadcast %75 : vector<2x8x1xf32> to vector<2x8x8xf32>
    %77 = arith.subf %73, %76 : vector<2x8x8xf32>
    %78 = math.exp %77 : vector<2x8x8xf32>
    %cst_29 = arith.constant dense<0.000000e+00> : vector<2x8xf32>
    %79 = vector.multi_reduction <add>, %78, %cst_29 [2] : vector<2x8x8xf32> to vector<2x8xf32>
    %80 = vector.shape_cast %79 : vector<2x8xf32> to vector<2x8x1xf32>
    %81 = tpu.reciprocal %80 {approx = true} : vector<2x8x1xf32> -> vector<2x8x1xf32>
    %82 = vector.broadcast %81 : vector<2x8x1xf32> to vector<2x8x8xf32>
    %83 = arith.mulf %78, %82 : vector<2x8x8xf32>
    %84 = arith.truncf %83 : vector<2x8x8xf32> to vector<2x8x8xbf16>
    %85 = arith.truncf %68 : vector<2x8x8xf32> to vector<2x8x8xbf16>
    "tpu.trace_start"() <{level = 10 : i32, message = "bqk,bkd->bqd"}> : () -> ()
    %cst_30 = arith.constant dense<0.000000e+00> : vector<2x8x8xf32>
    %86 = tpu.matmul %84, %85, %cst_30 {dimension_numbers = #tpu.dot_dimension_numbers<[2], [1], [1], [2], [0, 0, 0, 1, 1, 2], [0], [0]>} : vector<2x8x8xbf16>, vector<2x8x8xbf16>, vector<2x8x8xf32> -> vector<2x8x8xf32>
    "tpu.trace_stop"() : () -> ()
    %87 = vector.shape_cast %86 : vector<2x8x8xf32> to vector<16x8xf32>
    %88 = vector.extract_strided_slice %37 {offsets = [0, 16], sizes = [16, 8], strides = [1, 1]} : vector<16x96xf32> to vector<16x8xf32>
    %89 = vector.shape_cast %88 : vector<16x8xf32> to vector<2x8x8xf32>
    %90 = vector.extract_strided_slice %37 {offsets = [0, 48], sizes = [16, 8], strides = [1, 1]} : vector<16x96xf32> to vector<16x8xf32>
    %91 = vector.shape_cast %90 : vector<16x8xf32> to vector<2x8x8xf32>
    %92 = vector.extract_strided_slice %37 {offsets = [0, 80], sizes = [16, 8], strides = [1, 1]} : vector<16x96xf32> to vector<16x8xf32>
    %93 = vector.shape_cast %92 : vector<16x8xf32> to vector<2x8x8xf32>
    %94 = arith.truncf %89 : vector<2x8x8xf32> to vector<2x8x8xbf16>
    %95 = arith.truncf %91 : vector<2x8x8xf32> to vector<2x8x8xbf16>
    "tpu.trace_start"() <{level = 10 : i32, message = "bqd,bkd->bqk"}> : () -> ()
    %cst_31 = arith.constant dense<0.000000e+00> : vector<2x8x8xf32>
    %96 = tpu.matmul %94, %95, %cst_31 {dimension_numbers = #tpu.dot_dimension_numbers<[2], [2], [1], [1], [0, 0, 0, 1, 1, 1], [0], [0]>} : vector<2x8x8xbf16>, vector<2x8x8xbf16>, vector<2x8x8xf32> -> vector<2x8x8xf32>
    "tpu.trace_stop"() : () -> ()
    %97 = vector.broadcast %24 : vector<2x1x8xf32> to vector<2x8x8xf32>
    %98 = arith.addf %96, %97 : vector<2x8x8xf32>
    %cst_32 = arith.constant dense<0xFF800000> : vector<2x8xf32>
    %99 = vector.multi_reduction <maximumf>, %98, %cst_32 [2] : vector<2x8x8xf32> to vector<2x8xf32>
    %100 = vector.shape_cast %99 : vector<2x8xf32> to vector<2x8x1xf32>
    %101 = vector.broadcast %100 : vector<2x8x1xf32> to vector<2x8x8xf32>
    %102 = arith.subf %98, %101 : vector<2x8x8xf32>
    %103 = math.exp %102 : vector<2x8x8xf32>
    %cst_33 = arith.constant dense<0.000000e+00> : vector<2x8xf32>
    %104 = vector.multi_reduction <add>, %103, %cst_33 [2] : vector<2x8x8xf32> to vector<2x8xf32>
    %105 = vector.shape_cast %104 : vector<2x8xf32> to vector<2x8x1xf32>
    %106 = tpu.reciprocal %105 {approx = true} : vector<2x8x1xf32> -> vector<2x8x1xf32>
    %107 = vector.broadcast %106 : vector<2x8x1xf32> to vector<2x8x8xf32>
    %108 = arith.mulf %103, %107 : vector<2x8x8xf32>
    %109 = arith.truncf %108 : vector<2x8x8xf32> to vector<2x8x8xbf16>
    %110 = arith.truncf %93 : vector<2x8x8xf32> to vector<2x8x8xbf16>
    "tpu.trace_start"() <{level = 10 : i32, message = "bqk,bkd->bqd"}> : () -> ()
    %cst_34 = arith.constant dense<0.000000e+00> : vector<2x8x8xf32>
    %111 = tpu.matmul %109, %110, %cst_34 {dimension_numbers = #tpu.dot_dimension_numbers<[2], [1], [1], [2], [0, 0, 0, 1, 1, 2], [0], [0]>} : vector<2x8x8xbf16>, vector<2x8x8xbf16>, vector<2x8x8xf32> -> vector<2x8x8xf32>
    "tpu.trace_stop"() : () -> ()
    %112 = vector.shape_cast %111 : vector<2x8x8xf32> to vector<16x8xf32>
    %113 = vector.extract_strided_slice %37 {offsets = [0, 24], sizes = [16, 8], strides = [1, 1]} : vector<16x96xf32> to vector<16x8xf32>
    %114 = vector.shape_cast %113 : vector<16x8xf32> to vector<2x8x8xf32>
    %115 = vector.extract_strided_slice %37 {offsets = [0, 56], sizes = [16, 8], strides = [1, 1]} : vector<16x96xf32> to vector<16x8xf32>
    %116 = vector.shape_cast %115 : vector<16x8xf32> to vector<2x8x8xf32>
    %117 = vector.extract_strided_slice %37 {offsets = [0, 88], sizes = [16, 8], strides = [1, 1]} : vector<16x96xf32> to vector<16x8xf32>
    %118 = vector.shape_cast %117 : vector<16x8xf32> to vector<2x8x8xf32>
    %119 = arith.truncf %114 : vector<2x8x8xf32> to vector<2x8x8xbf16>
    %120 = arith.truncf %116 : vector<2x8x8xf32> to vector<2x8x8xbf16>
    "tpu.trace_start"() <{level = 10 : i32, message = "bqd,bkd->bqk"}> : () -> ()
    %cst_35 = arith.constant dense<0.000000e+00> : vector<2x8x8xf32>
    %121 = tpu.matmul %119, %120, %cst_35 {dimension_numbers = #tpu.dot_dimension_numbers<[2], [2], [1], [1], [0, 0, 0, 1, 1, 1], [0], [0]>} : vector<2x8x8xbf16>, vector<2x8x8xbf16>, vector<2x8x8xf32> -> vector<2x8x8xf32>
    "tpu.trace_stop"() : () -> ()
    %122 = vector.broadcast %24 : vector<2x1x8xf32> to vector<2x8x8xf32>
    %123 = arith.addf %121, %122 : vector<2x8x8xf32>
    %cst_36 = arith.constant dense<0xFF800000> : vector<2x8xf32>
    %124 = vector.multi_reduction <maximumf>, %123, %cst_36 [2] : vector<2x8x8xf32> to vector<2x8xf32>
    %125 = vector.shape_cast %124 : vector<2x8xf32> to vector<2x8x1xf32>
    %126 = vector.broadcast %125 : vector<2x8x1xf32> to vector<2x8x8xf32>
    %127 = arith.subf %123, %126 : vector<2x8x8xf32>
    %128 = math.exp %127 : vector<2x8x8xf32>
    %cst_37 = arith.constant dense<0.000000e+00> : vector<2x8xf32>
    %129 = vector.multi_reduction <add>, %128, %cst_37 [2] : vector<2x8x8xf32> to vector<2x8xf32>
    %130 = vector.shape_cast %129 : vector<2x8xf32> to vector<2x8x1xf32>
    %131 = tpu.reciprocal %130 {approx = true} : vector<2x8x1xf32> -> vector<2x8x1xf32>
    %132 = vector.broadcast %131 : vector<2x8x1xf32> to vector<2x8x8xf32>
    %133 = arith.mulf %128, %132 : vector<2x8x8xf32>
    %134 = arith.truncf %133 : vector<2x8x8xf32> to vector<2x8x8xbf16>
    %135 = arith.truncf %118 : vector<2x8x8xf32> to vector<2x8x8xbf16>
    "tpu.trace_start"() <{level = 10 : i32, message = "bqk,bkd->bqd"}> : () -> ()
    %cst_38 = arith.constant dense<0.000000e+00> : vector<2x8x8xf32>
    %136 = tpu.matmul %134, %135, %cst_38 {dimension_numbers = #tpu.dot_dimension_numbers<[2], [1], [1], [2], [0, 0, 0, 1, 1, 2], [0], [0]>} : vector<2x8x8xbf16>, vector<2x8x8xbf16>, vector<2x8x8xf32> -> vector<2x8x8xf32>
    "tpu.trace_stop"() : () -> ()
    %137 = vector.shape_cast %136 : vector<2x8x8xf32> to vector<16x8xf32>
    %138 = tpu.concatenate %62, %87, %112, %137 in 1 : vector<16x8xf32>, vector<16x8xf32>, vector<16x8xf32>, vector<16x8xf32> -> vector<16x32xf32>
    %139 = arith.truncf %138 : vector<16x32xf32> to vector<16x32xbf16>
    %c0_39 = arith.constant 0 : index
    %c0_40 = arith.constant 0 : index
    %c0_41 = arith.constant 0 : index
    %140 = vector.load %arg10[%c0_39, %c0_40, %c0_41] : memref<2x32x32xbf16, #tpu.memory_space<vmem>>, vector<1x32x32xbf16>
    %141 = vector.shape_cast %140 : vector<1x32x32xbf16> to vector<32x32xbf16>
    %cst_42 = arith.constant dense<0.000000e+00> : vector<16x32xf32>
    %142 = tpu.matmul %139, %141, %cst_42 {dimension_numbers = #tpu.dot_dimension_numbers<[1], [0], [0], [1], [0, 0, 1, 1], [], []>} : vector<16x32xbf16>, vector<32x32xbf16>, vector<16x32xf32> -> vector<16x32xf32>
    %c0_43 = arith.constant 0 : index
    %c0_44 = arith.constant 0 : index
    %c0_45 = arith.constant 0 : index
    %143 = vector.load %arg11[%c0_43, %c0_44, %c0_45] : memref<2x1x32xf32, #tpu.memory_space<vmem>>, vector<1x1x32xf32>
    %144 = vector.shape_cast %143 : vector<1x1x32xf32> to vector<1x32xf32>
    %145 = vector.broadcast %144 : vector<1x32xf32> to vector<16x32xf32>
    %146 = arith.addf %142, %145 : vector<16x32xf32>
    %147 = arith.addf %23, %146 : vector<16x32xf32>
    %c0_46 = arith.constant 0 : index
    %c0_47 = arith.constant 0 : index
    %c0_48 = arith.constant 0 : index
    %148 = vector.load %arg12[%c0_46, %c0_47, %c0_48] : memref<2x1x32xf32, #tpu.memory_space<vmem>>, vector<1x1x32xf32>
    %149 = vector.shape_cast %148 : vector<1x1x32xf32> to vector<1x32xf32>
    %c0_49 = arith.constant 0 : index
    %c0_50 = arith.constant 0 : index
    %c0_51 = arith.constant 0 : index
    %150 = vector.load %arg13[%c0_49, %c0_50, %c0_51] : memref<2x1x32xf32, #tpu.memory_space<vmem>>, vector<1x1x32xf32>
    %151 = vector.shape_cast %150 : vector<1x1x32xf32> to vector<1x32xf32>
    %cst_52 = arith.constant dense<0.000000e+00> : vector<16xf32>
    %152 = vector.multi_reduction <add>, %147, %cst_52 [1] : vector<16x32xf32> to vector<16xf32>
    %153 = vector.shape_cast %152 : vector<16xf32> to vector<16x1xf32>
    %cst_53 = arith.constant 3.200000e+01 : f32
    %154 = vector.broadcast %cst_53 : f32 to vector<16x1xf32>
    %155 = arith.divf %153, %154 : vector<16x1xf32>
    %156 = vector.broadcast %155 : vector<16x1xf32> to vector<16x32xf32>
    %157 = arith.subf %147, %156 : vector<16x32xf32>
    %158 = arith.mulf %157, %157 : vector<16x32xf32>
    %cst_54 = arith.constant dense<0.000000e+00> : vector<16xf32>
    %159 = vector.multi_reduction <add>, %158, %cst_54 [1] : vector<16x32xf32> to vector<16xf32>
    %160 = vector.shape_cast %159 : vector<16xf32> to vector<16x1xf32>
    %cst_55 = arith.constant 3.200000e+01 : f32
    %161 = vector.broadcast %cst_55 : f32 to vector<16x1xf32>
    %162 = arith.divf %160, %161 : vector<16x1xf32>
    %163 = vector.broadcast %155 : vector<16x1xf32> to vector<16x32xf32>
    %164 = arith.subf %147, %163 : vector<16x32xf32>
    %cst_56 = arith.constant 9.99999974E-6 : f32
    %165 = vector.broadcast %cst_56 : f32 to vector<16x1xf32>
    %166 = arith.addf %162, %165 : vector<16x1xf32>
    %167 = math.rsqrt %166 : vector<16x1xf32>
    %168 = vector.broadcast %167 : vector<16x1xf32> to vector<16x32xf32>
    %169 = arith.mulf %164, %168 : vector<16x32xf32>
    %170 = vector.broadcast %149 : vector<1x32xf32> to vector<16x32xf32>
    %171 = arith.mulf %169, %170 : vector<16x32xf32>
    %172 = vector.broadcast %151 : vector<1x32xf32> to vector<16x32xf32>
    %173 = arith.addf %171, %172 : vector<16x32xf32>
    %174 = arith.truncf %173 : vector<16x32xf32> to vector<16x32xbf16>
    %c0_57 = arith.constant 0 : index
    %c0_58 = arith.constant 0 : index
    %c0_59 = arith.constant 0 : index
    %175 = vector.load %arg14[%c0_57, %c0_58, %c0_59] : memref<2x32x64xbf16, #tpu.memory_space<vmem>>, vector<1x32x64xbf16>
    %176 = vector.shape_cast %175 : vector<1x32x64xbf16> to vector<32x64xbf16>
    %cst_60 = arith.constant dense<0.000000e+00> : vector<16x64xf32>
    %177 = tpu.matmul %174, %176, %cst_60 {dimension_numbers = #tpu.dot_dimension_numbers<[1], [0], [0], [1], [0, 0, 1, 1], [], []>} : vector<16x32xbf16>, vector<32x64xbf16>, vector<16x64xf32> -> vector<16x64xf32>
    %c0_61 = arith.constant 0 : index
    %c0_62 = arith.constant 0 : index
    %c0_63 = arith.constant 0 : index
    %178 = vector.load %arg15[%c0_61, %c0_62, %c0_63] : memref<2x1x64xf32, #tpu.memory_space<vmem>>, vector<1x1x64xf32>
    %179 = vector.shape_cast %178 : vector<1x1x64xf32> to vector<1x64xf32>
    %180 = vector.broadcast %179 : vector<1x64xf32> to vector<16x64xf32>
    %181 = arith.addf %177, %180 : vector<16x64xf32>
    %cst_64 = arith.constant 0.000000e+00 : f32
    %182 = vector.broadcast %cst_64 : f32 to vector<16x64xf32>
    %183 = arith.maximumf %181, %182 : vector<16x64xf32>
    %184 = arith.truncf %183 : vector<16x64xf32> to vector<16x64xbf16>
    %c0_65 = arith.constant 0 : index
    %c0_66 = arith.constant 0 : index
    %c0_67 = arith.constant 0 : index
    %185 = vector.load %arg16[%c0_65, %c0_66, %c0_67] : memref<2x64x32xbf16, #tpu.memory_space<vmem>>, vector<1x64x32xbf16>
    %186 = vector.shape_cast %185 : vector<1x64x32xbf16> to vector<64x32xbf16>
    %cst_68 = arith.constant dense<0.000000e+00> : vector<16x32xf32>
    %187 = tpu.matmul %184, %186, %cst_68 {dimension_numbers = #tpu.dot_dimension_numbers<[1], [0], [0], [1], [0, 0, 1, 1], [], []>} : vector<16x64xbf16>, vector<64x32xbf16>, vector<16x32xf32> -> vector<16x32xf32>
    %c0_69 = arith.constant 0 : index
    %c0_70 = arith.constant 0 : index
    %c0_71 = arith.constant 0 : index
    %188 = vector.load %arg17[%c0_69, %c0_70, %c0_71] : memref<2x1x32xf32, #tpu.memory_space<vmem>>, vector<1x1x32xf32>
    %189 = vector.shape_cast %188 : vector<1x1x32xf32> to vector<1x32xf32>
    %190 = vector.broadcast %189 : vector<1x32xf32> to vector<16x32xf32>
    %191 = arith.addf %187, %190 : vector<16x32xf32>
    %192 = arith.addf %173, %191 : vector<16x32xf32>
    %c0_72 = arith.constant 0 : index
    %c0_73 = arith.constant 0 : index
    %c0_74 = arith.constant 0 : index
    %193 = vector.load %arg18[%c0_72, %c0_73, %c0_74] : memref<2x1x32xf32, #tpu.memory_space<vmem>>, vector<1x1x32xf32>
    %194 = vector.shape_cast %193 : vector<1x1x32xf32> to vector<1x32xf32>
    %c0_75 = arith.constant 0 : index
    %c0_76 = arith.constant 0 : index
    %c0_77 = arith.constant 0 : index
    %195 = vector.load %arg19[%c0_75, %c0_76, %c0_77] : memref<2x1x32xf32, #tpu.memory_space<vmem>>, vector<1x1x32xf32>
    %196 = vector.shape_cast %195 : vector<1x1x32xf32> to vector<1x32xf32>
    %cst_78 = arith.constant dense<0.000000e+00> : vector<16xf32>
    %197 = vector.multi_reduction <add>, %192, %cst_78 [1] : vector<16x32xf32> to vector<16xf32>
    %198 = vector.shape_cast %197 : vector<16xf32> to vector<16x1xf32>
    %cst_79 = arith.constant 3.200000e+01 : f32
    %199 = vector.broadcast %cst_79 : f32 to vector<16x1xf32>
    %200 = arith.divf %198, %199 : vector<16x1xf32>
    %201 = vector.broadcast %200 : vector<16x1xf32> to vector<16x32xf32>
    %202 = arith.subf %192, %201 : vector<16x32xf32>
    %203 = arith.mulf %202, %202 : vector<16x32xf32>
    %cst_80 = arith.constant dense<0.000000e+00> : vector<16xf32>
    %204 = vector.multi_reduction <add>, %203, %cst_80 [1] : vector<16x32xf32> to vector<16xf32>
    %205 = vector.shape_cast %204 : vector<16xf32> to vector<16x1xf32>
    %cst_81 = arith.constant 3.200000e+01 : f32
    %206 = vector.broadcast %cst_81 : f32 to vector<16x1xf32>
    %207 = arith.divf %205, %206 : vector<16x1xf32>
    %208 = vector.broadcast %200 : vector<16x1xf32> to vector<16x32xf32>
    %209 = arith.subf %192, %208 : vector<16x32xf32>
    %cst_82 = arith.constant 9.99999974E-6 : f32
    %210 = vector.broadcast %cst_82 : f32 to vector<16x1xf32>
    %211 = arith.addf %207, %210 : vector<16x1xf32>
    %212 = math.rsqrt %211 : vector<16x1xf32>
    %213 = vector.broadcast %212 : vector<16x1xf32> to vector<16x32xf32>
    %214 = arith.mulf %209, %213 : vector<16x32xf32>
    %215 = vector.broadcast %194 : vector<1x32xf32> to vector<16x32xf32>
    %216 = arith.mulf %214, %215 : vector<16x32xf32>
    %217 = vector.broadcast %196 : vector<1x32xf32> to vector<16x32xf32>
    %218 = arith.addf %216, %217 : vector<16x32xf32>
    %219 = arith.truncf %218 : vector<16x32xf32> to vector<16x32xbf16>
    %c1 = arith.constant 1 : index
    %c0_83 = arith.constant 0 : index
    %c0_84 = arith.constant 0 : index
    %220 = vector.load %arg8[%c1, %c0_83, %c0_84] : memref<2x32x96xbf16, #tpu.memory_space<vmem>>, vector<1x32x96xbf16>
    %221 = vector.shape_cast %220 : vector<1x32x96xbf16> to vector<32x96xbf16>
    %cst_85 = arith.constant dense<0.000000e+00> : vector<16x96xf32>
    %222 = tpu.matmul %219, %221, %cst_85 {dimension_numbers = #tpu.dot_dimension_numbers<[1], [0], [0], [1], [0, 0, 1, 1], [], []>} : vector<16x32xbf16>, vector<32x96xbf16>, vector<16x96xf32> -> vector<16x96xf32>
    %c1_86 = arith.constant 1 : index
    %c0_87 = arith.constant 0 : index
    %c0_88 = arith.constant 0 : index
    %223 = vector.load %arg9[%c1_86, %c0_87, %c0_88] : memref<2x1x96xf32, #tpu.memory_space<vmem>>, vector<1x1x96xf32>
    %224 = vector.shape_cast %223 : vector<1x1x96xf32> to vector<1x96xf32>
    %225 = vector.broadcast %224 : vector<1x96xf32> to vector<16x96xf32>
    %226 = arith.addf %222, %225 : vector<16x96xf32>
    %227 = vector.extract_strided_slice %226 {offsets = [0, 0], sizes = [16, 8], strides = [1, 1]} : vector<16x96xf32> to vector<16x8xf32>
    %228 = vector.shape_cast %227 : vector<16x8xf32> to vector<2x8x8xf32>
    %229 = vector.extract_strided_slice %226 {offsets = [0, 32], sizes = [16, 8], strides = [1, 1]} : vector<16x96xf32> to vector<16x8xf32>
    %230 = vector.shape_cast %229 : vector<16x8xf32> to vector<2x8x8xf32>
    %231 = vector.extract_strided_slice %226 {offsets = [0, 64], sizes = [16, 8], strides = [1, 1]} : vector<16x96xf32> to vector<16x8xf32>
    %232 = vector.shape_cast %231 : vector<16x8xf32> to vector<2x8x8xf32>
    %233 = arith.truncf %228 : vector<2x8x8xf32> to vector<2x8x8xbf16>
    %234 = arith.truncf %230 : vector<2x8x8xf32> to vector<2x8x8xbf16>
    "tpu.trace_start"() <{level = 10 : i32, message = "bqd,bkd->bqk"}> : () -> ()
    %cst_89 = arith.constant dense<0.000000e+00> : vector<2x8x8xf32>
    %235 = tpu.matmul %233, %234, %cst_89 {dimension_numbers = #tpu.dot_dimension_numbers<[2], [2], [1], [1], [0, 0, 0, 1, 1, 1], [0], [0]>} : vector<2x8x8xbf16>, vector<2x8x8xbf16>, vector<2x8x8xf32> -> vector<2x8x8xf32>
    "tpu.trace_stop"() : () -> ()
    %236 = vector.broadcast %24 : vector<2x1x8xf32> to vector<2x8x8xf32>
    %237 = arith.addf %235, %236 : vector<2x8x8xf32>
    %cst_90 = arith.constant dense<0xFF800000> : vector<2x8xf32>
    %238 = vector.multi_reduction <maximumf>, %237, %cst_90 [2] : vector<2x8x8xf32> to vector<2x8xf32>
    %239 = vector.shape_cast %238 : vector<2x8xf32> to vector<2x8x1xf32>
    %240 = vector.broadcast %239 : vector<2x8x1xf32> to vector<2x8x8xf32>
    %241 = arith.subf %237, %240 : vector<2x8x8xf32>
    %242 = math.exp %241 : vector<2x8x8xf32>
    %cst_91 = arith.constant dense<0.000000e+00> : vector<2x8xf32>
    %243 = vector.multi_reduction <add>, %242, %cst_91 [2] : vector<2x8x8xf32> to vector<2x8xf32>
    %244 = vector.shape_cast %243 : vector<2x8xf32> to vector<2x8x1xf32>
    %245 = tpu.reciprocal %244 {approx = true} : vector<2x8x1xf32> -> vector<2x8x1xf32>
    %246 = vector.broadcast %245 : vector<2x8x1xf32> to vector<2x8x8xf32>
    %247 = arith.mulf %242, %246 : vector<2x8x8xf32>
    %248 = arith.truncf %247 : vector<2x8x8xf32> to vector<2x8x8xbf16>
    %249 = arith.truncf %232 : vector<2x8x8xf32> to vector<2x8x8xbf16>
    "tpu.trace_start"() <{level = 10 : i32, message = "bqk,bkd->bqd"}> : () -> ()
    %cst_92 = arith.constant dense<0.000000e+00> : vector<2x8x8xf32>
    %250 = tpu.matmul %248, %249, %cst_92 {dimension_numbers = #tpu.dot_dimension_numbers<[2], [1], [1], [2], [0, 0, 0, 1, 1, 2], [0], [0]>} : vector<2x8x8xbf16>, vector<2x8x8xbf16>, vector<2x8x8xf32> -> vector<2x8x8xf32>
    "tpu.trace_stop"() : () -> ()
    %251 = vector.shape_cast %250 : vector<2x8x8xf32> to vector<16x8xf32>
    %252 = vector.extract_strided_slice %226 {offsets = [0, 8], sizes = [16, 8], strides = [1, 1]} : vector<16x96xf32> to vector<16x8xf32>
    %253 = vector.shape_cast %252 : vector<16x8xf32> to vector<2x8x8xf32>
    %254 = vector.extract_strided_slice %226 {offsets = [0, 40], sizes = [16, 8], strides = [1, 1]} : vector<16x96xf32> to vector<16x8xf32>
    %255 = vector.shape_cast %254 : vector<16x8xf32> to vector<2x8x8xf32>
    %256 = vector.extract_strided_slice %226 {offsets = [0, 72], sizes = [16, 8], strides = [1, 1]} : vector<16x96xf32> to vector<16x8xf32>
    %257 = vector.shape_cast %256 : vector<16x8xf32> to vector<2x8x8xf32>
    %258 = arith.truncf %253 : vector<2x8x8xf32> to vector<2x8x8xbf16>
    %259 = arith.truncf %255 : vector<2x8x8xf32> to vector<2x8x8xbf16>
    "tpu.trace_start"() <{level = 10 : i32, message = "bqd,bkd->bqk"}> : () -> ()
    %cst_93 = arith.constant dense<0.000000e+00> : vector<2x8x8xf32>
    %260 = tpu.matmul %258, %259, %cst_93 {dimension_numbers = #tpu.dot_dimension_numbers<[2], [2], [1], [1], [0, 0, 0, 1, 1, 1], [0], [0]>} : vector<2x8x8xbf16>, vector<2x8x8xbf16>, vector<2x8x8xf32> -> vector<2x8x8xf32>
    "tpu.trace_stop"() : () -> ()
    %261 = vector.broadcast %24 : vector<2x1x8xf32> to vector<2x8x8xf32>
    %262 = arith.addf %260, %261 : vector<2x8x8xf32>
    %cst_94 = arith.constant dense<0xFF800000> : vector<2x8xf32>
    %263 = vector.multi_reduction <maximumf>, %262, %cst_94 [2] : vector<2x8x8xf32> to vector<2x8xf32>
    %264 = vector.shape_cast %263 : vector<2x8xf32> to vector<2x8x1xf32>
    %265 = vector.broadcast %264 : vector<2x8x1xf32> to vector<2x8x8xf32>
    %266 = arith.subf %262, %265 : vector<2x8x8xf32>
    %267 = math.exp %266 : vector<2x8x8xf32>
    %cst_95 = arith.constant dense<0.000000e+00> : vector<2x8xf32>
    %268 = vector.multi_reduction <add>, %267, %cst_95 [2] : vector<2x8x8xf32> to vector<2x8xf32>
    %269 = vector.shape_cast %268 : vector<2x8xf32> to vector<2x8x1xf32>
    %270 = tpu.reciprocal %269 {approx = true} : vector<2x8x1xf32> -> vector<2x8x1xf32>
    %271 = vector.broadcast %270 : vector<2x8x1xf32> to vector<2x8x8xf32>
    %272 = arith.mulf %267, %271 : vector<2x8x8xf32>
    %273 = arith.truncf %272 : vector<2x8x8xf32> to vector<2x8x8xbf16>
    %274 = arith.truncf %257 : vector<2x8x8xf32> to vector<2x8x8xbf16>
    "tpu.trace_start"() <{level = 10 : i32, message = "bqk,bkd->bqd"}> : () -> ()
    %cst_96 = arith.constant dense<0.000000e+00> : vector<2x8x8xf32>
    %275 = tpu.matmul %273, %274, %cst_96 {dimension_numbers = #tpu.dot_dimension_numbers<[2], [1], [1], [2], [0, 0, 0, 1, 1, 2], [0], [0]>} : vector<2x8x8xbf16>, vector<2x8x8xbf16>, vector<2x8x8xf32> -> vector<2x8x8xf32>
    "tpu.trace_stop"() : () -> ()
    %276 = vector.shape_cast %275 : vector<2x8x8xf32> to vector<16x8xf32>
    %277 = vector.extract_strided_slice %226 {offsets = [0, 16], sizes = [16, 8], strides = [1, 1]} : vector<16x96xf32> to vector<16x8xf32>
    %278 = vector.shape_cast %277 : vector<16x8xf32> to vector<2x8x8xf32>
    %279 = vector.extract_strided_slice %226 {offsets = [0, 48], sizes = [16, 8], strides = [1, 1]} : vector<16x96xf32> to vector<16x8xf32>
    %280 = vector.shape_cast %279 : vector<16x8xf32> to vector<2x8x8xf32>
    %281 = vector.extract_strided_slice %226 {offsets = [0, 80], sizes = [16, 8], strides = [1, 1]} : vector<16x96xf32> to vector<16x8xf32>
    %282 = vector.shape_cast %281 : vector<16x8xf32> to vector<2x8x8xf32>
    %283 = arith.truncf %278 : vector<2x8x8xf32> to vector<2x8x8xbf16>
    %284 = arith.truncf %280 : vector<2x8x8xf32> to vector<2x8x8xbf16>
    "tpu.trace_start"() <{level = 10 : i32, message = "bqd,bkd->bqk"}> : () -> ()
    %cst_97 = arith.constant dense<0.000000e+00> : vector<2x8x8xf32>
    %285 = tpu.matmul %283, %284, %cst_97 {dimension_numbers = #tpu.dot_dimension_numbers<[2], [2], [1], [1], [0, 0, 0, 1, 1, 1], [0], [0]>} : vector<2x8x8xbf16>, vector<2x8x8xbf16>, vector<2x8x8xf32> -> vector<2x8x8xf32>
    "tpu.trace_stop"() : () -> ()
    %286 = vector.broadcast %24 : vector<2x1x8xf32> to vector<2x8x8xf32>
    %287 = arith.addf %285, %286 : vector<2x8x8xf32>
    %cst_98 = arith.constant dense<0xFF800000> : vector<2x8xf32>
    %288 = vector.multi_reduction <maximumf>, %287, %cst_98 [2] : vector<2x8x8xf32> to vector<2x8xf32>
    %289 = vector.shape_cast %288 : vector<2x8xf32> to vector<2x8x1xf32>
    %290 = vector.broadcast %289 : vector<2x8x1xf32> to vector<2x8x8xf32>
    %291 = arith.subf %287, %290 : vector<2x8x8xf32>
    %292 = math.exp %291 : vector<2x8x8xf32>
    %cst_99 = arith.constant dense<0.000000e+00> : vector<2x8xf32>
    %293 = vector.multi_reduction <add>, %292, %cst_99 [2] : vector<2x8x8xf32> to vector<2x8xf32>
    %294 = vector.shape_cast %293 : vector<2x8xf32> to vector<2x8x1xf32>
    %295 = tpu.reciprocal %294 {approx = true} : vector<2x8x1xf32> -> vector<2x8x1xf32>
    %296 = vector.broadcast %295 : vector<2x8x1xf32> to vector<2x8x8xf32>
    %297 = arith.mulf %292, %296 : vector<2x8x8xf32>
    %298 = arith.truncf %297 : vector<2x8x8xf32> to vector<2x8x8xbf16>
    %299 = arith.truncf %282 : vector<2x8x8xf32> to vector<2x8x8xbf16>
    "tpu.trace_start"() <{level = 10 : i32, message = "bqk,bkd->bqd"}> : () -> ()
    %cst_100 = arith.constant dense<0.000000e+00> : vector<2x8x8xf32>
    %300 = tpu.matmul %298, %299, %cst_100 {dimension_numbers = #tpu.dot_dimension_numbers<[2], [1], [1], [2], [0, 0, 0, 1, 1, 2], [0], [0]>} : vector<2x8x8xbf16>, vector<2x8x8xbf16>, vector<2x8x8xf32> -> vector<2x8x8xf32>
    "tpu.trace_stop"() : () -> ()
    %301 = vector.shape_cast %300 : vector<2x8x8xf32> to vector<16x8xf32>
    %302 = vector.extract_strided_slice %226 {offsets = [0, 24], sizes = [16, 8], strides = [1, 1]} : vector<16x96xf32> to vector<16x8xf32>
    %303 = vector.shape_cast %302 : vector<16x8xf32> to vector<2x8x8xf32>
    %304 = vector.extract_strided_slice %226 {offsets = [0, 56], sizes = [16, 8], strides = [1, 1]} : vector<16x96xf32> to vector<16x8xf32>
    %305 = vector.shape_cast %304 : vector<16x8xf32> to vector<2x8x8xf32>
    %306 = vector.extract_strided_slice %226 {offsets = [0, 88], sizes = [16, 8], strides = [1, 1]} : vector<16x96xf32> to vector<16x8xf32>
    %307 = vector.shape_cast %306 : vector<16x8xf32> to vector<2x8x8xf32>
    %308 = arith.truncf %303 : vector<2x8x8xf32> to vector<2x8x8xbf16>
    %309 = arith.truncf %305 : vector<2x8x8xf32> to vector<2x8x8xbf16>
    "tpu.trace_start"() <{level = 10 : i32, message = "bqd,bkd->bqk"}> : () -> ()
    %cst_101 = arith.constant dense<0.000000e+00> : vector<2x8x8xf32>
    %310 = tpu.matmul %308, %309, %cst_101 {dimension_numbers = #tpu.dot_dimension_numbers<[2], [2], [1], [1], [0, 0, 0, 1, 1, 1], [0], [0]>} : vector<2x8x8xbf16>, vector<2x8x8xbf16>, vector<2x8x8xf32> -> vector<2x8x8xf32>
    "tpu.trace_stop"() : () -> ()
    %311 = vector.broadcast %24 : vector<2x1x8xf32> to vector<2x8x8xf32>
    %312 = arith.addf %310, %311 : vector<2x8x8xf32>
    %cst_102 = arith.constant dense<0xFF800000> : vector<2x8xf32>
    %313 = vector.multi_reduction <maximumf>, %312, %cst_102 [2] : vector<2x8x8xf32> to vector<2x8xf32>
    %314 = vector.shape_cast %313 : vector<2x8xf32> to vector<2x8x1xf32>
    %315 = vector.broadcast %314 : vector<2x8x1xf32> to vector<2x8x8xf32>
    %316 = arith.subf %312, %315 : vector<2x8x8xf32>
    %317 = math.exp %316 : vector<2x8x8xf32>
    %cst_103 = arith.constant dense<0.000000e+00> : vector<2x8xf32>
    %318 = vector.multi_reduction <add>, %317, %cst_103 [2] : vector<2x8x8xf32> to vector<2x8xf32>
    %319 = vector.shape_cast %318 : vector<2x8xf32> to vector<2x8x1xf32>
    %320 = tpu.reciprocal %319 {approx = true} : vector<2x8x1xf32> -> vector<2x8x1xf32>
    %321 = vector.broadcast %320 : vector<2x8x1xf32> to vector<2x8x8xf32>
    %322 = arith.mulf %317, %321 : vector<2x8x8xf32>
    %323 = arith.truncf %322 : vector<2x8x8xf32> to vector<2x8x8xbf16>
    %324 = arith.truncf %307 : vector<2x8x8xf32> to vector<2x8x8xbf16>
    "tpu.trace_start"() <{level = 10 : i32, message = "bqk,bkd->bqd"}> : () -> ()
    %cst_104 = arith.constant dense<0.000000e+00> : vector<2x8x8xf32>
    %325 = tpu.matmul %323, %324, %cst_104 {dimension_numbers = #tpu.dot_dimension_numbers<[2], [1], [1], [2], [0, 0, 0, 1, 1, 2], [0], [0]>} : vector<2x8x8xbf16>, vector<2x8x8xbf16>, vector<2x8x8xf32> -> vector<2x8x8xf32>
    "tpu.trace_stop"() : () -> ()
    %326 = vector.shape_cast %325 : vector<2x8x8xf32> to vector<16x8xf32>
    %327 = tpu.concatenate %251, %276, %301, %326 in 1 : vector<16x8xf32>, vector<16x8xf32>, vector<16x8xf32>, vector<16x8xf32> -> vector<16x32xf32>
    %328 = arith.truncf %327 : vector<16x32xf32> to vector<16x32xbf16>
    %c1_105 = arith.constant 1 : index
    %c0_106 = arith.constant 0 : index
    %c0_107 = arith.constant 0 : index
    %329 = vector.load %arg10[%c1_105, %c0_106, %c0_107] : memref<2x32x32xbf16, #tpu.memory_space<vmem>>, vector<1x32x32xbf16>
    %330 = vector.shape_cast %329 : vector<1x32x32xbf16> to vector<32x32xbf16>
    %cst_108 = arith.constant dense<0.000000e+00> : vector<16x32xf32>
    %331 = tpu.matmul %328, %330, %cst_108 {dimension_numbers = #tpu.dot_dimension_numbers<[1], [0], [0], [1], [0, 0, 1, 1], [], []>} : vector<16x32xbf16>, vector<32x32xbf16>, vector<16x32xf32> -> vector<16x32xf32>
    %c1_109 = arith.constant 1 : index
    %c0_110 = arith.constant 0 : index
    %c0_111 = arith.constant 0 : index
    %332 = vector.load %arg11[%c1_109, %c0_110, %c0_111] : memref<2x1x32xf32, #tpu.memory_space<vmem>>, vector<1x1x32xf32>
    %333 = vector.shape_cast %332 : vector<1x1x32xf32> to vector<1x32xf32>
    %334 = vector.broadcast %333 : vector<1x32xf32> to vector<16x32xf32>
    %335 = arith.addf %331, %334 : vector<16x32xf32>
    %336 = arith.addf %218, %335 : vector<16x32xf32>
    %c1_112 = arith.constant 1 : index
    %c0_113 = arith.constant 0 : index
    %c0_114 = arith.constant 0 : index
    %337 = vector.load %arg12[%c1_112, %c0_113, %c0_114] : memref<2x1x32xf32, #tpu.memory_space<vmem>>, vector<1x1x32xf32>
    %338 = vector.shape_cast %337 : vector<1x1x32xf32> to vector<1x32xf32>
    %c1_115 = arith.constant 1 : index
    %c0_116 = arith.constant 0 : index
    %c0_117 = arith.constant 0 : index
    %339 = vector.load %arg13[%c1_115, %c0_116, %c0_117] : memref<2x1x32xf32, #tpu.memory_space<vmem>>, vector<1x1x32xf32>
    %340 = vector.shape_cast %339 : vector<1x1x32xf32> to vector<1x32xf32>
    %cst_118 = arith.constant dense<0.000000e+00> : vector<16xf32>
    %341 = vector.multi_reduction <add>, %336, %cst_118 [1] : vector<16x32xf32> to vector<16xf32>
    %342 = vector.shape_cast %341 : vector<16xf32> to vector<16x1xf32>
    %cst_119 = arith.constant 3.200000e+01 : f32
    %343 = vector.broadcast %cst_119 : f32 to vector<16x1xf32>
    %344 = arith.divf %342, %343 : vector<16x1xf32>
    %345 = vector.broadcast %344 : vector<16x1xf32> to vector<16x32xf32>
    %346 = arith.subf %336, %345 : vector<16x32xf32>
    %347 = arith.mulf %346, %346 : vector<16x32xf32>
    %cst_120 = arith.constant dense<0.000000e+00> : vector<16xf32>
    %348 = vector.multi_reduction <add>, %347, %cst_120 [1] : vector<16x32xf32> to vector<16xf32>
    %349 = vector.shape_cast %348 : vector<16xf32> to vector<16x1xf32>
    %cst_121 = arith.constant 3.200000e+01 : f32
    %350 = vector.broadcast %cst_121 : f32 to vector<16x1xf32>
    %351 = arith.divf %349, %350 : vector<16x1xf32>
    %352 = vector.broadcast %344 : vector<16x1xf32> to vector<16x32xf32>
    %353 = arith.subf %336, %352 : vector<16x32xf32>
    %cst_122 = arith.constant 9.99999974E-6 : f32
    %354 = vector.broadcast %cst_122 : f32 to vector<16x1xf32>
    %355 = arith.addf %351, %354 : vector<16x1xf32>
    %356 = math.rsqrt %355 : vector<16x1xf32>
    %357 = vector.broadcast %356 : vector<16x1xf32> to vector<16x32xf32>
    %358 = arith.mulf %353, %357 : vector<16x32xf32>
    %359 = vector.broadcast %338 : vector<1x32xf32> to vector<16x32xf32>
    %360 = arith.mulf %358, %359 : vector<16x32xf32>
    %361 = vector.broadcast %340 : vector<1x32xf32> to vector<16x32xf32>
    %362 = arith.addf %360, %361 : vector<16x32xf32>
    %363 = arith.truncf %362 : vector<16x32xf32> to vector<16x32xbf16>
    %c1_123 = arith.constant 1 : index
    %c0_124 = arith.constant 0 : index
    %c0_125 = arith.constant 0 : index
    %364 = vector.load %arg14[%c1_123, %c0_124, %c0_125] : memref<2x32x64xbf16, #tpu.memory_space<vmem>>, vector<1x32x64xbf16>
    %365 = vector.shape_cast %364 : vector<1x32x64xbf16> to vector<32x64xbf16>
    %cst_126 = arith.constant dense<0.000000e+00> : vector<16x64xf32>
    %366 = tpu.matmul %363, %365, %cst_126 {dimension_numbers = #tpu.dot_dimension_numbers<[1], [0], [0], [1], [0, 0, 1, 1], [], []>} : vector<16x32xbf16>, vector<32x64xbf16>, vector<16x64xf32> -> vector<16x64xf32>
    %c1_127 = arith.constant 1 : index
    %c0_128 = arith.constant 0 : index
    %c0_129 = arith.constant 0 : index
    %367 = vector.load %arg15[%c1_127, %c0_128, %c0_129] : memref<2x1x64xf32, #tpu.memory_space<vmem>>, vector<1x1x64xf32>
    %368 = vector.shape_cast %367 : vector<1x1x64xf32> to vector<1x64xf32>
    %369 = vector.broadcast %368 : vector<1x64xf32> to vector<16x64xf32>
    %370 = arith.addf %366, %369 : vector<16x64xf32>
    %cst_130 = arith.constant 0.000000e+00 : f32
    %371 = vector.broadcast %cst_130 : f32 to vector<16x64xf32>
    %372 = arith.maximumf %370, %371 : vector<16x64xf32>
    %373 = arith.truncf %372 : vector<16x64xf32> to vector<16x64xbf16>
    %c1_131 = arith.constant 1 : index
    %c0_132 = arith.constant 0 : index
    %c0_133 = arith.constant 0 : index
    %374 = vector.load %arg16[%c1_131, %c0_132, %c0_133] : memref<2x64x32xbf16, #tpu.memory_space<vmem>>, vector<1x64x32xbf16>
    %375 = vector.shape_cast %374 : vector<1x64x32xbf16> to vector<64x32xbf16>
    %cst_134 = arith.constant dense<0.000000e+00> : vector<16x32xf32>
    %376 = tpu.matmul %373, %375, %cst_134 {dimension_numbers = #tpu.dot_dimension_numbers<[1], [0], [0], [1], [0, 0, 1, 1], [], []>} : vector<16x64xbf16>, vector<64x32xbf16>, vector<16x32xf32> -> vector<16x32xf32>
    %c1_135 = arith.constant 1 : index
    %c0_136 = arith.constant 0 : index
    %c0_137 = arith.constant 0 : index
    %377 = vector.load %arg17[%c1_135, %c0_136, %c0_137] : memref<2x1x32xf32, #tpu.memory_space<vmem>>, vector<1x1x32xf32>
    %378 = vector.shape_cast %377 : vector<1x1x32xf32> to vector<1x32xf32>
    %379 = vector.broadcast %378 : vector<1x32xf32> to vector<16x32xf32>
    %380 = arith.addf %376, %379 : vector<16x32xf32>
    %381 = arith.addf %362, %380 : vector<16x32xf32>
    %c1_138 = arith.constant 1 : index
    %c0_139 = arith.constant 0 : index
    %c0_140 = arith.constant 0 : index
    %382 = vector.load %arg18[%c1_138, %c0_139, %c0_140] : memref<2x1x32xf32, #tpu.memory_space<vmem>>, vector<1x1x32xf32>
    %383 = vector.shape_cast %382 : vector<1x1x32xf32> to vector<1x32xf32>
    %c1_141 = arith.constant 1 : index
    %c0_142 = arith.constant 0 : index
    %c0_143 = arith.constant 0 : index
    %384 = vector.load %arg19[%c1_141, %c0_142, %c0_143] : memref<2x1x32xf32, #tpu.memory_space<vmem>>, vector<1x1x32xf32>
    %385 = vector.shape_cast %384 : vector<1x1x32xf32> to vector<1x32xf32>
    %cst_144 = arith.constant dense<0.000000e+00> : vector<16xf32>
    %386 = vector.multi_reduction <add>, %381, %cst_144 [1] : vector<16x32xf32> to vector<16xf32>
    %387 = vector.shape_cast %386 : vector<16xf32> to vector<16x1xf32>
    %cst_145 = arith.constant 3.200000e+01 : f32
    %388 = vector.broadcast %cst_145 : f32 to vector<16x1xf32>
    %389 = arith.divf %387, %388 : vector<16x1xf32>
    %390 = vector.broadcast %389 : vector<16x1xf32> to vector<16x32xf32>
    %391 = arith.subf %381, %390 : vector<16x32xf32>
    %392 = arith.mulf %391, %391 : vector<16x32xf32>
    %cst_146 = arith.constant dense<0.000000e+00> : vector<16xf32>
    %393 = vector.multi_reduction <add>, %392, %cst_146 [1] : vector<16x32xf32> to vector<16xf32>
    %394 = vector.shape_cast %393 : vector<16xf32> to vector<16x1xf32>
    %cst_147 = arith.constant 3.200000e+01 : f32
    %395 = vector.broadcast %cst_147 : f32 to vector<16x1xf32>
    %396 = arith.divf %394, %395 : vector<16x1xf32>
    %397 = vector.broadcast %389 : vector<16x1xf32> to vector<16x32xf32>
    %398 = arith.subf %381, %397 : vector<16x32xf32>
    %cst_148 = arith.constant 9.99999974E-6 : f32
    %399 = vector.broadcast %cst_148 : f32 to vector<16x1xf32>
    %400 = arith.addf %396, %399 : vector<16x1xf32>
    %401 = math.rsqrt %400 : vector<16x1xf32>
    %402 = vector.broadcast %401 : vector<16x1xf32> to vector<16x32xf32>
    %403 = arith.mulf %398, %402 : vector<16x32xf32>
    %404 = vector.broadcast %383 : vector<1x32xf32> to vector<16x32xf32>
    %405 = arith.mulf %403, %404 : vector<16x32xf32>
    %406 = vector.broadcast %385 : vector<1x32xf32> to vector<16x32xf32>
    %407 = arith.addf %405, %406 : vector<16x32xf32>
    %408 = vector.shape_cast %407 : vector<16x32xf32> to vector<2x8x32xf32>
    %cst_149 = arith.constant dense<0.000000e+00> : vector<2x32xf32>
    %409 = vector.multi_reduction <add>, %408, %cst_149 [1] : vector<2x8x32xf32> to vector<2x32xf32>
    %410 = vector.broadcast %29 : vector<2x1xf32> to vector<2x32xf32>
    %411 = arith.divf %409, %410 : vector<2x32xf32>
    %412 = arith.truncf %411 : vector<2x32xf32> to vector<2x32xbf16>
    %c0_150 = arith.constant 0 : index
    %c0_151 = arith.constant 0 : index
    %413 = vector.load %arg20[%c0_150, %c0_151] : memref<32x64xbf16, #tpu.memory_space<vmem>>, vector<32x64xbf16>
    %cst_152 = arith.constant dense<0.000000e+00> : vector<2x64xf32>
    %414 = tpu.matmul %412, %413, %cst_152 {dimension_numbers = #tpu.dot_dimension_numbers<[1], [0], [0], [1], [0, 0, 1, 1], [], []>} : vector<2x32xbf16>, vector<32x64xbf16>, vector<2x64xf32> -> vector<2x64xf32>
    %c0_153 = arith.constant 0 : index
    %c0_154 = arith.constant 0 : index
    %415 = vector.load %arg21[%c0_153, %c0_154] : memref<1x64xf32, #tpu.memory_space<vmem>>, vector<1x64xf32>
    %416 = vector.broadcast %415 : vector<1x64xf32> to vector<2x64xf32>
    %417 = arith.addf %414, %416 : vector<2x64xf32>
    %cst_155 = arith.constant 0.000000e+00 : f32
    %418 = vector.broadcast %cst_155 : f32 to vector<2x64xf32>
    %419 = arith.maximumf %417, %418 : vector<2x64xf32>
    %420 = arith.truncf %419 : vector<2x64xf32> to vector<2x64xbf16>
    %c0_156 = arith.constant 0 : index
    %c0_157 = arith.constant 0 : index
    %421 = vector.load %arg22[%c0_156, %c0_157] : memref<64x48xbf16, #tpu.memory_space<vmem>>, vector<64x48xbf16>
    %cst_158 = arith.constant dense<0.000000e+00> : vector<2x48xf32>
    %422 = tpu.matmul %420, %421, %cst_158 {dimension_numbers = #tpu.dot_dimension_numbers<[1], [0], [0], [1], [0, 0, 1, 1], [], []>} : vector<2x64xbf16>, vector<64x48xbf16>, vector<2x48xf32> -> vector<2x48xf32>
    %c0_159 = arith.constant 0 : index
    %c0_160 = arith.constant 0 : index
    %423 = vector.load %arg23[%c0_159, %c0_160] : memref<1x48xf32, #tpu.memory_space<vmem>>, vector<1x48xf32>
    %424 = vector.broadcast %423 : vector<1x48xf32> to vector<2x48xf32>
    %425 = arith.addf %422, %424 : vector<2x48xf32>
    %426 = vector.extract_strided_slice %425 {offsets = [0, 0], sizes = [2, 16], strides = [1, 1]} : vector<2x48xf32> to vector<2x16xf32>
    %427 = vector.extract_strided_slice %425 {offsets = [0, 16], sizes = [2, 16], strides = [1, 1]} : vector<2x48xf32> to vector<2x16xf32>
    %428 = vector.extract_strided_slice %425 {offsets = [0, 32], sizes = [2, 16], strides = [1, 1]} : vector<2x48xf32> to vector<2x16xf32>
    %429 = arith.maximumf %426, %427 : vector<2x16xf32>
    %430 = arith.maximumf %429, %428 : vector<2x16xf32>
    %431 = arith.subf %426, %430 : vector<2x16xf32>
    %432 = math.exp %431 : vector<2x16xf32>
    %433 = arith.subf %427, %430 : vector<2x16xf32>
    %434 = math.exp %433 : vector<2x16xf32>
    %435 = arith.subf %428, %430 : vector<2x16xf32>
    %436 = math.exp %435 : vector<2x16xf32>
    %437 = arith.addf %432, %434 : vector<2x16xf32>
    %438 = arith.addf %437, %436 : vector<2x16xf32>
    %cst_161 = arith.constant 1.000000e+00 : f32
    %439 = vector.broadcast %cst_161 : f32 to vector<2x16xf32>
    %440 = arith.divf %439, %438 : vector<2x16xf32>
    %441 = arith.mulf %432, %440 : vector<2x16xf32>
    %442 = vector.shape_cast %441 : vector<2x16xf32> to vector<2x1x16xf32>
    %c0_162 = arith.constant 0 : index
    %c0_163 = arith.constant 0 : index
    %c0_164 = arith.constant 0 : index
    %443 = vector.load %arg24[%c0_162, %c0_163, %c0_164] : memref<2x3x16xf32, #tpu.memory_space<vmem>>, vector<2x1x16xf32>
    tpu.vector_store %arg24[%c0_162, %c0_163, %c0_164], %442 {strides = array<i32>} : memref<2x3x16xf32, #tpu.memory_space<vmem>>, vector<2x1x16xf32>,
    %444 = arith.mulf %434, %440 : vector<2x16xf32>
    %445 = vector.shape_cast %444 : vector<2x16xf32> to vector<2x1x16xf32>
    %c0_165 = arith.constant 0 : index
    %c1_166 = arith.constant 1 : index
    %c0_167 = arith.constant 0 : index
    %446 = vector.load %arg24[%c0_165, %c1_166, %c0_167] : memref<2x3x16xf32, #tpu.memory_space<vmem>>, vector<2x1x16xf32>
    tpu.vector_store %arg24[%c0_165, %c1_166, %c0_167], %445 {strides = array<i32>} : memref<2x3x16xf32, #tpu.memory_space<vmem>>, vector<2x1x16xf32>,
    %447 = arith.mulf %436, %440 : vector<2x16xf32>
    %448 = vector.shape_cast %447 : vector<2x16xf32> to vector<2x1x16xf32>
    %c0_168 = arith.constant 0 : index
    %c2 = arith.constant 2 : index
    %c0_169 = arith.constant 0 : index
    %449 = vector.load %arg24[%c0_168, %c2, %c0_169] : memref<2x3x16xf32, #tpu.memory_space<vmem>>, vector<2x1x16xf32>
    tpu.vector_store %arg24[%c0_168, %c2, %c0_169], %448 {strides = array<i32>} : memref<2x3x16xf32, #tpu.memory_space<vmem>>, vector<2x1x16xf32>,
    return
  }
  func.func @transform_0(%arg0: i32) -> (i32, i32) {
    %c0_i32 = arith.constant 0 : i32
    %c0_i32_0 = arith.constant 0 : i32
    return %arg0, %c0_i32 : i32, i32
  }
  func.func @transform_1(%arg0: i32) -> (i32, i32) {
    %c0_i32 = arith.constant 0 : i32
    %c0_i32_0 = arith.constant 0 : i32
    return %arg0, %c0_i32 : i32, i32
  }
  func.func @transform_2(%arg0: i32) -> (i32, i32, i32) {
    %c0_i32 = arith.constant 0 : i32
    %c0_i32_0 = arith.constant 0 : i32
    %c0_i32_1 = arith.constant 0 : i32
    return %arg0, %c0_i32, %c0_i32_0 : i32, i32, i32
  }
  func.func @transform_3(%arg0: i32) -> (i32, i32) {
    %c0_i32 = arith.constant 0 : i32
    %c0_i32_0 = arith.constant 0 : i32
    %c0_i32_1 = arith.constant 0 : i32
    return %c0_i32, %c0_i32_0 : i32, i32
  }
  func.func @transform_4(%arg0: i32) -> (i32, i32) {
    %c0_i32 = arith.constant 0 : i32
    %c0_i32_0 = arith.constant 0 : i32
    %c0_i32_1 = arith.constant 0 : i32
    return %c0_i32, %c0_i32_0 : i32, i32
  }
  func.func @transform_5(%arg0: i32) -> (i32, i32) {
    %c0_i32 = arith.constant 0 : i32
    %c0_i32_0 = arith.constant 0 : i32
    %c0_i32_1 = arith.constant 0 : i32
    return %c0_i32, %c0_i32_0 : i32, i32
  }
  func.func @transform_6(%arg0: i32) -> (i32, i32) {
    %c0_i32 = arith.constant 0 : i32
    %c0_i32_0 = arith.constant 0 : i32
    %c0_i32_1 = arith.constant 0 : i32
    return %c0_i32, %c0_i32_0 : i32, i32
  }
  func.func @transform_7(%arg0: i32) -> (i32, i32, i32) {
    %c0_i32 = arith.constant 0 : i32
    %c0_i32_0 = arith.constant 0 : i32
    %c0_i32_1 = arith.constant 0 : i32
    %c0_i32_2 = arith.constant 0 : i32
    return %c0_i32, %c0_i32_0, %c0_i32_1 : i32, i32, i32
  }
  func.func @transform_8(%arg0: i32) -> (i32, i32, i32) {
    %c0_i32 = arith.constant 0 : i32
    %c0_i32_0 = arith.constant 0 : i32
    %c0_i32_1 = arith.constant 0 : i32
    %c0_i32_2 = arith.constant 0 : i32
    return %c0_i32, %c0_i32_0, %c0_i32_1 : i32, i32, i32
  }
  func.func @transform_9(%arg0: i32) -> (i32, i32, i32) {
    %c0_i32 = arith.constant 0 : i32
    %c0_i32_0 = arith.constant 0 : i32
    %c0_i32_1 = arith.constant 0 : i32
    %c0_i32_2 = arith.constant 0 : i32
    return %c0_i32, %c0_i32_0, %c0_i32_1 : i32, i32, i32
  }
  func.func @transform_10(%arg0: i32) -> (i32, i32, i32) {
    %c0_i32 = arith.constant 0 : i32
    %c0_i32_0 = arith.constant 0 : i32
    %c0_i32_1 = arith.constant 0 : i32
    %c0_i32_2 = arith.constant 0 : i32
    return %c0_i32, %c0_i32_0, %c0_i32_1 : i32, i32, i32
  }
  func.func @transform_11(%arg0: i32) -> (i32, i32, i32) {
    %c0_i32 = arith.constant 0 : i32
    %c0_i32_0 = arith.constant 0 : i32
    %c0_i32_1 = arith.constant 0 : i32
    %c0_i32_2 = arith.constant 0 : i32
    return %c0_i32, %c0_i32_0, %c0_i32_1 : i32, i32, i32
  }
  func.func @transform_12(%arg0: i32) -> (i32, i32, i32) {
    %c0_i32 = arith.constant 0 : i32
    %c0_i32_0 = arith.constant 0 : i32
    %c0_i32_1 = arith.constant 0 : i32
    %c0_i32_2 = arith.constant 0 : i32
    return %c0_i32, %c0_i32_0, %c0_i32_1 : i32, i32, i32
  }
  func.func @transform_13(%arg0: i32) -> (i32, i32, i32) {
    %c0_i32 = arith.constant 0 : i32
    %c0_i32_0 = arith.constant 0 : i32
    %c0_i32_1 = arith.constant 0 : i32
    %c0_i32_2 = arith.constant 0 : i32
    return %c0_i32, %c0_i32_0, %c0_i32_1 : i32, i32, i32
  }
  func.func @transform_14(%arg0: i32) -> (i32, i32, i32) {
    %c0_i32 = arith.constant 0 : i32
    %c0_i32_0 = arith.constant 0 : i32
    %c0_i32_1 = arith.constant 0 : i32
    %c0_i32_2 = arith.constant 0 : i32
    return %c0_i32, %c0_i32_0, %c0_i32_1 : i32, i32, i32
  }
  func.func @transform_15(%arg0: i32) -> (i32, i32, i32) {
    %c0_i32 = arith.constant 0 : i32
    %c0_i32_0 = arith.constant 0 : i32
    %c0_i32_1 = arith.constant 0 : i32
    %c0_i32_2 = arith.constant 0 : i32
    return %c0_i32, %c0_i32_0, %c0_i32_1 : i32, i32, i32
  }
  func.func @transform_16(%arg0: i32) -> (i32, i32, i32) {
    %c0_i32 = arith.constant 0 : i32
    %c0_i32_0 = arith.constant 0 : i32
    %c0_i32_1 = arith.constant 0 : i32
    %c0_i32_2 = arith.constant 0 : i32
    return %c0_i32, %c0_i32_0, %c0_i32_1 : i32, i32, i32
  }
  func.func @transform_17(%arg0: i32) -> (i32, i32, i32) {
    %c0_i32 = arith.constant 0 : i32
    %c0_i32_0 = arith.constant 0 : i32
    %c0_i32_1 = arith.constant 0 : i32
    %c0_i32_2 = arith.constant 0 : i32
    return %c0_i32, %c0_i32_0, %c0_i32_1 : i32, i32, i32
  }
  func.func @transform_18(%arg0: i32) -> (i32, i32, i32) {
    %c0_i32 = arith.constant 0 : i32
    %c0_i32_0 = arith.constant 0 : i32
    %c0_i32_1 = arith.constant 0 : i32
    %c0_i32_2 = arith.constant 0 : i32
    return %c0_i32, %c0_i32_0, %c0_i32_1 : i32, i32, i32
  }
  func.func @transform_19(%arg0: i32) -> (i32, i32) {
    %c0_i32 = arith.constant 0 : i32
    %c0_i32_0 = arith.constant 0 : i32
    %c0_i32_1 = arith.constant 0 : i32
    return %c0_i32, %c0_i32_0 : i32, i32
  }
  func.func @transform_20(%arg0: i32) -> (i32, i32) {
    %c0_i32 = arith.constant 0 : i32
    %c0_i32_0 = arith.constant 0 : i32
    %c0_i32_1 = arith.constant 0 : i32
    return %c0_i32, %c0_i32_0 : i32, i32
  }
  func.func @transform_21(%arg0: i32) -> (i32, i32) {
    %c0_i32 = arith.constant 0 : i32
    %c0_i32_0 = arith.constant 0 : i32
    %c0_i32_1 = arith.constant 0 : i32
    return %c0_i32, %c0_i32_0 : i32, i32
  }
  func.func @transform_22(%arg0: i32) -> (i32, i32) {
    %c0_i32 = arith.constant 0 : i32
    %c0_i32_0 = arith.constant 0 : i32
    %c0_i32_1 = arith.constant 0 : i32
    return %c0_i32, %c0_i32_0 : i32, i32
  }
  func.func @transform_23(%arg0: i32) -> (i32, i32, i32) {
    %c0_i32 = arith.constant 0 : i32
    %c0_i32_0 = arith.constant 0 : i32
    %c0_i32_1 = arith.constant 0 : i32
    return %arg0, %c0_i32, %c0_i32_0 : i32, i32, i32
  }
}

</mosaic_0001>

<bundles_post_ra>
// kernel: transformer_rta_forward.1
= control target key start
LH: loop header
LB: loop body
LE: loop exit
PB: predicated region body
PF: predicated region fallthrough
CT: control target
= control target key end

     0   :  { %s3828_s0 = inlined_call_operand.vmem [shape: s32[32,1], index: 0, kind: input, shape index: {}]   ;;  %s3829_s1 = inlined_call_operand.vmem [shape: f32[32,1], index: 1, kind: input, shape index: {}]   ;;  %s3830_s2 = inlined_call_operand.vmem [shape: f32[4,1,8], index: 2, kind: input, shape index: {}]   ;;  %s3831_s3 = inlined_call_operand.vmem [shape: f32[8,32], index: 3, kind: input, shape index: {}]   ;;  %s3832_s4 = inlined_call_operand.vmem [shape: bf16[16,32], index: 4, kind: input, shape index: {}]   ;;  %s3833_s5 = inlined_call_operand.vmem [shape: f32[1,32], index: 5, kind: input, shape index: {}]   ;;  %s3834_s6 = inlined_call_operand.vmem [shape: f32[1,32], index: 6, kind: input, shape index: {}]   ;;  %s3835_s7 = inlined_call_operand.vmem [shape: bf16[2,32,96], index: 7, kind: input, shape index: {}]   ;;  %s3836_s8 = inlined_call_operand.vmem [shape: f32[2,1,96], index: 8, kind: input, shape index: {}]   ;;  %s3837_s9 = inlined_call_operand.vmem [shape: bf16[2,32,32], index: 9, kind: input, shape index: {}]   ;;  %s3838_s10 = inlined_call_operand.vmem [shape: f32[2,1,32], index: 10, kind: input, shape index: {}]   ;;  %s3839_s11 = inlined_call_operand.vmem [shape: f32[2,1,32], index: 11, kind: input, shape index: {}]   ;;  %s3840_s12 = inlined_call_operand.vmem [shape: f32[2,1,32], index: 12, kind: input, shape index: {}]   ;;  %s3841_s13 = inlined_call_operand.vmem [shape: bf16[2,32,64], index: 13, kind: input, shape index: {}]   ;;  %s3842_s14 = inlined_call_operand.vmem [shape: f32[2,1,64], index: 14, kind: input, shape index: {}]   ;;  %s3843_s15 = inlined_call_operand.vmem [shape: bf16[2,64,32], index: 15, kind: input, shape index: {}]   ;;  %s3844_s16 = inlined_call_operand.vmem [shape: f32[2,1,32], index: 16, kind: input, shape index: {}]   ;;  %s3845_s17 = inlined_call_operand.vmem [shape: f32[2,1,32], index: 17, kind: input, shape index: {}]   ;;  %s3846_s18 = inlined_call_operand.vmem [shape: f32[2,1,32], index: 18, kind: input, shape index: {}]   ;;  %s3847_s19 = inlined_call_operand.vmem [shape: bf16[32,64], index: 19, kind: input, shape index: {}]   ;;  %s3848_s20 = inlined_call_operand.vmem [shape: f32[1,64], index: 20, kind: input, shape index: {}]   ;;  %s3849_s21 = inlined_call_operand.vmem [shape: bf16[64,48], index: 21, kind: input, shape index: {}]   ;;  %s3850_s22 = inlined_call_operand.vmem [shape: f32[1,48], index: 22, kind: input, shape index: {}]   ;;  %s3851_s23 = inlined_call_operand.vmem [shape: f32[4,3,16], index: 23, kind: output, shape index: {}]  }
   0x1   :  { %3877 = sst [smem:[#allocation2_spill]] %s3828_s0 }
   0x2   :  { %3878 = sst [smem:[#allocation3_spill]] %s3829_s1 }
   0x3   :  { %3879 = sst [smem:[#allocation4_spill]] %s3830_s2 }
   0x4   :  { %3880 = sst [smem:[#allocation5_spill]] %s3831_s3 }
   0x5   :  { %3881 = sst [smem:[#allocation6_spill]] %s3832_s4  ;;  %s3263_s4 = smov 0  }
   0x6   :  { %3882 = sst [smem:[#allocation7_spill]] %s3833_s5 }
   0x7   :  { %3883 = sst [smem:[#allocation8_spill]] %s3834_s6 }
   0x8   :  { %3884 = sst [smem:[#allocation9_spill]] %s3835_s7 }
   0x9 LB: > { %s2719_s30 = sadd.s32 4294967295, %s3123_s4   ;;  %p2723_p0 = scmp.ge.s32.totalorder %s3123_s4, 1  ;;  %s3123_s4 = sphi %s3263_s4, %s33_s4  }
   0xa   : > { %p659_p1 = scmp.lt.s32.totalorder %s3123_s4, 3 }
   0xc   : > { %p660_p2 = pnand %p2723_p0, %p659_p1 }
   0xd   : > { %s2724_s24 = sshll.u32 (!%p660_p2), %s2719_s30, 1  ;;  %s3885_s26 = sld [smem:[#allocation2_spill]] (!%p660_p2) }
   0xe   : > { %663 = sbr.rel (%p660_p2) target bundleno = 5059 (0x13c3), region = 112  ;;  %p733_p3 = scmp.lt.s32.totalorder (!%p660_p2), %s2724_s24, 3 }
   0xf   : > { %s3886_s7 = sld [smem:[#allocation6_spill]] (!%p660_p2)  ;;  %s3871_s6 = smov (!%p660_p2), 120  }
  0x10   : > { %s3887_s3 = sld [smem:[#allocation3_spill]] (!%p660_p2)  ;;  %s3861_s28 = smov (!%p660_p2), 72  }
  0x11   : > { %s3888_s5 = sld [smem:[#allocation9_spill]] (!%p660_p2) }
  0x12   : > { %s3889_s27 = sld [smem:[#allocation7_spill]] (!%p660_p2) }
  0x13   : > { %v3125_v0 = vmov 0   ;;  %s3907_s24 = smov (!%p733_p3, %s2724_s24), 3  ;;  %v758_v6 = vlaneseq  ;;  %v3126_v10 = vmov 0.0   ;;  %vm805_vm2 = vcmask 130048   ;;  %s3890_s29 = sld [smem:[#allocation8_spill]] }
  0x14   : > { %2969 = vset.pattern.permute.xlu0 %v3125_v0  ;;  %2970 = vset.pattern.permute.xlu1 %v3125_v0  ;;  %s2725_s25 = sshll.u32 %s3907_s24, 3  ;;  %s3891_s30 = sld [smem:[#allocation5_spill]]  ;;  %vm862_vm3 = vcmask 261120   ;;  %v3005_v32 = vld [vmem:[%s3836_s8] ss:$0 sm:$0xff]  ;;  %vm893_vm4 = vcmask 64512  }
  0x15   : > { %s736_s2 = scalar_lea.vmem %s3885_s26, %s2725_s25  ;;  %v2916_v3 = vld [vmem:[%s3886_s7] sm:$0xff]  ;;  %v759_v8 = vand.u32 127, %v758_v6  ;;  %s3127_s26 = smov 88   ;;  %vm966_vm5 = vcmask 1043456   ;;  %vm1368_vm6 = vcmask 195584   ;;  %vm1551_vm14 = vcmask 523264  }
  0x16   : > { %v756_v1 = vld [vmem:[%s736_s2] sm:$0xff]  ;;  %v757_v2 = vld [vmem:[%s736_s2 + $0x8] sm:$0xff]  ;;  %s742_s0 = scalar_lea.vmem %s3887_s3, %s2725_s25  ;;  %816 = vmatpush.bf16.msra.mxu0 %v2916_v3  ;;  %s3875_s2 = smov 96  }
  0x17   : > { %761 = vperm.xlu0 %2969, %v756_v1   ;;  %v775_v4 = vld [vmem:[%s742_s0] sm:$0xff]  ;;  %v776_v5 = vld [vmem:[%s742_s0 + $0x8] sm:$0xff]  ;;  %s3869_s7 = smov 112   ;;  %s3859_s3 = smov 64  }
  0x18   : > { %780 = vperm.xlu1 %2970, %v775_v4   ;;  %v2918_v14 = vld [vmem:[%s3888_s5 + $0x8] sm:$0xff]  ;;  %v2917_v15 = vld [vmem:[%s3888_s5] sm:$0xff]  ;;  %s3892_s25 = sld [smem:[#allocation4_spill]]  ;;  %s3857_s0 = smov 56  }
  0x19   : > { %872 = vmatpush.bf16.msra.mxu1 %v2918_v14  ;;  %v3003_v17 = vld [vmem:[%s3889_s27] ss:$0 sm:$0xff]  ;;  %s3873_s27 = smov 80  }
  0x1a   : > { %v3004_v19 = vld [vmem:[%s3890_s29] ss:$0 sm:$0xff]  ;;  %s3864_s29 = smov 104  }
  0x1b   : > { %v823_v26 = vld [vmem:[%s3891_s30] sm:$0xff]  ;;  %s3855_s30 = smov 48  }
  0x1d   : > { %873 = vmatpush.bf16.msra.mxu1 %v2917_v15 }
  0x1e   : > { %s3366_s1 = scalar_lea.vmem %s3892_s25, %s3907_s24  ;;  %s3853_s25 = smov 40  }
  0x1f   : > { %764 = vperm.xlu0 %2969, %v757_v2   ;;  %v3369_v3 = vld [vmem:[%s3366_s1] ss:$0 sm:$0xff] }
  0x20   : > { %785 = vperm.xlu1 %2970, %v776_v5  }
  0x89   : > { %v762_v7 = vpop.permute.xlu0 %761 }
  0x8a   : > { %vm766_vm0 = vcmp.eq.s32.totalorder %v759_v8, %v762_v7  ;;  %v781_v16 = vpop.permute.xlu1 %780  ;;  %v3374_v7 = vld [vmem:[%s3366_s1 + $0x1] ss:$0 sm:$0xff] }
  0x8b   : > { %v2731_v11 = vsel %vm766_vm0, 1.0, %v3126_v10  ;;  %v791_v18 = vmul.f32 %v3003_v17, %v781_v16 }
  0x8d   : > { %v797_v23 = vadd.f32 %v3004_v19, %v791_v18 }
  0x91   : > { %v765_v9 = vpop.permute.xlu0 %764 }
  0x92   : > { %vm767_vm1 = vcmp.eq.s32.totalorder %v759_v8, %v765_v9  ;;  %v786_v20 = vpop.permute.xlu1 %785 }
  0x93   : > { %v2732_v12 = vsel %vm767_vm1, 1.0, %v3126_v10  ;;  %v792_v22 = vmul.f32 %v3003_v17, %v786_v20 }
  0x94   : > { %v772_v13 = vpack.c.bf16 %v2732_v12, %v2731_v11 }
  0x95   : > { %v798_v25 = vadd.f32 %v3004_v19, %v792_v22 }
  0x96   : > { %2737 = vmatmul.msk.bf16.vlgmr.msra.gmra.mxu0 %vm805_vm2, %v772_v13 }
 0x113   : > { %v818_v21 = vpop.f32.mrf.mxu0 }
 0x114   : > { %v819_v24 = vadd.f32 %v818_v21, %v797_v23 }
 0x116   : > { %v3301_v29 = vadd.f32 %v823_v26, %v819_v24 }
 0x11b   : > { %v820_v27 = vpop.f32.mrf.mxu0 }
 0x11c   : > { %v821_v28 = vadd.f32 %v820_v27, %v798_v25 }
 0x11e   : > { %v3303_v30 = vadd.f32 %v823_v26, %v821_v28 }
 0x120   : > { %v841_v31 = vpack.c.bf16 %v3303_v30, %v3301_v29 }
 0x122   : > { %2748 = vmatmul.msk.bf16.vlgmr.msra.gmra.mxu1 %vm862_vm3, %v841_v31 }
 0x19f   : > { %v875_v33 = vpop.f32.mrf.mxu1 }
 0x1a0   : > { %v876_v34 = vadd.f32 %v3005_v32, %v875_v33 }
 0x1a2   : > { %v880_v35 = vpack.c.bf16 %v876_v34, %v876_v34 }
 0x1a4   : > { %v889_v36 = vunpack.c.l.b16 %v880_v35 }
 0x1a6   : > { %v3311_v37 = vpack.c.b16 %v889_v36, %v889_v36 }
 0x1a7   : > { %v877_v38 = vpop.f32.mrf.mxu1 }
 0x1a8   : > { %v878_v39 = vadd.f32 %v3005_v32, %v877_v38  ;;  %1006 = vrot.lane.b32.xlu0 %v3311_v37, %s3127_s26  ;;  %891 = vrot.lane.b32.xlu2 %v3311_v37, %s3875_s2 }
 0x1aa   : > { %v881_v40 = vpack.c.bf16 %v878_v39, %v878_v39 }
 0x1ac   : > { %v914_v41 = vunpack.c.l.b16 %v881_v40 }
 0x1ae   : > { %v3317_v42 = vpack.c.b16 %v914_v41, %v914_v41 }
 0x1b0   : > { %1029 = vrot.lane.b32.xlu1 %v3317_v42, %s3127_s26  ;;  %1027 = vrot.lane.b32.xlu0 %v3317_v42, %s3871_s6 }
 0x1b1   : > { %916 = vrot.lane.b32.xlu2 %v3317_v42, %s3875_s2 }
 0x1b8   : > { %1118 = vrot.lane.b32.xlu1 %v3311_v37, %s3873_s27  ;;  %1116 = vrot.lane.b32.xlu0 %v3311_v37, %s3869_s7 }
 0x1b9   : > { %1004 = vrot.lane.b32.xlu2 %v3311_v37, %s3871_s6  ;;  %s3902_s6 = smov 8  }
 0x1c0   : > { %1139 = vrot.lane.b32.xlu1 %v3317_v42, %s3869_s7  ;;  %1253 = vrot.lane.b32.xlu0 %v3317_v42, %s3861_s28  ;;  %s3894_s7 = smov 120  }
 0x1c1   : > { %1141 = vrot.lane.b32.xlu2 %v3317_v42, %s3873_s27  ;;  %s3893_s27 = smov 80  }
 0x1c8   : > { %1228 = vrot.lane.b32.xlu1 %v3311_v37, %s3864_s29  ;;  %961 = vrot.lane.b32.xlu0 %v3311_v37, %s3859_s3 }
 0x1c9   : > { %1230 = vrot.lane.b32.xlu2 %v3311_v37, %s3861_s28  ;;  %s3896_s28 = smov 104  }
 0x1d1   : > { %1251 = vrot.lane.b32.xlu2 %v3317_v42, %s3864_s29  ;;  %s3897_s29 = smov 72  }
 0x202   : > { %v892_v43 = vpop.permute.xlu2 %891 }
 0x203   : > { %v898_v44 = vsel %vm893_vm4, %v892_v43, 0 }
 0x204   : > { %907 = vmatpush.bf16.xpose.msra.mxu2 %v898_v44 }
 0x20b   : > { %v917_v45 = vpop.permute.xlu2 %916  ;;  %2749 = vmatmul.msk.bf16.vlgmr.msra.gmra.mxu2 %vm893_vm4, %v880_v35 }
 0x20c   : > { %v922_v46 = vsel %vm893_vm4, %v917_v45, 0 }
 0x20d   : > { %931 = vmatpush.bf16.xpose.msra.mxu3 %v922_v46 }
 0x213   : > { %v1005_v47 = vpop.permute.xlu2 %1004 }
 0x214   : > { %2750 = vmatmul.msk.bf16.vlgmr.msra.gmra.mxu3 %vm893_vm4, %v881_v40 }
 0x21a   : > { %v1007_v48 = vpop.permute.xlu0 %1006 }
 0x21b   : > { %v1012_v49 = vsel %vm893_vm4, %v1007_v48, 0  ;;  %v1142_v50 = vpop.permute.xlu2 %1141 }
 0x21c   : > { %1021 = vmatpush.bf16.xpose.msrb.mxu2 %v1012_v49  ;;  %v1147_v54 = vsel %vm893_vm4, %v1142_v50, 0 }
 0x222   : > { %v1030_v51 = vpop.permute.xlu1 %1029  ;;  %v1028_v52 = vpop.permute.xlu0 %1027 }
 0x223   : > { %2753 = vmatmul.msk.bf16.vlgmr.msrb.gmra.mxu2 %vm893_vm4, %v1005_v47  ;;  %v1035_v53 = vsel %vm893_vm4, %v1030_v51, 0  ;;  %v1231_v55 = vpop.permute.xlu2 %1230 }
 0x224   : > { %1044 = vmatpush.bf16.xpose.msrb.mxu3 %v1035_v53  ;;  %v1236_v59 = vsel %vm893_vm4, %v1231_v55, 0 }
 0x22a   : > { %v1119_v56 = vpop.permute.xlu1 %1118  ;;  %v1117_v57 = vpop.permute.xlu0 %1116 }
 0x22b   : > { %v1124_v58 = vsel %vm893_vm4, %v1119_v56, 0  ;;  %2754 = vmatmul.msk.bf16.vlgmr.msrb.gmra.mxu3 %vm893_vm4, %v1028_v52  ;;  %v1252_v2 = vpop.permute.xlu2 %1251 }
 0x22c   : > { %1156 = vmatpush.bf16.xpose.msra.mxu3 %v1147_v54  ;;  %1133 = vmatpush.bf16.xpose.msra.mxu2 %v1124_v58 }
 0x232   : > { %v1254_v60 = vpop.permute.xlu0 %1253  ;;  %v1140_v62 = vpop.permute.xlu1 %1139 }
 0x233   : > { %v1259_v61 = vsel %vm893_vm4, %v1254_v60, 0  ;;  %2757 = vmatmul.msk.bf16.vlgmr.msra.gmra.mxu2 %vm893_vm4, %v1117_v57 }
 0x234   : > { %1245 = vmatpush.bf16.xpose.msrb.mxu2 %v1236_v59  ;;  %1268 = vmatpush.bf16.xpose.msrb.mxu3 %v1259_v61 }
 0x23a   : > { %v962_v63 = vpop.permute.xlu0 %961  ;;  %v1229_v1 = vpop.permute.xlu1 %1228 }
 0x23b   : > { %2758 = vmatmul.msk.bf16.vlgmr.msra.gmra.mxu3 %vm893_vm4, %v1140_v62  ;;  %v968_v0 = vsel %vm966_vm5, %v962_v63, 0 }
 0x23c   : > { %977 = vmatpush.bf16.msrb.mxu0 %v968_v0 }
 0x243   : > { %2761 = vmatmul.msk.bf16.vlgmr.msrb.gmra.mxu2 %vm893_vm4, %v1229_v1 }
 0x24b   : > { %2762 = vmatmul.msk.bf16.vlgmr.msrb.gmra.mxu3 %vm893_vm4, %v1252_v2 }
 0x28e   : > { %v909_v4 = vpop.f32.mrf.mxu2 }
 0x28f   : > { %v910_v5 = vadd.f32 %v3369_v3, %v909_v4 }
 0x291   : > { %v937_v6 = vsel %vm893_vm4, %v910_v5, -inf }
 0x292   : > { %938 = vmax.xlane.f32.xlu0 %v937_v6 }
 0x296   : > { %v911_v8 = vpop.f32.mrf.mxu2 }
 0x297   : > { %v933_v9 = vpop.f32.mrf.mxu3 }
 0x298   : > { %v934_v11 = vadd.f32 %v3374_v7, %v933_v9 }
 0x29a   : > { %v940_v12 = vsel %vm893_vm4, %v934_v11, -inf }
 0x29b   : > { %941 = vmax.xlane.f32.xlu1 %v940_v12 }
 0x29f   : > { %v935_v13 = vpop.f32.mrf.mxu3 }
 0x2a6   : > { %v1023_v14 = vpop.f32.mrf.mxu2 }
 0x2a7   : > { %v1024_v15 = vadd.f32 %v3369_v3, %v1023_v14 }
 0x2a9   : > { %v1050_v16 = vsel %vm893_vm4, %v1024_v15, -inf }
 0x2aa   : > { %1051 = vmax.xlane.f32.xlu2 %v1050_v16 }
 0x2ae   : > { %v1025_v17 = vpop.f32.mrf.mxu2  ;;  %v1046_v18 = vpop.f32.mrf.mxu3 }
 0x2af   : > { %v1047_v19 = vadd.f32 %v3374_v7, %v1046_v18 }
 0x2b1   : > { %v1053_v20 = vsel %vm893_vm4, %v1047_v19, -inf }
 0x2b2   : > { %1054 = vmax.xlane.f32.xlu2 %v1053_v20 }
 0x2b6   : > { %v1048_v21 = vpop.f32.mrf.mxu3  ;;  %v1135_v22 = vpop.f32.mrf.mxu2 }
 0x2b7   : > { %v1136_v23 = vadd.f32 %v3369_v3, %v1135_v22 }
 0x2b9   : > { %v1162_v24 = vsel %vm893_vm4, %v1136_v23, -inf }
 0x2ba   : > { %1163 = vmax.xlane.f32.xlu0 %v1162_v24 }
 0x2be   : > { %v1137_v25 = vpop.f32.mrf.mxu2  ;;  %v1158_v26 = vpop.f32.mrf.mxu3 }
 0x2bf   : > { %v1159_v27 = vadd.f32 %v3374_v7, %v1158_v26 }
 0x2c1   : > { %v1165_v28 = vsel %vm893_vm4, %v1159_v27, -inf }
 0x2c2   : > { %1166 = vmax.xlane.f32.xlu1 %v1165_v28 }
 0x2c6   : > { %v1160_v31 = vpop.f32.mrf.mxu3  ;;  %v1247_v32 = vpop.f32.mrf.mxu2 }
 0x2c7   : > { %v3387_v33 = vadd.f32 %v3369_v3, %v1247_v32 }
 0x2c9   : > { %v1274_v34 = vsel %vm893_vm4, %v3387_v33, -inf }
 0x2ca   : > { %1275 = vmax.xlane.f32.xlu2 %v1274_v34 }
 0x2ce   : > { %v1249_v35 = vpop.f32.mrf.mxu2  ;;  %v1270_v36 = vpop.f32.mrf.mxu3 }
 0x2cf   : > { %v1271_v38 = vadd.f32 %v3374_v7, %v1270_v36 }
 0x2d1   : > { %v1277_v39 = vsel %vm893_vm4, %v1271_v38, -inf }
 0x2d2   : > { %1278 = vmax.xlane.f32.xlu0 %v1277_v39 }
 0x2d6   : > { %v1272_v40 = vpop.f32.mrf.mxu3 }
 0x2db   : > { %983 = vrot.lane.b32.xlu1 %v3317_v42, %s3859_s3  ;;  %s3901_s3 = smov 40  }
 0x2e2   : > { %1095 = vrot.lane.b32.xlu2 %v3317_v42, %s3857_s0 }
 0x2e6   : > { %1074 = vrot.lane.b32.xlu0 %v3311_v37, %s3857_s0  ;;  %s3866_s0 = smov 24  }
 0x2ea   : > { %1186 = vrot.lane.b32.xlu2 %v3311_v37, %s3855_s30 }
 0x305   : > { %v939_v41 = vpop.xlane.xlu0 %938 }
 0x306   : > { %v943_v43 = vsub.f32 %v910_v5, %v939_v41 }
 0x308   : > { %v945_v44 = vmul.f32 1.442695, %v943_v43 }
 0x30a   : > { %3023 = vpow2.f32 %v945_v44 }
 0x30e   : > { %v942_v45 = vpop.xlane.xlu1 %941 }
 0x30f   : > { %v944_v46 = vsub.f32 %v934_v11, %v942_v45 }
 0x310   : > { %v3401_v47 = vpop.eup %3023 }
 0x311   : > { %v947_v48 = vmul.f32 1.442695, %v944_v46  ;;  %v949_v49 = vsel %vm893_vm4, %v3401_v47, 0.0 }
 0x312   : > { %950 = vadd.xlane.f32.xlu1 %v949_v49 }
 0x313   : > { %3025 = vpow2.f32 %v947_v48 }
 0x319   : > { %v3405_v50 = vpop.eup %3025 }
 0x31a   : > { %v952_v51 = vsel %vm893_vm4, %v3405_v50, 0.0 }
 0x31b   : > { %953 = vadd.xlane.f32.xlu2 %v952_v51 }
 0x31d   : > { %v1052_v52 = vpop.xlane.xlu2 %1051 }
 0x31e   : > { %v1056_v53 = vsub.f32 %v1024_v15, %v1052_v52 }
 0x320   : > { %v1058_v54 = vmul.f32 1.442695, %v1056_v53 }
 0x322   : > { %3027 = vpow2.f32 %v1058_v54 }
 0x325   : > { %v1055_v55 = vpop.xlane.xlu2 %1054 }
 0x326   : > { %v1057_v56 = vsub.f32 %v1047_v19, %v1055_v55 }
 0x328   : > { %v3409_v57 = vpop.eup %3027  ;;  %v1060_v58 = vmul.f32 1.442695, %v1057_v56 }
 0x329   : > { %v1062_v59 = vsel %vm893_vm4, %v3409_v57, 0.0 }
 0x32a   : > { %3029 = vpow2.f32 %v1060_v58  ;;  %1063 = vadd.xlane.f32.xlu2 %v1062_v59 }
 0x32d   : > { %v1164_v60 = vpop.xlane.xlu0 %1163 }
 0x32e   : > { %v1168_v61 = vsub.f32 %v1136_v23, %v1164_v60 }
 0x330   : > { %v3413_v62 = vpop.eup %3029  ;;  %v1170_v63 = vmul.f32 1.442695, %v1168_v61 }
 0x331   : > { %v1065_v0 = vsel %vm893_vm4, %v3413_v62, 0.0 }
 0x332   : > { %3031 = vpow2.f32 %v1170_v63  ;;  %1066 = vadd.xlane.f32.xlu2 %v1065_v0 }
 0x335   : > { %v1167_v1 = vpop.xlane.xlu1 %1166 }
 0x336   : > { %v1169_v2 = vsub.f32 %v1159_v27, %v1167_v1 }
 0x338   : > { %v3417_v4 = vpop.eup %3031  ;;  %v1172_v5 = vmul.f32 1.442695, %v1169_v2 }
 0x339   : > { %v1174_v6 = vsel %vm893_vm4, %v3417_v4, 0.0 }
 0x33a   : > { %3033 = vpow2.f32 %v1172_v5  ;;  %1175 = vadd.xlane.f32.xlu1 %v1174_v6 }
 0x33d   : > { %v1276_v11 = vpop.xlane.xlu2 %1275 }
 0x33e   : > { %v1280_v23 = vsub.f32 %v3387_v33, %v1276_v11 }
 0x340   : > { %v3421_v8 = vpop.eup %3033  ;;  %v1282_v24 = vmul.f32 1.442695, %v1280_v23 }
 0x341   : > { %v1177_v9 = vsel %vm893_vm4, %v3421_v8, 0.0 }
 0x342   : > { %1178 = vadd.xlane.f32.xlu0 %v1177_v9 }
 0x345   : > { %v1279_v12 = vpop.xlane.xlu0 %1278  ;;  %v1096_v15 = vpop.permute.xlu2 %1095 }
 0x346   : > { %v1281_v13 = vsub.f32 %v1271_v38, %v1279_v12  ;;  %v1101_v18 = vsel %vm966_vm5, %v1096_v15, 0 }
 0x348   : > { %v1284_v14 = vmul.f32 1.442695, %v1281_v13 }
 0x34a   : > { %3035 = vpow2.f32 %v1284_v14  ;;  %1207 = vrot.lane.b32.xlu2 %v3317_v42, %s3855_s30  ;;  %s3867_s30 = smov 16  }
 0x34b   : > { %3037 = vpow2.f32 %v1282_v24 }
 0x34d   : > { %v984_v16 = vpop.permute.xlu1 %983  ;;  %v1187_v28 = vpop.permute.xlu2 %1186 }
 0x34e   : > { %v989_v17 = vsel %vm966_vm5, %v984_v16, 0  ;;  %v1192_v33 = vsel %vm966_vm5, %v1187_v28, 0  ;;  %v2919_v28 = vld [vmem:[%s3837_s9] sm:$0xff] }
 0x34f   : > { %998 = vmatpush.bf16.msrb.mxu1 %v989_v17 }
 0x350   : > { %v3429_v19 = vpop.eup %3035 }
 0x351   : > { %v1289_v20 = vsel %vm893_vm4, %v3429_v19, 0.0  ;;  %v3038_v25 = vpop.eup %3037 }
 0x352   : > { %1290 = vadd.xlane.f32.xlu1 %v1289_v20  ;;  %v1286_v26 = vsel %vm893_vm4, %v3038_v25, 0.0 }
 0x353   : > { %1110 = vmatpush.bf16.msra.mxu1 %v1101_v18 }
 0x356   : > { %1298 = vrot.lane.b32.xlu0 %v3311_v37, %s3853_s25 }
 0x358   : > { %v1075_v21 = vpop.permute.xlu0 %1074 }
 0x359   : > { %v1080_v22 = vsel %vm966_vm5, %v1075_v21, 0 }
 0x35a   : > { %1089 = vmatpush.bf16.msra.mxu0 %v1080_v22 }
 0x36b   : > { %1319 = vrot.lane.b32.xlu1 %v3317_v42, %s3853_s25  ;;  %s3863_s25 = smov 8  }
 0x373   : > { %1287 = vadd.xlane.f32.xlu2 %v1286_v26 }
 0x385   : > { %v951_v27 = vpop.xlane.xlu1 %950 }
 0x386   : > { %3039 = vrcp.f32 %v951_v27  ;;  %v2920_v27 = vld [vmem:[%s3837_s9 + $0x8] sm:$0xff] }
 0x387   : > { %1401 = vmatpush.bf16.msra.mxu2 %v2920_v27 }
 0x38b   : > { %1402 = vmatpush.bf16.msra.mxu2 %v2919_v28 }
 0x38c   : > { %v3040_v31 = vpop.eup %3039 }
 0x38d   : > { %v957_v37 = vmul.f32 %v3040_v31, %v3401_v47 }
 0x38e   : > { %v954_v32 = vpop.xlane.xlu2 %953 }
 0x38f   : > { %3041 = vrcp.f32 %v954_v32  ;;  %v959_v34 = vpack.c.bf16 %v957_v37, %v957_v37 }
 0x391   : > { %2751 = vmatmul.msk.bf16.vlgmr.msrb.gmra.mxu0 %vm893_vm4, %v959_v34 }
 0x392   : > { %1201 = vmatpush.bf16.msrb.mxu0 %v1192_v33 }
 0x395   : > { %v3042_v35 = vpop.eup %3041 }
 0x396   : > { %v958_v42 = vmul.f32 %v3042_v35, %v3405_v50 }
 0x398   : > { %v960_v36 = vpack.c.bf16 %v958_v42, %v958_v42 }
 0x39a   : > { %2752 = vmatmul.msk.bf16.vlgmr.msrb.gmra.mxu1 %vm893_vm4, %v960_v36 }
 0x39d   : > { %v1064_v38 = vpop.xlane.xlu2 %1063 }
 0x39e   : > { %3043 = vrcp.f32 %v1064_v38 }
 0x3a4   : > { %v3044_v39 = vpop.eup %3043 }
 0x3a5   : > { %v1070_v40 = vmul.f32 %v3044_v39, %v3409_v57  ;;  %v1067_v41 = vpop.xlane.xlu2 %1066 }
 0x3a6   : > { %3045 = vrcp.f32 %v1067_v41 }
 0x3a7   : > { %v1072_v43 = vpack.c.bf16 %v1070_v40, %v1070_v40 }
 0x3a9   : > { %2755 = vmatmul.msk.bf16.vlgmr.msra.gmra.mxu0 %vm893_vm4, %v1072_v43 }
 0x3ac   : > { %v3046_v44 = vpop.eup %3045 }
 0x3ad   : > { %v1071_v45 = vmul.f32 %v3046_v44, %v3413_v62  ;;  %v1176_v46 = vpop.xlane.xlu1 %1175  ;;  %v1208_v47 = vpop.permute.xlu2 %1207 }
 0x3ae   : > { %3047 = vrcp.f32 %v1176_v46  ;;  %v1213_v48 = vsel %vm966_vm5, %v1208_v47, 0  ;;  %v3006_v47 = vld [vmem:[%s3838_s10] ss:$0 sm:$0xff] }
 0x3af   : > { %v1073_v49 = vpack.c.bf16 %v1071_v45, %v1071_v45  ;;  %1222 = vmatpush.bf16.msrb.mxu1 %v1213_v48 }
 0x3b1   : > { %2756 = vmatmul.msk.bf16.vlgmr.msra.gmra.mxu1 %vm893_vm4, %v1073_v49 }
 0x3b4   : > { %v3048_v50 = vpop.eup %3047 }
 0x3b5   : > { %v1182_v51 = vmul.f32 %v3048_v50, %v3417_v4  ;;  %v1179_v52 = vpop.xlane.xlu0 %1178 }
 0x3b6   : > { %3049 = vrcp.f32 %v1179_v52 }
 0x3b7   : > { %v1184_v53 = vpack.c.bf16 %v1182_v51, %v1182_v51 }
 0x3b9   : > { %2759 = vmatmul.msk.bf16.vlgmr.msrb.gmra.mxu0 %vm893_vm4, %v1184_v53 }
 0x3bc   : > { %v3050_v54 = vpop.eup %3049 }
 0x3bd   : > { %v1183_v55 = vmul.f32 %v3050_v54, %v3421_v8 }
 0x3bf   : > { %v1185_v56 = vpack.c.bf16 %v1183_v55, %v1183_v55 }
 0x3c1   : > { %2760 = vmatmul.msk.bf16.vlgmr.msrb.gmra.mxu1 %vm893_vm4, %v1185_v56  ;;  %v3141_v56 = vmov 32.0  }
 0x3c5   : > { %v1291_v59 = vpop.xlane.xlu1 %1290 }
 0x3c6   : > { %3051 = vrcp.f32 %v1291_v59 }
 0x3c8   : > { %v1299_v57 = vpop.permute.xlu0 %1298 }
 0x3c9   : > { %v1304_v58 = vsel %vm966_vm5, %v1299_v57, 0 }
 0x3ca   : > { %1313 = vmatpush.bf16.msra.mxu0 %v1304_v58 }
 0x3cc   : > { %v3052_v60 = vpop.eup %3051 }
 0x3cd   : > { %v1295_v61 = vmul.f32 %v3052_v60, %v3429_v19 }
 0x3cf   : > { %v1297_v0 = vpack.c.bf16 %v1295_v61, %v1295_v61 }
 0x3dd   : > { %v1320_v62 = vpop.permute.xlu1 %1319 }
 0x3de   : > { %v1325_v63 = vsel %vm966_vm5, %v1320_v62, 0 }
 0x3df   : > { %1334 = vmatpush.bf16.msra.mxu1 %v1325_v63 }
 0x3e2   : > { %2764 = vmatmul.msk.bf16.vlgmr.msra.gmra.mxu1 %vm893_vm4, %v1297_v0 }
 0x3e6   : > { %v1288_v1 = vpop.xlane.xlu2 %1287 }
 0x3e7   : > { %3053 = vrcp.f32 %v1288_v1 }
 0x3e8   : > { %3055 = vrcp.f32 %v3141_v56 }
 0x3ed   : > { %v3054_v2 = vpop.eup %3053 }
 0x3ee   : > { %v1294_v4 = vmul.f32 %v3054_v2, %v3038_v25  ;;  %v3056_v57 = vpop.eup %3055 }
 0x3ef   : > { %v1420_v58 = vmul.f32 32.0, %v3056_v57  ;;  %vm1424_vm7 = vweird.f32 %v3056_v57 }
 0x3f0   : > { %v1296_v5 = vpack.c.bf16 %v1294_v4, %v1294_v4 }
 0x3f1   : > { %v1421_v59 = vsub.f32 1.0, %v1420_v58 }
 0x3f2   : > { %2763 = vmatmul.msk.bf16.vlgmr.msra.gmra.mxu0 %vm893_vm4, %v1296_v5 }
 0x3f3   : > { %v1422_v60 = vmul.f32 %v3056_v57, %v1421_v59 }
 0x3f5   : > { %v1423_v61 = vadd.f32 %v3056_v57, %v1422_v60 }
 0x3f7   : > { %v3482_v62 = vsel %vm1424_vm7, %v3056_v57, %v1423_v61 }
 0x40e   : > { %v979_v6 = vpop.f32.mrf.mxu0 }
 0x416   : > { %v981_v8 = vpop.f32.mrf.mxu0 }
 0x417   : > { %v1000_v9 = vpop.f32.mrf.mxu1 }
 0x41f   : > { %v1002_v11 = vpop.f32.mrf.mxu1 }
 0x426   : > { %v1091_v12 = vpop.f32.mrf.mxu0 }
 0x42e   : > { %v1093_v13 = vpop.f32.mrf.mxu0  ;;  %v1112_v14 = vpop.f32.mrf.mxu1 }
 0x42f   : > { %v2971_v15 = vpack.i.bf16 %v1112_v14, %v1091_v12  ;;  %v2921_v14 = vld [vmem:[%s3841_s13] sm:$0xff] }
 0x431   : > { %2972 = vrot.lane.b32.xlu0 %v2971_v15, %s3863_s25  ;;  %s3895_s25 = smov 112  }
 0x436   : > { %v1114_v16 = vpop.f32.mrf.mxu1  ;;  %v1203_v17 = vpop.f32.mrf.mxu0 }
 0x43e   : > { %v1205_v18 = vpop.f32.mrf.mxu0  ;;  %v1224_v19 = vpop.f32.mrf.mxu1 }
 0x43f   : > { %v2976_v20 = vpack.i.bf16 %v1224_v19, %v1203_v17 }
 0x441   : > { %2977 = vrot.lane.b32.xlu0 %v2976_v20, %s3867_s30  ;;  %s3900_s30 = smov 48  }
 0x446   : > { %v1226_v21 = vpop.f32.mrf.mxu1 }
 0x45f   : > { %v1336_v22 = vpop.f32.mrf.mxu1 }
 0x467   : > { %v1338_v23 = vpop.f32.mrf.mxu1 }
 0x46f   : > { %v1315_v24 = vpop.f32.mrf.mxu0 }
 0x470   : > { %v2981_v25 = vpack.i.bf16 %v1336_v22, %v1315_v24 }
 0x472   : > { %2982 = vrot.lane.b32.xlu1 %v2981_v25, %s3866_s0  ;;  %s3899_s0 = smov 56  }
 0x477   : > { %v1317_v26 = vpop.f32.mrf.mxu0 }
 0x4a3   : > { %v2973_v31 = vpop.permute.xlu0 %2972 }
 0x4a4   : > { %v2975_v32 = vunpack.i.h.bf16 %v2973_v31  ;;  %v2974_v34 = vunpack.i.l.bf16 %v2973_v31 }
 0x4a6   : > { %v1365_v36 = vsel %vm893_vm4, %v1000_v9, %v2975_v32  ;;  %v1364_v38 = vsel %vm893_vm4, %v979_v6, %v2974_v34  ;;  %v2922_v9 = vld [vmem:[%s3841_s13 + $0x8] sm:$0xff] }
 0x4a7   : > { %1504 = vmatpush.bf16.msra.mxu3 %v2922_v9 }
 0x4ab   : > { %1505 = vmatpush.bf16.msra.mxu3 %v2921_v14 }
 0x4b3   : > { %v2978_v37 = vpop.permute.xlu0 %2977 }
 0x4b4   : > { %v2980_v33 = vunpack.i.h.bf16 %v2978_v37  ;;  %v2979_v35 = vunpack.i.l.bf16 %v2978_v37  ;;  %v3007_v37 = vld [vmem:[%s3839_s11] ss:$0 sm:$0xff] }
 0x4b6   : > { %v1367_v41 = vsel %vm805_vm2, %v1365_v36, %v2980_v33  ;;  %v1366_v43 = vsel %vm805_vm2, %v1364_v38, %v2979_v35  ;;  %v3008_v35 = vld [vmem:[%s3840_s12] ss:$0 sm:$0xff] }
 0x4e4   : > { %v2983_v42 = vpop.permute.xlu1 %2982 }
 0x4e5   : > { %v2985_v39 = vunpack.i.h.bf16 %v2983_v42  ;;  %v2984_v40 = vunpack.i.l.bf16 %v2983_v42 }
 0x4e7   : > { %v1370_v44 = vsel %vm1368_vm6, %v1367_v41, %v2985_v39  ;;  %v1369_v45 = vsel %vm1368_vm6, %v1366_v43, %v2984_v40  ;;  %v2926_v43 = vld [vmem:[%s3843_s15 + $0x18] sm:$0xff] }
 0x4e8   : > { %v1371_v46 = vpack.c.bf16 %v1370_v44, %v1369_v45  ;;  %1559 = vmatpush.bf16.msrb.mxu0 %v2926_v43  ;;  %v2925_v44 = vld [vmem:[%s3843_s15 + $0x10] sm:$0xff]  ;;  %v2924_v45 = vld [vmem:[%s3843_s15 + $0x8] sm:$0xff] }
 0x4ea   : > { %2773 = vmatmul.msk.bf16.vlgmr.msra.gmra.mxu2 %vm862_vm3, %v1371_v46  ;;  %v2923_v46 = vld [vmem:[%s3843_s15] sm:$0xff] }
 0x4ec   : > { %1560 = vmatpush.bf16.msrb.mxu0 %v2925_v44 }
 0x4f0   : > { %1561 = vmatpush.bf16.msrb.mxu0 %v2924_v45  ;;  %v3013_v45 = vld [vmem:[%s3836_s8 + $0x1] ss:$0 sm:$0xff] }
 0x4f4   : > { %1562 = vmatpush.bf16.msrb.mxu0 %v2923_v46 }
 0x56d   : > { %v1404_v48 = vpop.f32.mrf.mxu2 }
 0x56e   : > { %v1405_v49 = vadd.f32 %v3006_v47, %v1404_v48  ;;  %v3009_v48 = vld [vmem:[%s3842_s14] ss:$0 sm:$0xff] }
 0x570   : > { %v1409_v50 = vadd.f32 %v1405_v49, %v3301_v29 }
 0x572   : > { %v1413_v51 = vsel %vm862_vm3, %v1409_v50, 0.0 }
 0x573   : > { %1414 = vadd.xlane.f32.xlu2 %v1413_v51 }
 0x575   : > { %v1406_v52 = vpop.f32.mrf.mxu2 }
 0x576   : > { %v1407_v53 = vadd.f32 %v3006_v47, %v1406_v52 }
 0x578   : > { %v1410_v54 = vadd.f32 %v1407_v53, %v3303_v30 }
 0x57a   : > { %v1416_v55 = vsel %vm862_vm3, %v1410_v54, 0.0 }
 0x57b   : > { %1417 = vadd.xlane.f32.xlu0 %v1416_v55  ;;  %v3010_v55 = vld [vmem:[%s3844_s16] ss:$0 sm:$0xff] }
 0x5e6   : > { %v1415_v29 = vpop.xlane.xlu2 %1414 }
 0x5e7   : > { %v1426_v63 = vmul.f32 %v3482_v62, %v1415_v29 }
 0x5e9   : > { %v1428_v0 = vsub.f32 %v1409_v50, %v1426_v63 }
 0x5eb   : > { %v1430_v1 = vmul.f32 %v1428_v0, %v1428_v0 }
 0x5ed   : > { %v1432_v30 = vsel %vm862_vm3, %v1430_v1, 0.0 }
 0x5ee   : > { %v1418_v2 = vpop.xlane.xlu0 %1417  ;;  %1433 = vadd.xlane.f32.xlu1 %v1432_v30 }
 0x5ef   : > { %v1427_v4 = vmul.f32 %v3482_v62, %v1418_v2 }
 0x5f1   : > { %v1429_v5 = vsub.f32 %v1410_v54, %v1427_v4 }
 0x5f3   : > { %v1431_v6 = vmul.f32 %v1429_v5, %v1429_v5 }
 0x5f5   : > { %v1435_v8 = vsel %vm862_vm3, %v1431_v6, 0.0 }
 0x5f6   : > { %1436 = vadd.xlane.f32.xlu2 %v1435_v8 }
 0x661   : > { %v1434_v11 = vpop.xlane.xlu1 %1433 }
 0x662   : > { %v1438_v12 = vmul.f32 %v1434_v11, %v3482_v62 }
 0x664   : > { %v1440_v13 = vadd.f32 1e-05, %v1438_v12  ;;  %v2928_v12 = vld [vmem:[%s3888_s5 + $0x18] sm:$0xff] }
 0x665   : > { %1659 = vmatpush.bf16.msrb.mxu1 %v2928_v12 }
 0x666   : > { %3057 = vrsqrt.f32 %v1440_v13  ;;  %vm1448_vm9 = vweird.f32 %v1440_v13 }
 0x669   : > { %v1437_v15 = vpop.xlane.xlu2 %1436 }
 0x66a   : > { %v1439_v16 = vmul.f32 %v1437_v15, %v3482_v62 }
 0x66c   : > { %v3058_v17 = vpop.eup %3057  ;;  %v1441_v18 = vadd.f32 1e-05, %v1439_v16  ;;  %v2927_v16 = vld [vmem:[%s3888_s5 + $0x10] sm:$0xff] }
 0x66d   : > { %v1443_v19 = vmul.f32 %v3058_v17, %v1440_v13  ;;  %vm1449_vm8 = vweird.f32 %v3058_v17  ;;  %1660 = vmatpush.bf16.msrb.mxu1 %v2927_v16 }
 0x66e   : > { %3059 = vrsqrt.f32 %v1441_v18  ;;  %vm1450_vm10 = vmor %vm1448_vm9, %vm1449_vm8  ;;  %vm1458_vm12 = vweird.f32 %v1441_v18 }
 0x66f   : > { %v1444_v20 = vmul.f32 %v3058_v17, %v1443_v19 }
 0x671   : > { %v1445_v21 = vmul.f32 0.5, %v1444_v20 }
 0x673   : > { %v1446_v22 = vsub.f32 1.5, %v1445_v21 }
 0x674   : > { %v3060_v23 = vpop.eup %3059 }
 0x675   : > { %v1447_v24 = vmul.f32 %v3058_v17, %v1446_v22  ;;  %v1453_v25 = vmul.f32 %v3060_v23, %v1441_v18  ;;  %vm1459_vm11 = vweird.f32 %v3060_v23 }
 0x676   : > { %vm1460_vm13 = vmor %vm1458_vm12, %vm1459_vm11  ;;  %vm834_vm12 = vcmask 57344  }
 0x677   : > { %v1454_v26 = vmul.f32 %v3060_v23, %v1453_v25  ;;  %v1451_v27 = vsel %vm1450_vm10, %v3058_v17, %v1447_v24 }
 0x678   : > { %v1462_v32 = vmul.f32 %v1451_v27, %v1428_v0 }
 0x679   : > { %v1455_v28 = vmul.f32 0.5, %v1454_v26 }
 0x67a   : > { %v1467_v42 = vmul.f32 %v3007_v37, %v1462_v32 }
 0x67b   : > { %v1456_v31 = vsub.f32 1.5, %v1455_v28 }
 0x67c   : > { %v1472_v39 = vadd.f32 %v3008_v35, %v1467_v42 }
 0x67d   : > { %v1457_v34 = vmul.f32 %v3060_v23, %v1456_v31 }
 0x67f   : > { %v1461_v33 = vsel %vm1460_vm13, %v3060_v23, %v1457_v34  ;;  %v3011_v34 = vld [vmem:[%s3845_s17] ss:$0 sm:$0xff] }
 0x680   : > { %v1463_v36 = vmul.f32 %v1461_v33, %v1429_v5 }
 0x682   : > { %v1468_v38 = vmul.f32 %v3007_v37, %v1463_v36  ;;  %v3012_v36 = vld [vmem:[%s3846_s18] ss:$0 sm:$0xff] }
 0x684   : > { %v1473_v40 = vadd.f32 %v3008_v35, %v1468_v38 }
 0x686   : > { %v1474_v41 = vpack.c.bf16 %v1473_v40, %v1472_v39 }
 0x688   : > { %2782 = vmatmul.msk.bf16.vlgmr.msra.gmra.mxu3 %vm862_vm3, %v1474_v41 }
 0x70b   : > { %v1507_v47 = vpop.f32.mrf.mxu3 }
 0x70c   : > { %v1508_v49 = vadd.f32 %v3009_v48, %v1507_v47 }
 0x70e   : > { %v1512_v52 = vmax.f32 %v1508_v49, 0.0 }
 0x713   : > { %v1509_v50 = vpop.f32.mrf.mxu3 }
 0x714   : > { %v1510_v51 = vadd.f32 %v3009_v48, %v1509_v50 }
 0x716   : > { %v1513_v53 = vmax.f32 %v1510_v51, 0.0 }
 0x718   : > { %v1514_v54 = vpack.c.bf16 %v1513_v53, %v1512_v52 }
 0x71a   : > { %2799 = vmatmul.msk.bf16.vlgmr.msrb.gmra.mxu0 %vm1551_vm14, %v1514_v54 }
 0x797   : > { %v1564_v56 = vpop.f32.mrf.mxu0 }
 0x798   : > { %v1565_v57 = vadd.f32 %v3010_v55, %v1564_v56 }
 0x79a   : > { %v1569_v58 = vadd.f32 %v1565_v57, %v1472_v39 }
 0x79c   : > { %v1573_v59 = vsel %vm862_vm3, %v1569_v58, 0.0 }
 0x79d   : > { %1574 = vadd.xlane.f32.xlu2 %v1573_v59 }
 0x79f   : > { %v1566_v60 = vpop.f32.mrf.mxu0 }
 0x7a0   : > { %v1567_v61 = vadd.f32 %v3010_v55, %v1566_v60 }
 0x7a2   : > { %v1570_v29 = vadd.f32 %v1567_v61, %v1473_v40 }
 0x7a4   : > { %v1576_v63 = vsel %vm862_vm3, %v1570_v29, 0.0 }
 0x7a5   : > { %1577 = vadd.xlane.f32.xlu2 %v1576_v63 }
 0x810   : > { %v1575_v0 = vpop.xlane.xlu2 %1574 }
 0x811   : > { %v1579_v1 = vmul.f32 %v1575_v0, %v3482_v62 }
 0x813   : > { %v1581_v30 = vsub.f32 %v1569_v58, %v1579_v1 }
 0x815   : > { %v1583_v2 = vmul.f32 %v1581_v30, %v1581_v30 }
 0x817   : > { %v1585_v4 = vsel %vm862_vm3, %v1583_v2, 0.0 }
 0x818   : > { %1586 = vadd.xlane.f32.xlu2 %v1585_v4  ;;  %v1578_v5 = vpop.xlane.xlu2 %1577 }
 0x819   : > { %v1580_v6 = vmul.f32 %v1578_v5, %v3482_v62 }
 0x81b   : > { %v1582_v8 = vsub.f32 %v1570_v29, %v1580_v6 }
 0x81d   : > { %v1584_v9 = vmul.f32 %v1582_v8, %v1582_v8 }
 0x81f   : > { %v1588_v11 = vsel %vm862_vm3, %v1584_v9, 0.0 }
 0x820   : > { %1589 = vadd.xlane.f32.xlu2 %v1588_v11 }
 0x88b   : > { %v1587_v13 = vpop.xlane.xlu2 %1586 }
 0x88c   : > { %v1591_v14 = vmul.f32 %v1587_v13, %v3482_v62 }
 0x88e   : > { %v1593_v15 = vadd.f32 1e-05, %v1591_v14 }
 0x890   : > { %3061 = vrsqrt.f32 %v1593_v15  ;;  %vm1601_vm0 = vweird.f32 %v1593_v15 }
 0x893   : > { %v1590_v17 = vpop.xlane.xlu2 %1589 }
 0x894   : > { %v1592_v18 = vmul.f32 %v1590_v17, %v3482_v62 }
 0x896   : > { %v3062_v19 = vpop.eup %3061  ;;  %v1594_v20 = vadd.f32 1e-05, %v1592_v18 }
 0x897   : > { %v1596_v21 = vmul.f32 %v3062_v19, %v1593_v15  ;;  %vm1602_vm15 = vweird.f32 %v3062_v19 }
 0x898   : > { %3063 = vrsqrt.f32 %v1594_v20  ;;  %vm1603_vm1 = vmor %vm1601_vm0, %vm1602_vm15  ;;  %vm1611_vm8 = vweird.f32 %v1594_v20 }
 0x899   : > { %v1597_v22 = vmul.f32 %v3062_v19, %v1596_v21 }
 0x89b   : > { %v1598_v23 = vmul.f32 0.5, %v1597_v22 }
 0x89d   : > { %v1599_v24 = vsub.f32 1.5, %v1598_v23 }
 0x89e   : > { %v3064_v25 = vpop.eup %3063 }
 0x89f   : > { %v1600_v26 = vmul.f32 %v3062_v19, %v1599_v24  ;;  %v1606_v27 = vmul.f32 %v3064_v25, %v1594_v20  ;;  %vm1612_vm7 = vweird.f32 %v3064_v25 }
 0x8a0   : > { %vm1613_vm9 = vmor %vm1611_vm8, %vm1612_vm7 }
 0x8a1   : > { %v1607_v28 = vmul.f32 %v3064_v25, %v1606_v27  ;;  %v1604_v31 = vsel %vm1603_vm1, %v3062_v19, %v1600_v26 }
 0x8a2   : > { %v1615_v33 = vmul.f32 %v1604_v31, %v1581_v30 }
 0x8a3   : > { %v1608_v37 = vmul.f32 0.5, %v1607_v28 }
 0x8a4   : > { %v1620_v38 = vmul.f32 %v3011_v34, %v1615_v33 }
 0x8a5   : > { %v1609_v32 = vsub.f32 1.5, %v1608_v37 }
 0x8a6   : > { %v3542_v41 = vadd.f32 %v3012_v36, %v1620_v38 }
 0x8a7   : > { %v1610_v35 = vmul.f32 %v3064_v25, %v1609_v32 }
 0x8a9   : > { %v1614_v42 = vsel %vm1613_vm9, %v3064_v25, %v1610_v35 }
 0x8aa   : > { %v1616_v39 = vmul.f32 %v1614_v42, %v1582_v8 }
 0x8ac   : > { %v1621_v40 = vmul.f32 %v3011_v34, %v1616_v39 }
 0x8ae   : > { %v3544_v43 = vadd.f32 %v3012_v36, %v1621_v40 }
 0x8b0   : > { %v1627_v44 = vpack.c.bf16 %v3544_v43, %v3542_v41 }
 0x8b2   : > { %2813 = vmatmul.msk.bf16.vlgmr.msrb.gmra.mxu1 %vm862_vm3, %v1627_v44 }
 0x92f   : > { %v1662_v46 = vpop.f32.mrf.mxu1 }
 0x930   : > { %v1663_v47 = vadd.f32 %v3013_v45, %v1662_v46 }
 0x932   : > { %v1667_v48 = vpack.c.bf16 %v1663_v47, %v1663_v47 }
 0x934   : > { %v1670_v49 = vunpack.c.l.b16 %v1667_v48 }
 0x936   : > { %v3552_v50 = vpack.c.b16 %v1670_v49, %v1670_v49 }
 0x937   : > { %v1664_v51 = vpop.f32.mrf.mxu1 }
 0x938   : > { %v1665_v52 = vadd.f32 %v3013_v45, %v1664_v51  ;;  %1785 = vrot.lane.b32.xlu2 %v3552_v50, %s3127_s26  ;;  %1672 = vrot.lane.b32.xlu0 %v3552_v50, %s3875_s2 }
 0x93a   : > { %v1668_v53 = vpack.c.bf16 %v1665_v52, %v1665_v52 }
 0x93c   : > { %v1694_v54 = vunpack.c.l.b16 %v1668_v53 }
 0x93e   : > { %v3558_v55 = vpack.c.b16 %v1694_v54, %v1694_v54 }
 0x940   : > { %1696 = vrot.lane.b32.xlu1 %v3558_v55, %s3875_s2  ;;  %1897 = vrot.lane.b32.xlu2 %v3552_v50, %s3893_s27  ;;  %s3905_s2 = smov 96  }
 0x941   : > { %1808 = vrot.lane.b32.xlu0 %v3558_v55, %s3127_s26  ;;  %s3898_s26 = smov 64  }
 0x948   : > { %1783 = vrot.lane.b32.xlu1 %v3552_v50, %s3894_s7  ;;  %1918 = vrot.lane.b32.xlu2 %v3558_v55, %s3895_s25 }
 0x949   : > { %1806 = vrot.lane.b32.xlu0 %v3558_v55, %s3894_s7  ;;  %s3904_s7 = smov 24  }
 0x950   : > { %1920 = vrot.lane.b32.xlu1 %v3558_v55, %s3893_s27  ;;  %2007 = vrot.lane.b32.xlu2 %v3552_v50, %s3896_s28  ;;  %s3903_s27 = smov 16  }
 0x951   : > { %1895 = vrot.lane.b32.xlu0 %v3552_v50, %s3895_s25 }
 0x958   : > { %2009 = vrot.lane.b32.xlu1 %v3552_v50, %s3897_s29 }
 0x959   : > { %2032 = vrot.lane.b32.xlu0 %v3558_v55, %s3897_s29  ;;  %s2730_s29 = sshll.u32 %s3907_s24, 2 }
 0x960   : > { %2030 = vrot.lane.b32.xlu1 %v3558_v55, %s3896_s28 }
 0x961   : > { %1741 = vrot.lane.b32.xlu0 %v3552_v50, %s3898_s26 }
 0x992   : > { %v1786_v56 = vpop.permute.xlu2 %1785 }
 0x993   : > { %v1791_v59 = vsel %vm893_vm4, %v1786_v56, 0 }
 0x99a   : > { %v1898_v60 = vpop.permute.xlu2 %1897 }
 0x99b   : > { %v1903_v29 = vsel %vm893_vm4, %v1898_v60, 0 }
 0x9a2   : > { %v1919_v15 = vpop.permute.xlu2 %1918 }
 0x9aa   : > { %v1673_v57 = vpop.permute.xlu0 %1672  ;;  %v2008_v16 = vpop.permute.xlu2 %2007 }
 0x9ab   : > { %v1678_v58 = vsel %vm893_vm4, %v1673_v57, 0 }
 0x9ac   : > { %1687 = vmatpush.bf16.xpose.msrb.mxu2 %v1678_v58 }
 0x9b2   : > { %v1697_v61 = vpop.permute.xlu1 %1696 }
 0x9b3   : > { %v1702_v63 = vsel %vm893_vm4, %v1697_v61, 0  ;;  %v1809_v0 = vpop.permute.xlu0 %1808  ;;  %2814 = vmatmul.msk.bf16.vlgmr.msrb.gmra.mxu2 %vm893_vm4, %v1667_v48 }
 0x9b4   : > { %1800 = vmatpush.bf16.xpose.msra.mxu2 %v1791_v59  ;;  %v1814_v1 = vsel %vm893_vm4, %v1809_v0, 0  ;;  %1711 = vmatpush.bf16.xpose.msrb.mxu3 %v1702_v63 }
 0x9ba   : > { %v1784_v30 = vpop.permute.xlu1 %1783 }
 0x9bb   : > { %v1807_v2 = vpop.permute.xlu0 %1806  ;;  %2815 = vmatmul.msk.bf16.vlgmr.msrb.gmra.mxu3 %vm893_vm4, %v1668_v53 }
 0x9bc   : > { %1912 = vmatpush.bf16.xpose.msrb.mxu2 %v1903_v29  ;;  %1823 = vmatpush.bf16.xpose.msra.mxu3 %v1814_v1 }
 0x9c2   : > { %v1921_v4 = vpop.permute.xlu1 %1920 }
 0x9c3   : > { %v1926_v5 = vsel %vm893_vm4, %v1921_v4, 0  ;;  %v1896_v6 = vpop.permute.xlu0 %1895  ;;  %2818 = vmatmul.msk.bf16.vlgmr.msra.gmra.mxu2 %vm893_vm4, %v1784_v30 }
 0x9c4   : > { %1935 = vmatpush.bf16.xpose.msrb.mxu3 %v1926_v5 }
 0x9ca   : > { %v2010_v8 = vpop.permute.xlu1 %2009 }
 0x9cb   : > { %v2015_v9 = vsel %vm893_vm4, %v2010_v8, 0  ;;  %v2033_v11 = vpop.permute.xlu0 %2032  ;;  %2819 = vmatmul.msk.bf16.vlgmr.msra.gmra.mxu3 %vm893_vm4, %v1807_v2 }
 0x9cc   : > { %v2038_v12 = vsel %vm893_vm4, %v2033_v11, 0  ;;  %2024 = vmatpush.bf16.xpose.msra.mxu2 %v2015_v9 }
 0x9cd   : > { %2047 = vmatpush.bf16.xpose.msra.mxu3 %v2038_v12 }
 0x9d2   : > { %v2031_v17 = vpop.permute.xlu1 %2030 }
 0x9d3   : > { %v1742_v13 = vpop.permute.xlu0 %1741  ;;  %2822 = vmatmul.msk.bf16.vlgmr.msrb.gmra.mxu2 %vm893_vm4, %v1896_v6 }
 0x9d4   : > { %v1747_v14 = vsel %vm966_vm5, %v1742_v13, 0 }
 0x9d5   : > { %1756 = vmatpush.bf16.msra.mxu0 %v1747_v14 }
 0x9db   : > { %2823 = vmatmul.msk.bf16.vlgmr.msrb.gmra.mxu3 %vm893_vm4, %v1919_v15 }
 0x9e3   : > { %2826 = vmatmul.msk.bf16.vlgmr.msra.gmra.mxu2 %vm893_vm4, %v2008_v16 }
 0x9eb   : > { %2827 = vmatmul.msk.bf16.vlgmr.msra.gmra.mxu3 %vm893_vm4, %v2031_v17 }
 0xa36   : > { %v1689_v18 = vpop.f32.mrf.mxu2 }
 0xa37   : > { %v1690_v19 = vadd.f32 %v3369_v3, %v1689_v18 }
 0xa39   : > { %v1717_v20 = vsel %vm893_vm4, %v1690_v19, -inf }
 0xa3a   : > { %1718 = vmax.xlane.f32.xlu0 %v1717_v20 }
 0xa3e   : > { %v1691_v21 = vpop.f32.mrf.mxu2  ;;  %v1713_v22 = vpop.f32.mrf.mxu3 }
 0xa3f   : > { %v1714_v23 = vadd.f32 %v3374_v7, %v1713_v22 }
 0xa41   : > { %v1720_v24 = vsel %vm893_vm4, %v1714_v23, -inf }
 0xa42   : > { %1721 = vmax.xlane.f32.xlu2 %v1720_v24 }
 0xa46   : > { %v1715_v25 = vpop.f32.mrf.mxu3  ;;  %v1802_v26 = vpop.f32.mrf.mxu2 }
 0xa47   : > { %v1803_v27 = vadd.f32 %v3369_v3, %v1802_v26 }
 0xa49   : > { %v1829_v28 = vsel %vm893_vm4, %v1803_v27, -inf }
 0xa4a   : > { %1830 = vmax.xlane.f32.xlu1 %v1829_v28 }
 0xa4e   : > { %v1804_v31 = vpop.f32.mrf.mxu2  ;;  %v1825_v37 = vpop.f32.mrf.mxu3 }
 0xa4f   : > { %v1826_v32 = vadd.f32 %v3374_v7, %v1825_v37 }
 0xa51   : > { %v1832_v34 = vsel %vm893_vm4, %v1826_v32, -inf }
 0xa52   : > { %1833 = vmax.xlane.f32.xlu2 %v1832_v34 }
 0xa56   : > { %v1827_v33 = vpop.f32.mrf.mxu3  ;;  %v1914_v35 = vpop.f32.mrf.mxu2 }
 0xa57   : > { %v1915_v42 = vadd.f32 %v3369_v3, %v1914_v35 }
 0xa59   : > { %v1941_v36 = vsel %vm893_vm4, %v1915_v42, -inf }
 0xa5a   : > { %1942 = vmax.xlane.f32.xlu0 %v1941_v36 }
 0xa5e   : > { %v1916_v38 = vpop.f32.mrf.mxu2  ;;  %v1937_v39 = vpop.f32.mrf.mxu3 }
 0xa5f   : > { %v1938_v40 = vadd.f32 %v3374_v7, %v1937_v39 }
 0xa61   : > { %v1944_v44 = vsel %vm893_vm4, %v1938_v40, -inf }
 0xa62   : > { %1945 = vmax.xlane.f32.xlu1 %v1944_v44 }
 0xa66   : > { %v1939_v45 = vpop.f32.mrf.mxu3  ;;  %v2026_v46 = vpop.f32.mrf.mxu2 }
 0xa67   : > { %v3616_v47 = vadd.f32 %v3369_v3, %v2026_v46 }
 0xa69   : > { %v2053_v48 = vsel %vm893_vm4, %v3616_v47, -inf }
 0xa6a   : > { %2054 = vmax.xlane.f32.xlu2 %v2053_v48 }
 0xa6e   : > { %v2028_v49 = vpop.f32.mrf.mxu2  ;;  %v2049_v51 = vpop.f32.mrf.mxu3 }
 0xa6f   : > { %v2050_v52 = vadd.f32 %v3374_v7, %v2049_v51 }
 0xa71   : > { %v2056_v53 = vsel %vm893_vm4, %v2050_v52, -inf }
 0xa72   : > { %2057 = vmax.xlane.f32.xlu0 %v2056_v53 }
 0xa76   : > { %v2051_v54 = vpop.f32.mrf.mxu3 }
 0xa82   : > { %1874 = vrot.lane.b32.xlu2 %v3558_v55, %s3899_s0 }
 0xa86   : > { %1853 = vrot.lane.b32.xlu0 %v3552_v50, %s3899_s0 }
 0xa8a   : > { %1965 = vrot.lane.b32.xlu2 %v3552_v50, %s3900_s30 }
 0xaad   : > { %v1719_v3 = vpop.xlane.xlu0 %1718 }
 0xaae   : > { %v1723_v56 = vsub.f32 %v1690_v19, %v1719_v3 }
 0xab0   : > { %v1725_v57 = vmul.f32 1.442695, %v1723_v56 }
 0xab2   : > { %3065 = vpow2.f32 %v1725_v57 }
 0xab5   : > { %v1722_v58 = vpop.xlane.xlu2 %1721 }
 0xab6   : > { %v1724_v59 = vsub.f32 %v1714_v23, %v1722_v58 }
 0xab8   : > { %v3066_v7 = vpop.eup %3065  ;;  %v1727_v60 = vmul.f32 1.442695, %v1724_v59 }
 0xab9   : > { %v1729_v61 = vsel %vm893_vm4, %v3066_v7, 0.0 }
 0xaba   : > { %3067 = vpow2.f32 %v1727_v60  ;;  %1730 = vadd.xlane.f32.xlu1 %v1729_v61 }
 0xabd   : > { %v1831_v29 = vpop.xlane.xlu1 %1830 }
 0xabe   : > { %v1835_v63 = vsub.f32 %v1803_v27, %v1831_v29 }
 0xac0   : > { %v3629_v0 = vpop.eup %3067  ;;  %v1837_v1 = vmul.f32 1.442695, %v1835_v63 }
 0xac1   : > { %v1732_v30 = vsel %vm893_vm4, %v3629_v0, 0.0 }
 0xac2   : > { %3069 = vpow2.f32 %v1837_v1  ;;  %1733 = vadd.xlane.f32.xlu2 %v1732_v30 }
 0xac5   : > { %v1834_v2 = vpop.xlane.xlu2 %1833 }
 0xac6   : > { %v1836_v4 = vsub.f32 %v1826_v32, %v1834_v2 }
 0xac8   : > { %v3070_v5 = vpop.eup %3069  ;;  %v1839_v6 = vmul.f32 1.442695, %v1836_v4 }
 0xac9   : > { %v1841_v8 = vsel %vm893_vm4, %v3070_v5, 0.0 }
 0xaca   : > { %3071 = vpow2.f32 %v1839_v6  ;;  %1842 = vadd.xlane.f32.xlu2 %v1841_v8 }
 0xacd   : > { %v1943_v9 = vpop.xlane.xlu0 %1942 }
 0xace   : > { %v1947_v11 = vsub.f32 %v1915_v42, %v1943_v9 }
 0xad0   : > { %v3634_v12 = vpop.eup %3071  ;;  %v1949_v13 = vmul.f32 1.442695, %v1947_v11 }
 0xad1   : > { %v1844_v14 = vsel %vm893_vm4, %v3634_v12, 0.0 }
 0xad2   : > { %3073 = vpow2.f32 %v1949_v13  ;;  %1845 = vadd.xlane.f32.xlu2 %v1844_v14 }
 0xad3   : > { %1762 = vrot.lane.b32.xlu1 %v3558_v55, %s3898_s26 }
 0xad5   : > { %v1946_v19 = vpop.xlane.xlu1 %1945 }
 0xad6   : > { %v1948_v21 = vsub.f32 %v1938_v40, %v1946_v19 }
 0xad8   : > { %v3640_v15 = vpop.eup %3073  ;;  %v1951_v22 = vmul.f32 1.442695, %v1948_v21 }
 0xad9   : > { %v1953_v16 = vsel %vm893_vm4, %v3640_v15, 0.0 }
 0xada   : > { %1954 = vadd.xlane.f32.xlu0 %v1953_v16 }
 0xadd   : > { %v2055_v31 = vpop.xlane.xlu2 %2054 }
 0xade   : > { %v2059_v37 = vsub.f32 %v3616_v47, %v2055_v31 }
 0xae0   : > { %v2061_v32 = vmul.f32 1.442695, %v2059_v37 }
 0xae5   : > { %v2058_v17 = vpop.xlane.xlu0 %2057  ;;  %v1875_v35 = vpop.permute.xlu2 %1874 }
 0xae6   : > { %v2060_v18 = vsub.f32 %v2050_v52, %v2058_v17  ;;  %v1880_v53 = vsel %vm966_vm5, %v1875_v35, 0 }
 0xae8   : > { %v2063_v20 = vmul.f32 1.442695, %v2060_v18 }
 0xaea   : > { %3075 = vpow2.f32 %v2063_v20  ;;  %1986 = vrot.lane.b32.xlu2 %v3558_v55, %s3900_s30  ;;  %s753_s30 = scalar_lea.vmem %s3851_s23, %s2730_s29 }
 0xaeb   : > { %3077 = vpow2.f32 %v1951_v22 }
 0xaec   : > { %3079 = vpow2.f32 %v2061_v32 }
 0xaed   : > { %v1966_v42 = vpop.permute.xlu2 %1965 }
 0xaf0   : > { %v3646_v23 = vpop.eup %3075 }
 0xaf1   : > { %v2068_v24 = vsel %vm893_vm4, %v3646_v23, 0.0  ;;  %v3078_v26 = vpop.eup %3077 }
 0xaf2   : > { %2069 = vadd.xlane.f32.xlu0 %v2068_v24  ;;  %v1956_v28 = vsel %vm893_vm4, %v3078_v26, 0.0  ;;  %v3655_v34 = vpop.eup %3079 }
 0xaf3   : > { %v2065_v33 = vsel %vm893_vm4, %v3655_v34, 0.0 }
 0xaf8   : > { %v1854_v25 = vpop.permute.xlu0 %1853 }
 0xaf9   : > { %v1859_v27 = vsel %vm966_vm5, %v1854_v25, 0 }
 0xafa   : > { %1868 = vmatpush.bf16.msrb.mxu0 %v1859_v27 }
 0xafd   : > { %1957 = vadd.xlane.f32.xlu1 %v1956_v28 }
 0xb06   : > { %2098 = vrot.lane.b32.xlu0 %v3558_v55, %s3901_s3  ;;  %v1971_v55 = vsel %vm966_vm5, %v1966_v42, 0 }
 0xb13   : > { %2066 = vadd.xlane.f32.xlu2 %v2065_v33 }
 0xb16   : > { %2077 = vrot.lane.b32.xlu1 %v3552_v50, %s3901_s3 }
 0xb2d   : > { %v1731_v36 = vpop.xlane.xlu1 %1730 }
 0xb2e   : > { %3081 = vrcp.f32 %v1731_v36 }
 0xb34   : > { %v3082_v38 = vpop.eup %3081 }
 0xb35   : > { %v1737_v39 = vmul.f32 %v3082_v38, %v3066_v7  ;;  %v1734_v40 = vpop.xlane.xlu2 %1733  ;;  %v2930_v38 = vld [vmem:[%s3837_s9 + $0x18] sm:$0xff] }
 0xb36   : > { %3083 = vrcp.f32 %v1734_v40  ;;  %2181 = vmatpush.bf16.msrb.mxu2 %v2930_v38 }
 0xb37   : > { %v1739_v44 = vpack.c.bf16 %v1737_v39, %v1737_v39  ;;  %v2929_v39 = vld [vmem:[%s3837_s9 + $0x10] sm:$0xff] }
 0xb39   : > { %2816 = vmatmul.msk.bf16.vlgmr.msra.gmra.mxu0 %vm893_vm4, %v1739_v44 }
 0xb3a   : > { %1980 = vmatpush.bf16.msra.mxu0 %v1971_v55  ;;  %2182 = vmatpush.bf16.msrb.mxu2 %v2929_v39 }
 0xb3c   : > { %v3084_v46 = vpop.eup %3083 }
 0xb3d   : > { %v1843_v45 = vpop.xlane.xlu2 %1842  ;;  %v1738_v50 = vmul.f32 %v3084_v46, %v3629_v0 }
 0xb3e   : > { %3085 = vrcp.f32 %v1843_v45 }
 0xb3f   : > { %v1740_v3 = vpack.c.bf16 %v1738_v50, %v1738_v50 }
 0xb44   : > { %v3086_v47 = vpop.eup %3085 }
 0xb45   : > { %v1849_v48 = vmul.f32 %v3086_v47, %v3070_v5  ;;  %v1846_v49 = vpop.xlane.xlu2 %1845  ;;  %v1763_v51 = vpop.permute.xlu1 %1762 }
 0xb46   : > { %v1768_v52 = vsel %vm966_vm5, %v1763_v51, 0  ;;  %3087 = vrcp.f32 %v1846_v49 }
 0xb47   : > { %v1851_v54 = vpack.c.bf16 %v1849_v48, %v1849_v48  ;;  %1777 = vmatpush.bf16.msra.mxu1 %v1768_v52 }
 0xb49   : > { %2820 = vmatmul.msk.bf16.vlgmr.msrb.gmra.mxu0 %vm893_vm4, %v1851_v54 }
 0xb4a   : > { %2817 = vmatmul.msk.bf16.vlgmr.msra.gmra.mxu1 %vm893_vm4, %v1740_v3 }
 0xb4b   : > { %1889 = vmatpush.bf16.msrb.mxu1 %v1880_v53 }
 0xb4c   : > { %v3088_v59 = vpop.eup %3087 }
 0xb4d   : > { %v1987_v56 = vpop.permute.xlu2 %1986  ;;  %v1955_v57 = vpop.xlane.xlu0 %1954  ;;  %v1850_v60 = vmul.f32 %v3088_v59, %v3634_v12 }
 0xb4e   : > { %v1992_v58 = vsel %vm966_vm5, %v1987_v56, 0  ;;  %3089 = vrcp.f32 %v1955_v57 }
 0xb4f   : > { %2001 = vmatpush.bf16.msra.mxu1 %v1992_v58  ;;  %v1852_v63 = vpack.c.bf16 %v1850_v60, %v1850_v60  ;;  %v3014_v58 = vld [vmem:[%s3838_s10 + $0x1] ss:$0 sm:$0xff] }
 0xb54   : > { %v3090_v7 = vpop.eup %3089 }
 0xb55   : > { %v1961_v61 = vmul.f32 %v3090_v7, %v3640_v15 }
 0xb57   : > { %v1963_v29 = vpack.c.bf16 %v1961_v61, %v1961_v61 }
 0xb59   : > { %2824 = vmatmul.msk.bf16.vlgmr.msra.gmra.mxu0 %vm893_vm4, %v1963_v29 }
 0xb5a   : > { %2821 = vmatmul.msk.bf16.vlgmr.msrb.gmra.mxu1 %vm893_vm4, %v1852_v63 }
 0xb65   : > { %v2070_v0 = vpop.xlane.xlu0 %2069 }
 0xb70   : > { %v1958_v1 = vpop.xlane.xlu1 %1957 }
 0xb71   : > { %3091 = vrcp.f32 %v1958_v1 }
 0xb72   : > { %3093 = vrcp.f32 %v2070_v0 }
 0xb77   : > { %v3092_v30 = vpop.eup %3091 }
 0xb78   : > { %v1962_v2 = vmul.f32 %v3092_v30, %v3078_v26  ;;  %v2099_v4 = vpop.permute.xlu0 %2098  ;;  %v3094_v8 = vpop.eup %3093 }
 0xb79   : > { %v2104_v5 = vsel %vm966_vm5, %v2099_v4, 0  ;;  %v2074_v9 = vmul.f32 %v3094_v8, %v3646_v23 }
 0xb7a   : > { %v1964_v6 = vpack.c.bf16 %v1962_v2, %v1962_v2  ;;  %2113 = vmatpush.bf16.msrb.mxu1 %v2104_v5 }
 0xb7b   : > { %v2076_v14 = vpack.c.bf16 %v2074_v9, %v2074_v9 }
 0xb7c   : > { %2825 = vmatmul.msk.bf16.vlgmr.msra.gmra.mxu1 %vm893_vm4, %v1964_v6 }
 0xb86   : > { %v2067_v11 = vpop.xlane.xlu2 %2066 }
 0xb87   : > { %3095 = vrcp.f32 %v2067_v11 }
 0xb88   : > { %v2078_v12 = vpop.permute.xlu1 %2077 }
 0xb89   : > { %v2083_v13 = vsel %vm966_vm5, %v2078_v12, 0 }
 0xb8a   : > { %2092 = vmatpush.bf16.msrb.mxu0 %v2083_v13 }
 0xb8c   : > { %2829 = vmatmul.msk.bf16.vlgmr.msrb.gmra.mxu1 %vm893_vm4, %v2076_v14 }
 0xb8d   : > { %v3096_v15 = vpop.eup %3095 }
 0xb8e   : > { %v2073_v16 = vmul.f32 %v3096_v15, %v3655_v34 }
 0xb90   : > { %v2075_v17 = vpack.c.bf16 %v2073_v16, %v2073_v16  ;;  %v2931_v16 = vld [vmem:[%s3841_s13 + $0x10] sm:$0xff] }
 0xb92   : > { %2828 = vmatmul.msk.bf16.vlgmr.msrb.gmra.mxu0 %vm893_vm4, %v2075_v17 }
 0xbb6   : > { %v1758_v18 = vpop.f32.mrf.mxu0 }
 0xbbe   : > { %v1760_v19 = vpop.f32.mrf.mxu0 }
 0xbc6   : > { %v1870_v20 = vpop.f32.mrf.mxu0 }
 0xbc7   : > { %v1779_v21 = vpop.f32.mrf.mxu1 }
 0xbce   : > { %v1872_v22 = vpop.f32.mrf.mxu0 }
 0xbcf   : > { %v1781_v23 = vpop.f32.mrf.mxu1 }
 0xbd6   : > { %v1982_v24 = vpop.f32.mrf.mxu0 }
 0xbd7   : > { %v1891_v25 = vpop.f32.mrf.mxu1 }
 0xbd8   : > { %v2986_v26 = vpack.i.bf16 %v1891_v25, %v1870_v20 }
 0xbda   : > { %2987 = vrot.lane.b32.xlu0 %v2986_v26, %s3902_s6 }
 0xbde   : > { %v1984_v27 = vpop.f32.mrf.mxu0 }
 0xbdf   : > { %v1893_v28 = vpop.f32.mrf.mxu1 }
 0xbf9   : > { %v2003_v31 = vpop.f32.mrf.mxu1 }
 0xbfa   : > { %v2991_v37 = vpack.i.bf16 %v2003_v31, %v1982_v24 }
 0xbfc   : > { %2992 = vrot.lane.b32.xlu1 %v2991_v37, %s3903_s27 }
 0xc01   : > { %v2005_v32 = vpop.f32.mrf.mxu1 }
 0xc09   : > { %v2115_v34 = vpop.f32.mrf.mxu1 }
 0xc0f   : > { %v2094_v33 = vpop.f32.mrf.mxu0 }
 0xc10   : > { %v2996_v35 = vpack.i.bf16 %v2115_v34, %v2094_v33  ;;  %v3015_v34 = vld [vmem:[%s3839_s11 + $0x1] ss:$0 sm:$0xff] }
 0xc11   : > { %v2117_v42 = vpop.f32.mrf.mxu1 }
 0xc12   : > { %2997 = vrot.lane.b32.xlu2 %v2996_v35, %s3904_s7 }
 0xc17   : > { %v2096_v36 = vpop.f32.mrf.mxu0 }
 0xc18   : > { %v3016_v36 = vld [vmem:[%s3840_s12 + $0x1] ss:$0 sm:$0xff] }
 0xc4c   : > { %v2988_v40 = vpop.permute.xlu0 %2987 }
 0xc4d   : > { %v2990_v44 = vunpack.i.h.bf16 %v2988_v40  ;;  %v2989_v55 = vunpack.i.l.bf16 %v2988_v40 }
 0xc4f   : > { %v2144_v48 = vsel %vm893_vm4, %v1779_v21, %v2990_v44  ;;  %v2143_v49 = vsel %vm893_vm4, %v1758_v18, %v2989_v55 }
 0xc6c   : > { %v2998_v45 = vpop.permute.xlu2 %2997 }
 0xc6d   : > { %v3000_v51 = vunpack.i.h.bf16 %v2998_v45  ;;  %v2999_v52 = vunpack.i.l.bf16 %v2998_v45 }
 0xc6e   : > { %v2993_v46 = vpop.permute.xlu1 %2992 }
 0xc6f   : > { %v2995_v47 = vunpack.i.h.bf16 %v2993_v46  ;;  %v2994_v50 = vunpack.i.l.bf16 %v2993_v46  ;;  %v2936_v46 = vld [vmem:[%s3843_s15 + $0x38] sm:$0xff] }
 0xc70   : > { %2337 = vmatpush.bf16.msra.mxu0 %v2936_v46 }
 0xc71   : > { %v2145_v53 = vsel %vm805_vm2, %v2143_v49, %v2994_v50  ;;  %v2146_v54 = vsel %vm805_vm2, %v2144_v48, %v2995_v47  ;;  %v2935_v47 = vld [vmem:[%s3843_s15 + $0x30] sm:$0xff]  ;;  %v2934_v50 = vld [vmem:[%s3843_s15 + $0x28] sm:$0xff]  ;;  %v2933_v48 = vld [vmem:[%s3843_s15 + $0x20] sm:$0xff] }
 0xc72   : > { %v2147_v3 = vsel %vm1368_vm6, %v2145_v53, %v2999_v52  ;;  %v2148_v56 = vsel %vm1368_vm6, %v2146_v54, %v3000_v51  ;;  %v3017_v51 = vld [vmem:[%s3842_s14 + $0x1] ss:$0 sm:$0xff] }
 0xc73   : > { %v2149_v57 = vpack.c.bf16 %v2148_v56, %v2147_v3 }
 0xc74   : > { %2338 = vmatpush.bf16.msra.mxu0 %v2935_v47 }
 0xc75   : > { %2843 = vmatmul.msk.bf16.vlgmr.msrb.gmra.mxu2 %vm862_vm3, %v2149_v57 }
 0xc78   : > { %2339 = vmatpush.bf16.msra.mxu0 %v2934_v50 }
 0xc7c   : > { %2340 = vmatpush.bf16.msra.mxu0 %v2933_v48 }
 0xcf8   : > { %v2184_v59 = vpop.f32.mrf.mxu2 }
 0xcf9   : > { %v2185_v7 = vadd.f32 %v3014_v58, %v2184_v59 }
 0xcfb   : > { %v2189_v60 = vadd.f32 %v2185_v7, %v3542_v41 }
 0xcfd   : > { %v2195_v61 = vsel %vm862_vm3, %v2189_v60, 0.0 }
 0xcfe   : > { %2196 = vadd.xlane.f32.xlu0 %v2195_v61 }
 0xd00   : > { %v2186_v29 = vpop.f32.mrf.mxu2 }
 0xd01   : > { %v2187_v63 = vadd.f32 %v3014_v58, %v2186_v29  ;;  %v3018_v58 = vld [vmem:[%s3844_s16 + $0x1] ss:$0 sm:$0xff] }
 0xd03   : > { %v2190_v0 = vadd.f32 %v2187_v63, %v3544_v43  ;;  %v2932_v43 = vld [vmem:[%s3841_s13 + $0x18] sm:$0xff] }
 0xd04   : > { %2281 = vmatpush.bf16.msrb.mxu3 %v2932_v43 }
 0xd05   : > { %v2198_v1 = vsel %vm862_vm3, %v2190_v0, 0.0 }
 0xd06   : > { %2199 = vadd.xlane.f32.xlu1 %v2198_v1 }
 0xd08   : > { %2282 = vmatpush.bf16.msrb.mxu3 %v2931_v16 }
 0xd71   : > { %v2197_v30 = vpop.xlane.xlu0 %2196 }
 0xd72   : > { %v2201_v2 = vmul.f32 %v2197_v30, %v3482_v62  ;;  %v827_v30 = vld [vmem:[%s3366_s1 + $0x1] sm:$0x1] }
 0xd73   : > { %vm829_vm13 = vcmp.eq.f32.partialorder %v827_v30, 0.0 }
 0xd74   : > { %v2203_v4 = vsub.f32 %v2189_v60, %v2201_v2  ;;  %v2739_v2 = vsel %vm829_vm13, 1.0, %v3126_v10 }
 0xd76   : > { %v2205_v5 = vmul.f32 %v2203_v4, %v2203_v4 }
 0xd78   : > { %v2207_v6 = vsel %vm862_vm3, %v2205_v5, 0.0 }
 0xd79   : > { %v2200_v8 = vpop.xlane.xlu1 %2199  ;;  %2208 = vadd.xlane.f32.xlu2 %v2207_v6 }
 0xd7a   : > { %v2202_v41 = vmul.f32 %v2200_v8, %v3482_v62 }
 0xd7c   : > { %v2204_v9 = vsub.f32 %v2190_v0, %v2202_v41  ;;  %v826_v41 = vld [vmem:[%s3366_s1] sm:$0x1]  ;;  %s3142_s1 = smov 32  }
 0xd7d   : > { %vm828_vm15 = vcmp.eq.f32.partialorder %v826_v41, 0.0 }
 0xd7e   : > { %v2206_v11 = vmul.f32 %v2204_v9, %v2204_v9 }
 0xd80   : > { %v2210_v12 = vsel %vm862_vm3, %v2206_v11, 0.0 }
 0xd81   : > { %2211 = vadd.xlane.f32.xlu0 %v2210_v12 }
 0xdec   : > { %v2209_v13 = vpop.xlane.xlu2 %2208 }
 0xded   : > { %v2213_v14 = vmul.f32 %v2209_v13, %v3482_v62  ;;  %v2738_v13 = vsel %vm828_vm15, 1.0, %v3126_v10 }
 0xdee   : > { %v835_v16 = vsel %vm834_vm12, %v2738_v13, 0.0 }
 0xdef   : > { %v2215_v15 = vadd.f32 1e-05, %v2213_v14 }
 0xdf1   : > { %3097 = vrsqrt.f32 %v2215_v15  ;;  %vm2223_vm4 = vweird.f32 %v2215_v15 }
 0xdf4   : > { %v2212_v17 = vpop.xlane.xlu0 %2211 }
 0xdf5   : > { %v2214_v18 = vmul.f32 %v2212_v17, %v3482_v62 }
 0xdf7   : > { %v3098_v19 = vpop.eup %3097  ;;  %v2216_v20 = vadd.f32 1e-05, %v2214_v18 }
 0xdf8   : > { %v2218_v21 = vmul.f32 %v3098_v19, %v2215_v15  ;;  %vm2224_vm2 = vweird.f32 %v3098_v19 }
 0xdf9   : > { %3099 = vrsqrt.f32 %v2216_v20  ;;  %vm2225_vm5 = vmor %vm2223_vm4, %vm2224_vm2  ;;  %vm2233_vm10 = vweird.f32 %v2216_v20 }
 0xdfa   : > { %v2219_v22 = vmul.f32 %v3098_v19, %v2218_v21 }
 0xdfc   : > { %v2220_v23 = vmul.f32 0.5, %v2219_v22 }
 0xdfe   : > { %v2221_v24 = vsub.f32 1.5, %v2220_v23 }
 0xdff   : > { %v3100_v25 = vpop.eup %3099 }
 0xe00   : > { %v2222_v26 = vmul.f32 %v3098_v19, %v2221_v24  ;;  %v2228_v27 = vmul.f32 %v3100_v25, %v2216_v20  ;;  %vm2234_vm6 = vweird.f32 %v3100_v25 }
 0xe01   : > { %vm2235_vm11 = vmor %vm2233_vm10, %vm2234_vm6 }
 0xe02   : > { %v2229_v28 = vmul.f32 %v3100_v25, %v2228_v27  ;;  %v2226_v31 = vsel %vm2225_vm5, %v3098_v19, %v2222_v26 }
 0xe03   : > { %v2237_v33 = vmul.f32 %v2226_v31, %v2203_v4  ;;  %v838_v4 = vsel %vm834_vm12, %v2739_v2, 0.0 }
 0xe04   : > { %v2230_v37 = vmul.f32 0.5, %v2229_v28  ;;  %839 = vadd.xlane.f32.xlu2 %v838_v4 }
 0xe05   : > { %v2242_v38 = vmul.f32 %v3015_v34, %v2237_v33 }
 0xe06   : > { %v2231_v32 = vsub.f32 1.5, %v2230_v37 }
 0xe07   : > { %v2247_v44 = vadd.f32 %v3016_v36, %v2242_v38 }
 0xe08   : > { %v2232_v35 = vmul.f32 %v3100_v25, %v2231_v32 }
 0xe0a   : > { %v2236_v42 = vsel %vm2235_vm11, %v3100_v25, %v2232_v35 }
 0xe0b   : > { %v2238_v39 = vmul.f32 %v2236_v42, %v2204_v9  ;;  %v2937_v42 = vld [vmem:[%s3847_s19] sm:$0xff] }
 0xe0d   : > { %v2243_v40 = vmul.f32 %v3015_v34, %v2238_v39 }
 0xe0f   : > { %v2248_v55 = vadd.f32 %v3016_v36, %v2243_v40  ;;  %v3019_v36 = vld [vmem:[%s3845_s17 + $0x1] ss:$0 sm:$0xff] }
 0xe11   : > { %v2249_v45 = vpack.c.bf16 %v2248_v55, %v2247_v44 }
 0xe13   : > { %2859 = vmatmul.msk.bf16.vlgmr.msrb.gmra.mxu3 %vm862_vm3, %v2249_v45 }
 0xe77   : > { %v840_v27 = vpop.xlane.xlu2 %839 }
 0xe78   : > { %v3757_v37 = vperm.slane %v840_v27, 0 }
 0xe7a   : > { %vm2443_vm10 = vweird.f32 %v3757_v37  ;;  %v2449_v13 = vand.u32 2147483648, %v3757_v37 }
 0xe96   : > { %v2284_v49 = vpop.f32.mrf.mxu3 }
 0xe97   : > { %v2285_v52 = vadd.f32 %v3017_v51, %v2284_v49 }
 0xe99   : > { %v2289_v3 = vmax.f32 %v2285_v52, 0.0 }
 0xe9e   : > { %v2286_v53 = vpop.f32.mrf.mxu3 }
 0xe9f   : > { %v2287_v54 = vadd.f32 %v3017_v51, %v2286_v53  ;;  %v2942_v51 = vld [vmem:[%s3849_s21 + $0x18] sm:$0xff] }
 0xea0   : > { %2543 = vmatpush.bf16.msra.mxu2 %v2942_v51 }
 0xea1   : > { %v2290_v56 = vmax.f32 %v2287_v54, 0.0 }
 0xea3   : > { %v2291_v57 = vpack.c.bf16 %v2290_v56, %v2289_v3  ;;  %v2941_v3 = vld [vmem:[%s3849_s21 + $0x10] sm:$0xff] }
 0xea4   : > { %2544 = vmatpush.bf16.msra.mxu2 %v2941_v3 }
 0xea5   : > { %2885 = vmatmul.msk.bf16.vlgmr.msra.gmra.mxu0 %vm1551_vm14, %v2291_v57 }
 0xf22   : > { %v2342_v59 = vpop.f32.mrf.mxu0 }
 0xf23   : > { %v2343_v7 = vadd.f32 %v3018_v58, %v2342_v59 }
 0xf25   : > { %v2347_v60 = vadd.f32 %v2343_v7, %v2247_v44  ;;  %v3020_v44 = vld [vmem:[%s3846_s18 + $0x1] ss:$0 sm:$0xff] }
 0xf27   : > { %v2353_v61 = vsel %vm862_vm3, %v2347_v60, 0.0 }
 0xf28   : > { %2354 = vadd.xlane.f32.xlu1 %v2353_v61 }
 0xf2a   : > { %v2344_v29 = vpop.f32.mrf.mxu0 }
 0xf2b   : > { %v2345_v63 = vadd.f32 %v3018_v58, %v2344_v29 }
 0xf2d   : > { %v2348_v0 = vadd.f32 %v2345_v63, %v2248_v55 }
 0xf2f   : > { %v2356_v1 = vsel %vm862_vm3, %v2348_v0, 0.0 }
 0xf30   : > { %2357 = vadd.xlane.f32.xlu0 %v2356_v1 }
 0xf9b   : > { %v2355_v5 = vpop.xlane.xlu1 %2354 }
 0xf9c   : > { %v2359_v6 = vmul.f32 %v2355_v5, %v3482_v62 }
 0xf9e   : > { %v2361_v8 = vsub.f32 %v2347_v60, %v2359_v6 }
 0xfa0   : > { %v2363_v9 = vmul.f32 %v2361_v8, %v2361_v8 }
 0xfa2   : > { %v2365_v11 = vsel %vm862_vm3, %v2363_v9, 0.0 }
 0xfa3   : > { %v2358_v12 = vpop.xlane.xlu0 %2357  ;;  %2366 = vadd.xlane.f32.xlu1 %v2365_v11 }
 0xfa4   : > { %v2360_v43 = vmul.f32 %v2358_v12, %v3482_v62 }
 0xfa6   : > { %v2362_v14 = vsub.f32 %v2348_v0, %v2360_v43  ;;  %v2447_v43 = vand.u32 2147483647, %v3757_v37 }
 0xfa8   : > { %v2364_v15 = vmul.f32 %v2362_v14, %v2362_v14  ;;  %vm2448_vm15 = vcmp.eq.f32.partialorder %v2447_v43, 8.507059e+37 }
 0xfaa   : > { %v2368_v17 = vsel %vm862_vm3, %v2364_v15, 0.0 }
 0xfab   : > { %2369 = vadd.xlane.f32.xlu0 %v2368_v17  ;;  %836 = vadd.xlane.f32.xlu1 %v835_v16 }
0x1016   : > { %v2367_v18 = vpop.xlane.xlu1 %2366 }
0x1017   : > { %v2371_v19 = vmul.f32 %v2367_v18, %v3482_v62 }
0x1019   : > { %v2373_v20 = vadd.f32 1e-05, %v2371_v19  ;;  %v2450_v19 = vor.u32 1.1754944e-38, %v2449_v13 }
0x101b   : > { %3101 = vrsqrt.f32 %v2373_v20  ;;  %vm2381_vm1 = vweird.f32 %v2373_v20 }
0x101e   : > { %v2370_v21 = vpop.xlane.xlu0 %2369  ;;  %v837_v23 = vpop.xlane.xlu1 %836 }
0x101f   : > { %v2372_v22 = vmul.f32 %v2370_v21, %v3482_v62  ;;  %v3755_v26 = vperm.slane %v837_v23, 0  ;;  %v2938_v62 = vld [vmem:[%s3847_s19 + $0x8] sm:$0xff] }
0x1020   : > { %2491 = vmatpush.bf16.msra.mxu1 %v2938_v62  ;;  %v2939_v62 = vld [vmem:[%s3849_s21] sm:$0xff] }
0x1021   : > { %v3102_v24 = vpop.eup %3101  ;;  %v2374_v25 = vadd.f32 1e-05, %v2372_v22  ;;  %vm2428_vm4 = vweird.f32 %v3755_v26  ;;  %v2434_v2 = vand.u32 2147483648, %v3755_v26  ;;  %v2432_v41 = vand.u32 2147483647, %v3755_v26 }
0x1022   : > { %v2376_v10 = vmul.f32 %v3102_v24, %v2373_v20  ;;  %vm2382_vm0 = vweird.f32 %v3102_v24 }
0x1023   : > { %3103 = vrsqrt.f32 %v2374_v25  ;;  %vm2383_vm7 = vmor %vm2381_vm1, %vm2382_vm0  ;;  %vm2391_vm9 = vweird.f32 %v2374_v25  ;;  %v2435_v11 = vor.u32 1.1754944e-38, %v2434_v2  ;;  %vm2433_vm12 = vcmp.eq.f32.partialorder %v2432_v41, 8.507059e+37 }
0x1024   : > { %v2377_v28 = vmul.f32 %v3102_v24, %v2376_v10  ;;  %3105 = vrcp.f32 %v3755_v26  ;;  %2492 = vmatpush.bf16.msra.mxu1 %v2937_v42  ;;  %vm2467_vm0 = vcmask 1041409  }
0x1025   : > { %3107 = vrcp.f32 %v3757_v37 }
0x1026   : > { %v2378_v31 = vmul.f32 0.5, %v2377_v28 }
0x1028   : > { %v2379_v32 = vsub.f32 1.5, %v2378_v31 }
0x1029   : > { %v3104_v34 = vpop.eup %3103 }
0x102a   : > { %v2380_v33 = vmul.f32 %v3102_v24, %v2379_v32  ;;  %v2386_v35 = vmul.f32 %v3104_v34, %v2374_v25  ;;  %v3106_v40 = vpop.eup %3105  ;;  %vm2392_vm8 = vweird.f32 %v3104_v34  ;;  %v2940_v32 = vld [vmem:[%s3849_s21 + $0x8] sm:$0xff] }
0x102b   : > { %v3108_v47 = vpop.eup %3107  ;;  %v2424_v48 = vmul.f32 %v3106_v40, %v3755_v26  ;;  %vm2393_vm2 = vmor %vm2391_vm9, %vm2392_vm8  ;;  %vm2429_vm5 = vweird.f32 %v3106_v40  ;;  %2545 = vmatpush.bf16.msra.mxu2 %v2940_v32  ;;  %vm2606_vm8 = vcmask 122880  }
0x102c   : > { %v2384_v38 = vsel %vm2383_vm7, %v3102_v24, %v2380_v33  ;;  %v2387_v39 = vmul.f32 %v3104_v34, %v2386_v35  ;;  %v2439_v54 = vmul.f32 %v3108_v47, %v3757_v37  ;;  %vm2430_vm6 = vmor %vm2428_vm4, %vm2429_vm5  ;;  %vm2444_vm11 = vweird.f32 %v3108_v47 }
0x102d   : > { %v2395_v55 = vmul.f32 %v2384_v38, %v2361_v8  ;;  %v2425_v58 = vsub.f32 1.0, %v2424_v48  ;;  %vm2445_vm13 = vmor %vm2443_vm10, %vm2444_vm11 }
0x102e   : > { %v2388_v45 = vmul.f32 0.5, %v2387_v39  ;;  %v2440_v61 = vsub.f32 1.0, %v2439_v54  ;;  %v3022_v39 = vld [vmem:[%s3850_s22] ss:$0 sm:$0xff] }
0x102f   : > { %v2400_v46 = vmul.f32 %v3019_v36, %v2395_v55  ;;  %v2426_v63 = vmul.f32 %v3106_v40, %v2425_v58  ;;  %2546 = vmatpush.bf16.msra.mxu2 %v2939_v62 }
0x1030   : > { %v2389_v50 = vsub.f32 1.5, %v2388_v45  ;;  %v2441_v4 = vmul.f32 %v3108_v47, %v2440_v61 }
0x1031   : > { %v2405_v49 = vadd.f32 %v3020_v44, %v2400_v46  ;;  %v2427_v8 = vadd.f32 %v3106_v40, %v2426_v63 }
0x1032   : > { %v2390_v52 = vmul.f32 %v3104_v34, %v2389_v50  ;;  %v2442_v12 = vadd.f32 %v3108_v47, %v2441_v4 }
0x1033   : > { %v2407_v53 = vsel %vm862_vm3, %v2405_v49, 0.0  ;;  %v2431_v16 = vsel %vm2430_vm6, %v3106_v40, %v2427_v8 }
0x1034   : > { %v2408_v56 = vrot.slane %v2407_v53, 4  ;;  %v2394_v57 = vsel %vm2393_vm2, %v3104_v34, %v2390_v52  ;;  %v2436_v18 = vsel %vm2433_vm12, %v2435_v11, %v2431_v16  ;;  %v2446_v22 = vsel %vm2445_vm13, %v3108_v47, %v2442_v12  ;;  %v3021_v34 = vld [vmem:[%s3848_s20] ss:$0 sm:$0xff] }
0x1035   : > { %v2396_v59 = vmul.f32 %v2394_v57, %v2362_v14  ;;  %v2451_v24 = vsel %vm2448_vm15, %v2450_v19, %v2446_v22 }
0x1036   : > { %v2409_v7 = vadd.f32 %v2408_v56, %v2407_v53 }
0x1037   : > { %v2401_v60 = vmul.f32 %v3019_v36, %v2396_v59 }
0x1038   : > { %v2410_v29 = vrot.slane %v2409_v7, 2 }
0x1039   : > { %v2406_v0 = vadd.f32 %v3020_v44, %v2401_v60 }
0x103a   : > { %v2411_v1 = vadd.f32 %v2410_v29, %v2409_v7 }
0x103b   : > { %v2414_v30 = vsel %vm862_vm3, %v2406_v0, 0.0 }
0x103c   : > { %v2415_v5 = vrot.slane %v2414_v30, 4  ;;  %v2412_v6 = vrot.slane %v2411_v1, 1 }
0x103e   : > { %v2416_v9 = vadd.f32 %v2415_v5, %v2414_v30  ;;  %v2413_v15 = vadd.f32 %v2412_v6, %v2411_v1 }
0x1040   : > { %v2417_v14 = vrot.slane %v2416_v9, 2  ;;  %v2437_v20 = vmul.f32 %v2436_v18, %v2413_v15 }
0x1042   : > { %v2418_v17 = vadd.f32 %v2417_v14, %v2416_v9  ;;  %v2453_v10 = vpack.c.bf16 %v2437_v20, %v2437_v20 }
0x1044   : > { %v2419_v21 = vrot.slane %v2418_v17, 1  ;;  %v2465_v27 = vunpack.c.l.b16 %v2453_v10 }
0x1046   : > { %v2420_v23 = vadd.f32 %v2419_v21, %v2418_v17 }
0x1048   : > { %v2452_v25 = vmul.f32 %v2451_v24, %v2420_v23 }
0x104a   : > { %v2454_v26 = vpack.c.bf16 %v2452_v25, %v2452_v25 }
0x104c   : > { %v2466_v28 = vunpack.c.l.b16 %v2454_v26 }
0x104e   : > { %v2468_v31 = vsel %vm2467_vm0, %v2466_v28, %v2465_v27 }
0x104f   : > { %v2469_v37 = vpack.c.b16 %v2468_v31, %v2468_v31 }
0x1051   : > { %2896 = vmatmul.msk.bf16.vlgmr.msra.gmra.mxu1 %vm862_vm3, %v2469_v37 }
0x10ce   : > { %v2494_v33 = vpop.f32.mrf.mxu1 }
0x10cf   : > { %v2495_v35 = vadd.f32 %v3021_v34, %v2494_v33 }
0x10d1   : > { %v2498_v42 = vmax.f32 %v2495_v35, 0.0 }
0x10d3   : > { %v2499_v36 = vpack.c.bf16 %v2498_v42, %v2498_v42 }
0x10d5   : > { %2913 = vmatmul.msk.bf16.vlgmr.msra.gmra.mxu2 %vm1551_vm14, %v2499_v36 }
0x10d6   : > { %v2496_v38 = vpop.f32.mrf.mxu1 }
0x1158   : > { %v2548_v40 = vpop.f32.mrf.mxu2 }
0x1159   : > { %v2549_v44 = vadd.f32 %v3022_v39, %v2548_v40 }
0x115b   : > { %2557 = vrot.lane.b32.xlu1 %v2549_v44, %s3905_s2  ;;  %2553 = vrot.lane.b32.xlu0 %v2549_v44, %s3895_s25 }
0x1160   : > { %v2550_v55 = vpop.f32.mrf.mxu2 }
0x11cd   : > { %v2554_v45 = vpop.permute.xlu0 %2553  ;;  %v2558_v47 = vpop.permute.xlu1 %2557 }
0x11ce   : > { %v2556_v46 = vmax.f32 %v2549_v44, %v2554_v45 }
0x11d0   : > { %v2560_v50 = vmax.f32 %v2556_v46, %v2558_v47 }
0x11d2   : > { %2571 = vrot.lane.b32.xlu0 %v2560_v50, %s3142_s1  ;;  %2565 = vrot.lane.b32.xlu2 %v2560_v50, %s3903_s27  ;;  %v2561_v57 = vsub.f32 %v2549_v44, %v2560_v50 }
0x11d4   : > { %v2562_v58 = vmul.f32 1.442695, %v2561_v57 }
0x122c   : > { %v2566_v48 = vpop.permute.xlu2 %2565 }
0x122d   : > { %v2568_v49 = vsub.f32 %v2549_v44, %v2566_v48 }
0x122f   : > { %v2569_v51 = vmul.f32 1.442695, %v2568_v49 }
0x1231   : > { %3109 = vpow2.f32 %v2569_v51 }
0x1237   : > { %v3110_v52 = vpop.eup %3109 }
0x1238   : > { %2578 = vrot.lane.b32.xlu1 %v3110_v52, %s3895_s25 }
0x1244   : > { %v2572_v53 = vpop.permute.xlu0 %2571 }
0x1245   : > { %v2574_v54 = vsub.f32 %v2549_v44, %v2572_v53 }
0x1247   : > { %v2575_v3 = vmul.f32 1.442695, %v2574_v54 }
0x1249   : > { %3111 = vpow2.f32 %v2575_v3 }
0x124a   : > { %3113 = vpow2.f32 %v2562_v58 }
0x124f   : > { %v3112_v56 = vpop.eup %3111 }
0x1250   : > { %2583 = vrot.lane.b32.xlu0 %v3112_v56, %s3905_s2  ;;  %v3114_v7 = vpop.eup %3113 }
0x12aa   : > { %v2579_v59 = vpop.permute.xlu1 %2578 }
0x12ab   : > { %v2581_v60 = vadd.f32 %v3114_v7, %v2579_v59 }
0x12c2   : > { %v2584_v61 = vpop.permute.xlu0 %2583 }
0x12c3   : > { %v2586_v29 = vadd.f32 %v2584_v61, %v2581_v60 }
0x12c5   : > { %3115 = vrcp.f32 %v2586_v29  ;;  %v2598_v30 = vand.u32 2147483648, %v2586_v29  ;;  %v2596_v4 = vand.u32 2147483647, %v2586_v29  ;;  %vm2592_vm14 = vweird.f32 %v2586_v29 }
0x12c7   : > { %v2599_v6 = vor.u32 1.1754944e-38, %v2598_v30  ;;  %vm2597_vm7 = vcmp.eq.f32.partialorder %v2596_v4, 8.507059e+37 }
0x12cb   : > { %v3116_v63 = vpop.eup %3115 }
0x12cc   : > { %v2588_v0 = vmul.f32 %v3116_v63, %v2586_v29  ;;  %vm2593_vm3 = vweird.f32 %v3116_v63 }
0x12cd   : > { %vm2594_vm1 = vmor %vm2592_vm14, %vm2593_vm3 }
0x12ce   : > { %v2589_v1 = vsub.f32 1.0, %v2588_v0 }
0x12d0   : > { %v2590_v2 = vmul.f32 %v3116_v63, %v2589_v1 }
0x12d2   : > { %v2591_v5 = vadd.f32 %v3116_v63, %v2590_v2 }
0x12d4   : > { %v2595_v8 = vsel %vm2594_vm1, %v3116_v63, %v2591_v5 }
0x12d5   : > { %v2600_v41 = vsel %vm2597_vm7, %v2599_v6, %v2595_v8 }
0x12d6   : > { %2626 = vrot.lane.b32.xlu1 %v2600_v41, %s3142_s1  ;;  %v2602_v9 = vmul.f32 %v3114_v7, %v2600_v41  ;;  %2610 = vrot.lane.b32.xlu2 %v2600_v41, %s3903_s27 }
0x12d8   : > { %v2604_v11 = vrot.slane %v2602_v9, 1  ;;  %2607 = vst.msk [vmem:[%s753_s30] sm:$0x1] %vm2606_vm8, %v2602_v9 }
0x12da   : > { %2608 = vst.msk [vmem:[%s753_s30 + $0x4] sm:$0x1] %vm2606_vm8, %v2604_v11 }
0x1330   : > { %v2611_v12 = vpop.permute.xlu2 %2610 }
0x1331   : > { %v2613_v43 = vmul.f32 %v3110_v52, %v2611_v12 }
0x1333   : > { %v2615_v13 = vrot.slane %v2613_v43, 1  ;;  %v2616_v14 = vperm.slane %v2613_v43, 0 }
0x1335   : > { %v2617_v15 = vperm.slane %v2615_v13, 0  ;;  %2618 = vrot.lane.b32.xlu0 %v2616_v14, %s3895_s25 }
0x1337   : > { %2620 = vrot.lane.b32.xlu1 %v2617_v15, %s3895_s25 }
0x1348   : > { %v2627_v16 = vpop.permute.xlu1 %2626 }
0x1349   : > { %v2629_v17 = vmul.f32 %v3112_v56, %v2627_v16 }
0x134b   : > { %v2631_v18 = vrot.slane %v2629_v17, 1  ;;  %v2632_v19 = vperm.slane %v2629_v17, 0 }
0x134d   : > { %v2633_v20 = vperm.slane %v2631_v18, 0  ;;  %2634 = vrot.lane.b32.xlu2 %v2632_v19, %s3905_s2 }
0x134f   : > { %2636 = vrot.lane.b32.xlu0 %v2633_v20, %s3905_s2 }
0x13a7   : > { %v2619_v21 = vpop.permute.xlu0 %2618  ;;  %v2635_v22 = vpop.permute.xlu2 %2634 }
0x13a8   : > { %2624 = vst.msk [vmem:[%s753_s30 + $0x1] sm:$0x1] %vm2606_vm8, %v2619_v21 }
0x13a9   : > { %2640 = vst.msk [vmem:[%s753_s30 + $0x2] sm:$0x1] %vm2606_vm8, %v2635_v22  ;;  %v2621_v23 = vpop.permute.xlu1 %2620 }
0x13aa   : > { %2625 = vst.msk [vmem:[%s753_s30 + $0x5] sm:$0x1] %vm2606_vm8, %v2621_v23 }
0x13c1   : > { %v2637_v24 = vpop.permute.xlu0 %2636 }
0x13c2   : > { %2641 = vst.msk [vmem:[%s753_s30 + $0x6] sm:$0x1] %vm2606_vm8, %v2637_v24 }
0x13c3 PF: > { %s33_s4 = sadd.s32 1, %s3123_s4  }
0x13c4   : > { %p30_p4 = scmp.ge.s32.totalorder %s33_s4, 4  }
0x13c6   :  { %32 = sbr.rel (!%p30_p4) target bundleno = 9 (0x9), region = 160 }

</bundles_post_ra>
